<compile_context>
chip_gen: v6e
topology: v6e:2x2x1
jax: 0.10.0
libtpu: 0.0.40
codegen_flags: <defaults>
</compile_context>

<pallas_src>
import jax
import jax.numpy as jnp
from jax.experimental import pallas as pl
from jax.experimental.pallas import tpu as pltpu


def _round_up(x, m):
    return ((x + m - 1) // m) * m


def _pad_to(a, shape):
    out = jnp.zeros(shape, a.dtype)
    return out.at[tuple(slice(0, s) for s in a.shape)].set(a)


def _vmem_tile_bytes(shape, dtype_bytes=4):
    """(8,128)-tiled VMEM footprint of an array (f32 by default)."""
    shape = tuple(shape)
    if len(shape) == 1:
        shape = (1,) + shape
    lead = 1
    for s in shape[:-2]:
        lead *= int(s)
    return lead * _round_up(int(shape[-2]), 8) * _round_up(int(shape[-1]), 128) * dtype_bytes


# ----------------------------------------------------------------------------
# Fused kernel: Time2Vec + masked LSTM + edge_out_layer + dst sum-reduce,
# with NodeUpdate + fc fused into the last grid step.
# ----------------------------------------------------------------------------
def _make_kernel(T, De, Ht, H, G, TE, rchunk):

    def kernel(e_ref, tim_ref, len_ref, srch_ref, dst_ref,
               selfh_ref, norm_ref,
               tw_ref, tb_ref, win_ref, whh_ref, b4_ref,
               weos_ref, weoh_ref, beo_ref,
               wnls_ref, wnlh_ref, bnl_ref, wfc_ref, bfc_ref,
               out_ref, agg_ref, xp_ref):
        NdP = agg_ref.shape[0]

        # zero the destination-node accumulator on the first edge tile
        @pl.when(pl.program_id(0) == 0)
        def _():
            agg_ref[...] = jnp.zeros_like(agg_ref)

        # ---- Phase 1: Time2Vec + fused LSTM input projection (off the serial
        #      path). Bias / weight broadcasts hoisted out of the time loop.
        e_all = e_ref[...]                                     # (TE, T*De)
        tim = tim_ref[...]                                     # (TE, T)
        win = win_ref[...]                                     # (Din, G)
        twb = jnp.broadcast_to(tw_ref[...], (TE, Ht))
        tbb = jnp.broadcast_to(tb_ref[...], (TE, Ht))
        b4b = jnp.broadcast_to(b4_ref[...], (TE, G))
        col = jax.lax.broadcasted_iota(jnp.int32, (TE, Ht), 1)
        sin_mask = col < (Ht - 1)
        for t in range(T):
            e_t = e_all[:, t * De:(t + 1) * De]                # (TE, De)
            tau = tim[:, t:t + 1]                              # (TE, 1)
            raw = tau * twb + tbb                              # (TE, Ht)
            te = jnp.where(sin_mask, jnp.sin(raw), raw)        # Time2Vec
            x_t = jnp.concatenate([e_t, te], axis=1)           # (TE, Din)
            xp_ref[t * TE:(t + 1) * TE, :] = (
                jnp.dot(x_t, win, preferred_element_type=jnp.float32) + b4b)

        # ---- Phase 2: length-masked LSTM recurrence.  Gates packed into one
        #      G-wide lane-aligned block; edges processed in sub-chunks so one
        #      chunk's h/c/gates stay vreg-resident on the serial path.
        whh = whh_ref[...]                                     # (H, G)
        elen = len_ref[...]                                    # (TE, 1) int32
        h_chunks = []
        for c0 in range(0, TE, rchunk):
            sz = min(rchunk, TE - c0)
            lenc = elen[c0:c0 + sz, :]                         # (sz, 1)
            h = jnp.zeros((sz, H), jnp.float32)
            c = jnp.zeros((sz, H), jnp.float32)
            for t in range(T):
                gates = (xp_ref[t * TE + c0:t * TE + c0 + sz, :]
                         + jnp.dot(h, whh, preferred_element_type=jnp.float32))
                # single sigmoid + single tanh pass over the packed gate block
                sg = jax.nn.sigmoid(gates)                     # (sz, G)
                th = jnp.tanh(gates)                           # (sz, G)
                i_g = sg[:, 0 * H:1 * H]
                f_g = sg[:, 1 * H:2 * H]
                g_g = th[:, 2 * H:3 * H]
                o_g = sg[:, 3 * H:4 * H]
                c_new = f_g * c + i_g * g_g
                h_new = o_g * jnp.tanh(c_new)
                valid = lenc > t                               # length mask
                h = jnp.where(valid, h_new, h)
                c = jnp.where(valid, c_new, c)
            h_chunks.append(h)
        h_all = h_chunks[0] if len(h_chunks) == 1 else jnp.concatenate(h_chunks, axis=0)

        # ---- message: relu(edge_out_layer(cat(src_h, lstm_h))) ----
        m = jnp.maximum(
            jnp.dot(srch_ref[...], weos_ref[...], preferred_element_type=jnp.float32)
            + jnp.dot(h_all, weoh_ref[...], preferred_element_type=jnp.float32)
            + beo_ref[...], 0.0)                               # (TE, H)

        # ---- reduce: in-kernel one-hot scatter-add onto destination nodes.
        #      Padded edges carry dst = -1 and therefore never hit a row.
        rows = jax.lax.broadcasted_iota(jnp.int32, (NdP, TE), 0)
        onehot = (rows == dst_ref[...]).astype(jnp.float32)    # (NdP, TE)
        agg_ref[...] += jnp.dot(onehot, m, preferred_element_type=jnp.float32)

        # ---- NodeUpdate + fc, fused into the last edge tile ----
        @pl.when(pl.program_id(0) == pl.num_programs(0) - 1)
        def _():
            self_h = selfh_ref[...]                            # (NdP, Dn)
            self_h_tmp = (jnp.dot(self_h, weos_ref[...],
                                  preferred_element_type=jnp.float32)
                          + beo_ref[...])                      # (NdP, H)
            hh = (agg_ref[...] - self_h_tmp) * norm_ref[...]
            z = jnp.maximum(
                jnp.dot(self_h, wnls_ref[...], preferred_element_type=jnp.float32)
                + jnp.dot(hh, wnlh_ref[...], preferred_element_type=jnp.float32)
                + bnl_ref[...], 0.0)
            out_ref[...] = (jnp.dot(z, wfc_ref[...],
                                    preferred_element_type=jnp.float32)
                            + bfc_ref[...])

    return kernel


# ----------------------------------------------------------------------------
# Wrapper = ETLSTMTrain.forward for one DGL block (num_layers = 1).
# ----------------------------------------------------------------------------
def etlstm_forward(features, edge_features, seq_times, edge_len,
                   src_idx, dst_idx, subg_norm, params, num_dst):
    E, T, De = edge_features.shape
    Dn = features.shape[1]
    Ht = params["tw"].shape[1]
    H = params["whhT"].shape[0]
    C = params["wfcT"].shape[1]
    Din = De + Ht
    assert params["wihT"].shape[0] == Din

    G = _round_up(4 * H, 128)       # packed gate block (lane aligned)
    Cp = _round_up(C, 128)          # lane-dense final output
    NdP = _round_up(num_dst, 8)     # sublane-aligned dst-node count

    # ---- edge tile selection under a VMEM budget safe on v7x (64 MiB) ----
    def tile_bytes(te):
        xp = T * _vmem_tile_bytes((te, G))
        blocks = 2 * (_vmem_tile_bytes((te, T * De)) + _vmem_tile_bytes((te, T))
                      + _vmem_tile_bytes((te, 1)) + _vmem_tile_bytes((te, Dn))
                      + _vmem_tile_bytes((1, te)))
        return xp + blocks

    te_cap = 512                    # multiple of 128 (dst block constraint)
    while te_cap > 128 and tile_bytes(te_cap) > (24 << 20):
        te_cap //= 2
    if E <= te_cap:
        TE = _round_up(E, 8)
        Ep = TE
    else:
        TE = te_cap
        Ep = _round_up(E, TE)
    n_tiles = Ep // TE
    # recurrence sub-chunk: target ~8 vregs of gates per chunk
    RCHUNK = min(TE, max(8, ((8192 // G) // 8) * 8))

    # ---- weights: keep natural gate order [i|f|g|o], pad once to G lanes ----
    win = _pad_to(params["wihT"], (Din, G))                    # (Din, G)
    whh = _pad_to(params["whhT"], (H, G))                      # (H, G)
    b4 = _pad_to(params["bih"] + params["bhh"], (1, G))        # (1, G)
    weos = params["weoT"][:Dn]                                 # (Dn, H)
    weoh = params["weoT"][Dn:]                                 # (H, H)
    beo = params["beo"]                                        # (1, H)
    wnls = params["wnlT"][:Dn]
    wnlh = params["wnlT"][Dn:]
    bnl = params["bnl"]
    wfc = _pad_to(params["wfcT"], (H, Cp))
    bfc = _pad_to(params["bfc"], (1, Cp))
    tw, tb = params["tw"], params["tb"]

    # ---- per-edge / per-node data (no time-major transpose) ----
    e2 = _pad_to(edge_features.reshape(E, T * De), (Ep, T * De))
    tim2 = _pad_to(seq_times, (Ep, T))
    len2 = _pad_to(edge_len.astype(jnp.int32).reshape(E, 1), (Ep, 1))  # pad len=0
    srch = _pad_to(features[src_idx], (Ep, Dn))
    # real edges must have dst_idx in [0, num_dst) (DGL block convention);
    # padded edges get dst = -1 so the one-hot scatter ignores them.
    dst2 = jnp.full((1, Ep), -1, jnp.int32).at[0, :E].set(dst_idx.astype(jnp.int32))
    selfh = _pad_to(features[:num_dst], (NdP, Dn))
    norm = _pad_to(subg_norm.astype(jnp.float32), (NdP, 1))

    edge_args = (e2, tim2, len2, srch, dst2)
    const_args = (selfh, norm, tw, tb, win, whh, b4,
                  weos, weoh, beo, wnls, wnlh, bnl, wfc, bfc)

    in_specs = ([pl.BlockSpec((TE, T * De), lambda i: (i, 0)),
                 pl.BlockSpec((TE, T), lambda i: (i, 0)),
                 pl.BlockSpec((TE, 1), lambda i: (i, 0)),
                 pl.BlockSpec((TE, Dn), lambda i: (i, 0)),
                 pl.BlockSpec((1, TE), lambda i: (0, i))]
                + [pl.BlockSpec(a.shape, lambda i: (0, 0)) for a in const_args])

    # ---- cost estimate & need-derived VMEM limit ----
    flops = int(2 * Ep * T * (Din + H) * G
                + 2 * Ep * (Dn + H) * H
                + 2 * NdP * Ep * H
                + 2 * NdP * (2 * (Dn + H) * H + H * Cp))
    transcendentals = int(Ep * T * (Ht + 2 * G + H))
    bytes_accessed = int(4 * (sum(int(a.size) for a in edge_args + const_args)
                              + NdP * Cp))

    need = tile_bytes(TE)
    need += sum(_vmem_tile_bytes(a.shape) for a in const_args)
    need += _vmem_tile_bytes((NdP, H)) + 2 * _vmem_tile_bytes((NdP, Cp))
    vmem_limit = int(min(max(int(1.25 * need) + (2 << 20), 16 << 20), 96 << 20))

    kernel = _make_kernel(T, De, Ht, H, G, TE, RCHUNK)

    out_p = pl.pallas_call(
        kernel,
        grid=(n_tiles,),
        in_specs=in_specs,
        out_specs=pl.BlockSpec((NdP, Cp), lambda i: (0, 0)),
        out_shape=jax.ShapeDtypeStruct((NdP, Cp), jnp.float32),
        scratch_shapes=[pltpu.VMEM((NdP, H), jnp.float32),        # agg accumulator
                        pltpu.VMEM((T * TE, G), jnp.float32)],    # hoisted x-proj
        compiler_params=pltpu.CompilerParams(
            dimension_semantics=("arbitrary",),
            vmem_limit_bytes=vmem_limit),
        cost_estimate=pl.CostEstimate(flops=flops,
                                      transcendentals=transcendentals,
                                      bytes_accessed=bytes_accessed),
    )(*edge_args, *const_args)

    return out_p[:num_dst, :C]


# ----------------------------------------------------------------------------
# Pure-JAX reference (same math) for verification.
# ----------------------------------------------------------------------------
def etlstm_reference(features, edge_features, seq_times, edge_len,
                     src_idx, dst_idx, subg_norm, params, num_dst):
    E, T, De = edge_features.shape
    Ht = params["tw"].shape[1]
    H = params["whhT"].shape[0]

    tau = seq_times.reshape(-1, 1)
    raw = tau * params["tw"] + params["tb"]
    te = jnp.concatenate([jnp.sin(raw[:, :Ht - 1]), raw[:, Ht - 1:]], axis=1)
    te = te.reshape(E, T, Ht)
    x = jnp.concatenate([edge_features, te], axis=-1)                # (E, T, Din)

    h = jnp.zeros((E, H), jnp.float32)
    c = jnp.zeros((E, H), jnp.float32)
    bias = params["bih"] + params["bhh"]
    for t in range(T):
        gates = x[:, t, :] @ params["wihT"] + h @ params["whhT"] + bias
        i_g = jax.nn.sigmoid(gates[:, :H])
        f_g = jax.nn.sigmoid(gates[:, H:2 * H])
        g_g = jnp.tanh(gates[:, 2 * H:3 * H])
        o_g = jax.nn.sigmoid(gates[:, 3 * H:])
        c_new = f_g * c + i_g * g_g
        h_new = o_g * jnp.tanh(c_new)
        valid = (edge_len > t)[:, None]
        h = jnp.where(valid, h_new, h)
        c = jnp.where(valid, c_new, c)

    src_h = features[src_idx]
    m = jax.nn.relu(jnp.concatenate([src_h, h], axis=1) @ params["weoT"]
                    + params["beo"])
    agg = jax.ops.segment_sum(m, dst_idx, num_segments=num_dst)

    self_h = features[:num_dst]
    self_h_tmp = (jnp.concatenate([self_h, jnp.zeros((num_dst, H))], axis=1)
                  @ params["weoT"] + params["beo"])
    hh = (agg - self_h_tmp) * subg_norm
    z = jax.nn.relu(jnp.concatenate([self_h, hh], axis=1) @ params["wnlT"]
                    + params["bnl"])
    return z @ params["wfcT"] + params["bfc"]


if __name__ == "__main__":
    # config (num_layers=1, num_lstm_layers=1, bidirectional=False, dropout=None)
    Dn, H, De, Ht, C = 8, 16, 4, 8, 3    # node_in, node_hidden, edge_in, time_hidden, classes
    T, E, N_src, N_dst = 6, 16, 12, 6
    Din = De + Ht

    key = jax.random.PRNGKey(0)
    ks = jax.random.split(key, 16)
    s = 0.1

    params = {
        # SineActivation (Time2Vec): [sin weights (Ht-1) | linear w0], same for bias
        "tw":   s * jax.random.normal(ks[0], (1, Ht), jnp.float32),
        "tb":   s * jax.random.normal(ks[1], (1, Ht), jnp.float32),
        # LSTM (PyTorch layout, pre-transposed): W_ih (4H, Din) -> (Din, 4H)
        "wihT": s * jax.random.normal(ks[2], (Din, 4 * H), jnp.float32),
        "whhT": s * jax.random.normal(ks[3], (H, 4 * H), jnp.float32),
        "bih":  s * jax.random.normal(ks[4], (1, 4 * H), jnp.float32),
        "bhh":  s * jax.random.normal(ks[5], (1, 4 * H), jnp.float32),
        # edge_out_layer: Linear(Dn + H, H), pre-transposed
        "weoT": s * jax.random.normal(ks[6], (Dn + H, H), jnp.float32),
        "beo":  s * jax.random.normal(ks[7], (1, H), jnp.float32),
        # NodeUpdate.layer: Linear(Dn + H, H), pre-transposed
        "wnlT": s * jax.random.normal(ks[8], (Dn + H, H), jnp.float32),
        "bnl":  s * jax.random.normal(ks[9], (1, H), jnp.float32),
        # fc: Linear(H, C), pre-transposed
        "wfcT": s * jax.random.normal(ks[10], (H, C), jnp.float32),
        "bfc":  s * jax.random.normal(ks[11], (1, C), jnp.float32),
    }

    # synthetic DGL-block data
    features = jax.random.normal(ks[12], (N_src, Dn), jnp.float32)
    edge_features = jax.random.normal(ks[13], (E, T, De), jnp.float32)
    seq_times = jnp.abs(jax.random.normal(ks[14], (E, T), jnp.float32))
    edge_len = (jax.random.randint(ks[15], (E,), 1, T + 1)).astype(jnp.int32)
    src_idx = jnp.arange(E, dtype=jnp.int32) % N_src
    dst_idx = jnp.arange(E, dtype=jnp.int32) % N_dst
    deg = jax.ops.segment_sum(jnp.ones((E,), jnp.float32), dst_idx, N_dst)
    subg_norm = (1.0 / jnp.maximum(deg, 1.0))[:, None]               # (Nd, 1)

    out = etlstm_forward(features, edge_features, seq_times, edge_len,
                         src_idx, dst_idx, subg_norm, params, N_dst)
    out = jax.block_until_ready(out)

    ref = etlstm_reference(features, edge_features, seq_times, edge_len,
                           src_idx, dst_idx, subg_norm, params, N_dst)
    assert out.shape == (N_dst, C)
    # (default TPU matmul precision is the same on both paths; the packed-gate
    #  and zero-padded layouts used in the kernel are numerically exact)
    assert jnp.allclose(out, ref, rtol=2e-4, atol=2e-4), (out, ref)

    print("KERNEL_OK")
</pallas_src>

<mosaic_0001>
module attributes {stable_mosaic.version = 11 : i64} {
  func.func @kernel(%arg0: i32, %arg1: memref<16x24xf32, #tpu.memory_space<vmem>>, %arg2: memref<16x6xf32, #tpu.memory_space<vmem>>, %arg3: memref<16x1xi32, #tpu.memory_space<vmem>>, %arg4: memref<16x8xf32, #tpu.memory_space<vmem>>, %arg5: memref<1x16xi32, #tpu.memory_space<vmem>>, %arg6: memref<8x8xf32, #tpu.memory_space<vmem>>, %arg7: memref<8x1xf32, #tpu.memory_space<vmem>>, %arg8: memref<1x8xf32, #tpu.memory_space<vmem>>, %arg9: memref<1x8xf32, #tpu.memory_space<vmem>>, %arg10: memref<12x128xf32, #tpu.memory_space<vmem>>, %arg11: memref<16x128xf32, #tpu.memory_space<vmem>>, %arg12: memref<1x128xf32, #tpu.memory_space<vmem>>, %arg13: memref<8x16xf32, #tpu.memory_space<vmem>>, %arg14: memref<16x16xf32, #tpu.memory_space<vmem>>, %arg15: memref<1x16xf32, #tpu.memory_space<vmem>>, %arg16: memref<8x16xf32, #tpu.memory_space<vmem>>, %arg17: memref<16x16xf32, #tpu.memory_space<vmem>>, %arg18: memref<1x16xf32, #tpu.memory_space<vmem>>, %arg19: memref<16x128xf32, #tpu.memory_space<vmem>>, %arg20: memref<1x128xf32, #tpu.memory_space<vmem>>, %arg21: memref<8x128xf32, #tpu.memory_space<vmem>>, %arg22: memref<8x16xf32, #tpu.memory_space<vmem>>, %arg23: memref<96x128xf32, #tpu.memory_space<vmem>>) attributes {dimension_semantics = [#tpu.dimension_semantics<arbitrary>], iteration_bounds = array<i64: 1>, scalar_prefetch = 0 : i64, scratch_operands = 2 : i64, tpu.core_type = #tpu.core_type<tc>, window_params = [{transform_indices = @transform_0, window_bounds = array<i64: 16, 24>}, {transform_indices = @transform_1, window_bounds = array<i64: 16, 6>}, {transform_indices = @transform_2, window_bounds = array<i64: 16, 1>}, {transform_indices = @transform_3, window_bounds = array<i64: 16, 8>}, {transform_indices = @transform_4, window_bounds = array<i64: 1, 16>}, {pipeline_mode = #tpu.pipeline_mode<synchronous>, transform_indices = @transform_5, window_bounds = array<i64: 8, 8>}, {pipeline_mode = #tpu.pipeline_mode<synchronous>, transform_indices = @transform_6, window_bounds = array<i64: 8, 1>}, {pipeline_mode = #tpu.pipeline_mode<synchronous>, transform_indices = @transform_7, window_bounds = array<i64: 1, 8>}, {pipeline_mode = #tpu.pipeline_mode<synchronous>, transform_indices = @transform_8, window_bounds = array<i64: 1, 8>}, {pipeline_mode = #tpu.pipeline_mode<synchronous>, transform_indices = @transform_9, window_bounds = array<i64: 12, 128>}, {pipeline_mode = #tpu.pipeline_mode<synchronous>, transform_indices = @transform_10, window_bounds = array<i64: 16, 128>}, {pipeline_mode = #tpu.pipeline_mode<synchronous>, transform_indices = @transform_11, window_bounds = array<i64: 1, 128>}, {pipeline_mode = #tpu.pipeline_mode<synchronous>, transform_indices = @transform_12, window_bounds = array<i64: 8, 16>}, {pipeline_mode = #tpu.pipeline_mode<synchronous>, transform_indices = @transform_13, window_bounds = array<i64: 16, 16>}, {pipeline_mode = #tpu.pipeline_mode<synchronous>, transform_indices = @transform_14, window_bounds = array<i64: 1, 16>}, {pipeline_mode = #tpu.pipeline_mode<synchronous>, transform_indices = @transform_15, window_bounds = array<i64: 8, 16>}, {pipeline_mode = #tpu.pipeline_mode<synchronous>, transform_indices = @transform_16, window_bounds = array<i64: 16, 16>}, {pipeline_mode = #tpu.pipeline_mode<synchronous>, transform_indices = @transform_17, window_bounds = array<i64: 1, 16>}, {pipeline_mode = #tpu.pipeline_mode<synchronous>, transform_indices = @transform_18, window_bounds = array<i64: 16, 128>}, {pipeline_mode = #tpu.pipeline_mode<synchronous>, transform_indices = @transform_19, window_bounds = array<i64: 1, 128>}, {pipeline_mode = #tpu.pipeline_mode<synchronous>, transform_indices = @transform_20, window_bounds = array<i64: 8, 128>}]} {
    %c0_i32 = arith.constant 0 : i32
    %0 = arith.cmpi eq, %arg0, %c0_i32 : i32
    %1 = arith.extui %0 : i1 to i32
    %c0_i32_0 = arith.constant 0 : i32
    %2 = arith.cmpi ne, %1, %c0_i32_0 : i32
    scf.if %2 {
      %cst_75 = arith.constant 0.000000e+00 : f32
      %265 = vector.broadcast %cst_75 : f32 to vector<8x16xf32>
      %c0_76 = arith.constant 0 : index
      %c0_77 = arith.constant 0 : index
      %266 = vector.load %arg22[%c0_76, %c0_77] : memref<8x16xf32, #tpu.memory_space<vmem>>, vector<8x16xf32>
      tpu.vector_store %arg22[%c0_76, %c0_77], %265 {strides = array<i32>} : memref<8x16xf32, #tpu.memory_space<vmem>>, vector<8x16xf32>,
    } else {
    }
    %c0 = arith.constant 0 : index
    %c0_1 = arith.constant 0 : index
    %3 = vector.load %arg1[%c0, %c0_1] : memref<16x24xf32, #tpu.memory_space<vmem>>, vector<16x24xf32>
    %c0_2 = arith.constant 0 : index
    %c0_3 = arith.constant 0 : index
    %4 = vector.load %arg2[%c0_2, %c0_3] : memref<16x6xf32, #tpu.memory_space<vmem>>, vector<16x6xf32>
    %c0_4 = arith.constant 0 : index
    %c0_5 = arith.constant 0 : index
    %5 = vector.load %arg10[%c0_4, %c0_5] : memref<12x128xf32, #tpu.memory_space<vmem>>, vector<12x128xf32>
    %c0_6 = arith.constant 0 : index
    %c0_7 = arith.constant 0 : index
    %6 = vector.load %arg8[%c0_6, %c0_7] : memref<1x8xf32, #tpu.memory_space<vmem>>, vector<1x8xf32>
    %7 = vector.shape_cast %6 : vector<1x8xf32> to vector<1x8xf32>
    %8 = vector.broadcast %7 : vector<1x8xf32> to vector<16x8xf32>
    %c0_8 = arith.constant 0 : index
    %c0_9 = arith.constant 0 : index
    %9 = vector.load %arg9[%c0_8, %c0_9] : memref<1x8xf32, #tpu.memory_space<vmem>>, vector<1x8xf32>
    %10 = vector.shape_cast %9 : vector<1x8xf32> to vector<1x8xf32>
    %11 = vector.broadcast %10 : vector<1x8xf32> to vector<16x8xf32>
    %c0_10 = arith.constant 0 : index
    %c0_11 = arith.constant 0 : index
    %12 = vector.load %arg12[%c0_10, %c0_11] : memref<1x128xf32, #tpu.memory_space<vmem>>, vector<1x128xf32>
    %13 = vector.shape_cast %12 : vector<1x128xf32> to vector<1x128xf32>
    %14 = vector.broadcast %13 : vector<1x128xf32> to vector<16x128xf32>
    %15 = tpu.iota {dimensions = array<i32: 1>} : vector<16x8xi32>
    %c7_i32 = arith.constant 7 : i32
    %16 = vector.broadcast %c7_i32 : i32 to vector<16x8xi32>
    %17 = arith.cmpi slt, %15, %16 : vector<16x8xi32>
    %18 = vector.extract_strided_slice %3 {offsets = [0, 0], sizes = [16, 4], strides = [1, 1]} : vector<16x24xf32> to vector<16x4xf32>
    %19 = vector.extract_strided_slice %4 {offsets = [0, 0], sizes = [16, 1], strides = [1, 1]} : vector<16x6xf32> to vector<16x1xf32>
    %20 = vector.broadcast %19 : vector<16x1xf32> to vector<16x8xf32>
    %21 = arith.mulf %20, %8 : vector<16x8xf32>
    %22 = arith.addf %21, %11 : vector<16x8xf32>
    %23 = math.sin %22 : vector<16x8xf32>
    %24 = arith.select %17, %23, %22 : vector<16x8xi1>, vector<16x8xf32>
    %25 = tpu.concatenate %18, %24 in 1 : vector<16x4xf32>, vector<16x8xf32> -> vector<16x12xf32>
    %cst = arith.constant dense<0.000000e+00> : vector<16x128xf32>
    %26 = tpu.matmul %25, %5, %cst {dimension_numbers = #tpu.dot_dimension_numbers<[1], [0], [0], [1], [0, 0, 1, 1], [], []>} : vector<16x12xf32>, vector<12x128xf32>, vector<16x128xf32> -> vector<16x128xf32>
    %27 = arith.addf %26, %14 : vector<16x128xf32>
    %c0_12 = arith.constant 0 : index
    %c0_13 = arith.constant 0 : index
    %28 = vector.load %arg23[%c0_12, %c0_13] : memref<96x128xf32, #tpu.memory_space<vmem>>, vector<16x128xf32>
    tpu.vector_store %arg23[%c0_12, %c0_13], %27 {strides = array<i32>} : memref<96x128xf32, #tpu.memory_space<vmem>>, vector<16x128xf32>,
    %29 = vector.extract_strided_slice %3 {offsets = [0, 4], sizes = [16, 4], strides = [1, 1]} : vector<16x24xf32> to vector<16x4xf32>
    %30 = vector.extract_strided_slice %4 {offsets = [0, 1], sizes = [16, 1], strides = [1, 1]} : vector<16x6xf32> to vector<16x1xf32>
    %31 = vector.broadcast %30 : vector<16x1xf32> to vector<16x8xf32>
    %32 = arith.mulf %31, %8 : vector<16x8xf32>
    %33 = arith.addf %32, %11 : vector<16x8xf32>
    %34 = math.sin %33 : vector<16x8xf32>
    %35 = arith.select %17, %34, %33 : vector<16x8xi1>, vector<16x8xf32>
    %36 = tpu.concatenate %29, %35 in 1 : vector<16x4xf32>, vector<16x8xf32> -> vector<16x12xf32>
    %cst_14 = arith.constant dense<0.000000e+00> : vector<16x128xf32>
    %37 = tpu.matmul %36, %5, %cst_14 {dimension_numbers = #tpu.dot_dimension_numbers<[1], [0], [0], [1], [0, 0, 1, 1], [], []>} : vector<16x12xf32>, vector<12x128xf32>, vector<16x128xf32> -> vector<16x128xf32>
    %38 = arith.addf %37, %14 : vector<16x128xf32>
    %c16 = arith.constant 16 : index
    %c0_15 = arith.constant 0 : index
    %39 = vector.load %arg23[%c16, %c0_15] : memref<96x128xf32, #tpu.memory_space<vmem>>, vector<16x128xf32>
    tpu.vector_store %arg23[%c16, %c0_15], %38 {strides = array<i32>} : memref<96x128xf32, #tpu.memory_space<vmem>>, vector<16x128xf32>,
    %40 = vector.extract_strided_slice %3 {offsets = [0, 8], sizes = [16, 4], strides = [1, 1]} : vector<16x24xf32> to vector<16x4xf32>
    %41 = vector.extract_strided_slice %4 {offsets = [0, 2], sizes = [16, 1], strides = [1, 1]} : vector<16x6xf32> to vector<16x1xf32>
    %42 = vector.broadcast %41 : vector<16x1xf32> to vector<16x8xf32>
    %43 = arith.mulf %42, %8 : vector<16x8xf32>
    %44 = arith.addf %43, %11 : vector<16x8xf32>
    %45 = math.sin %44 : vector<16x8xf32>
    %46 = arith.select %17, %45, %44 : vector<16x8xi1>, vector<16x8xf32>
    %47 = tpu.concatenate %40, %46 in 1 : vector<16x4xf32>, vector<16x8xf32> -> vector<16x12xf32>
    %cst_16 = arith.constant dense<0.000000e+00> : vector<16x128xf32>
    %48 = tpu.matmul %47, %5, %cst_16 {dimension_numbers = #tpu.dot_dimension_numbers<[1], [0], [0], [1], [0, 0, 1, 1], [], []>} : vector<16x12xf32>, vector<12x128xf32>, vector<16x128xf32> -> vector<16x128xf32>
    %49 = arith.addf %48, %14 : vector<16x128xf32>
    %c32 = arith.constant 32 : index
    %c0_17 = arith.constant 0 : index
    %50 = vector.load %arg23[%c32, %c0_17] : memref<96x128xf32, #tpu.memory_space<vmem>>, vector<16x128xf32>
    tpu.vector_store %arg23[%c32, %c0_17], %49 {strides = array<i32>} : memref<96x128xf32, #tpu.memory_space<vmem>>, vector<16x128xf32>,
    %51 = vector.extract_strided_slice %3 {offsets = [0, 12], sizes = [16, 4], strides = [1, 1]} : vector<16x24xf32> to vector<16x4xf32>
    %52 = vector.extract_strided_slice %4 {offsets = [0, 3], sizes = [16, 1], strides = [1, 1]} : vector<16x6xf32> to vector<16x1xf32>
    %53 = vector.broadcast %52 : vector<16x1xf32> to vector<16x8xf32>
    %54 = arith.mulf %53, %8 : vector<16x8xf32>
    %55 = arith.addf %54, %11 : vector<16x8xf32>
    %56 = math.sin %55 : vector<16x8xf32>
    %57 = arith.select %17, %56, %55 : vector<16x8xi1>, vector<16x8xf32>
    %58 = tpu.concatenate %51, %57 in 1 : vector<16x4xf32>, vector<16x8xf32> -> vector<16x12xf32>
    %cst_18 = arith.constant dense<0.000000e+00> : vector<16x128xf32>
    %59 = tpu.matmul %58, %5, %cst_18 {dimension_numbers = #tpu.dot_dimension_numbers<[1], [0], [0], [1], [0, 0, 1, 1], [], []>} : vector<16x12xf32>, vector<12x128xf32>, vector<16x128xf32> -> vector<16x128xf32>
    %60 = arith.addf %59, %14 : vector<16x128xf32>
    %c48 = arith.constant 48 : index
    %c0_19 = arith.constant 0 : index
    %61 = vector.load %arg23[%c48, %c0_19] : memref<96x128xf32, #tpu.memory_space<vmem>>, vector<16x128xf32>
    tpu.vector_store %arg23[%c48, %c0_19], %60 {strides = array<i32>} : memref<96x128xf32, #tpu.memory_space<vmem>>, vector<16x128xf32>,
    %62 = vector.extract_strided_slice %3 {offsets = [0, 16], sizes = [16, 4], strides = [1, 1]} : vector<16x24xf32> to vector<16x4xf32>
    %63 = vector.extract_strided_slice %4 {offsets = [0, 4], sizes = [16, 1], strides = [1, 1]} : vector<16x6xf32> to vector<16x1xf32>
    %64 = vector.broadcast %63 : vector<16x1xf32> to vector<16x8xf32>
    %65 = arith.mulf %64, %8 : vector<16x8xf32>
    %66 = arith.addf %65, %11 : vector<16x8xf32>
    %67 = math.sin %66 : vector<16x8xf32>
    %68 = arith.select %17, %67, %66 : vector<16x8xi1>, vector<16x8xf32>
    %69 = tpu.concatenate %62, %68 in 1 : vector<16x4xf32>, vector<16x8xf32> -> vector<16x12xf32>
    %cst_20 = arith.constant dense<0.000000e+00> : vector<16x128xf32>
    %70 = tpu.matmul %69, %5, %cst_20 {dimension_numbers = #tpu.dot_dimension_numbers<[1], [0], [0], [1], [0, 0, 1, 1], [], []>} : vector<16x12xf32>, vector<12x128xf32>, vector<16x128xf32> -> vector<16x128xf32>
    %71 = arith.addf %70, %14 : vector<16x128xf32>
    %c64 = arith.constant 64 : index
    %c0_21 = arith.constant 0 : index
    %72 = vector.load %arg23[%c64, %c0_21] : memref<96x128xf32, #tpu.memory_space<vmem>>, vector<16x128xf32>
    tpu.vector_store %arg23[%c64, %c0_21], %71 {strides = array<i32>} : memref<96x128xf32, #tpu.memory_space<vmem>>, vector<16x128xf32>,
    %73 = vector.extract_strided_slice %3 {offsets = [0, 20], sizes = [16, 4], strides = [1, 1]} : vector<16x24xf32> to vector<16x4xf32>
    %74 = vector.extract_strided_slice %4 {offsets = [0, 5], sizes = [16, 1], strides = [1, 1]} : vector<16x6xf32> to vector<16x1xf32>
    %75 = vector.broadcast %74 : vector<16x1xf32> to vector<16x8xf32>
    %76 = arith.mulf %75, %8 : vector<16x8xf32>
    %77 = arith.addf %76, %11 : vector<16x8xf32>
    %78 = math.sin %77 : vector<16x8xf32>
    %79 = arith.select %17, %78, %77 : vector<16x8xi1>, vector<16x8xf32>
    %80 = tpu.concatenate %73, %79 in 1 : vector<16x4xf32>, vector<16x8xf32> -> vector<16x12xf32>
    %cst_22 = arith.constant dense<0.000000e+00> : vector<16x128xf32>
    %81 = tpu.matmul %80, %5, %cst_22 {dimension_numbers = #tpu.dot_dimension_numbers<[1], [0], [0], [1], [0, 0, 1, 1], [], []>} : vector<16x12xf32>, vector<12x128xf32>, vector<16x128xf32> -> vector<16x128xf32>
    %82 = arith.addf %81, %14 : vector<16x128xf32>
    %c80 = arith.constant 80 : index
    %c0_23 = arith.constant 0 : index
    %83 = vector.load %arg23[%c80, %c0_23] : memref<96x128xf32, #tpu.memory_space<vmem>>, vector<16x128xf32>
    tpu.vector_store %arg23[%c80, %c0_23], %82 {strides = array<i32>} : memref<96x128xf32, #tpu.memory_space<vmem>>, vector<16x128xf32>,
    %c0_24 = arith.constant 0 : index
    %c0_25 = arith.constant 0 : index
    %84 = vector.load %arg11[%c0_24, %c0_25] : memref<16x128xf32, #tpu.memory_space<vmem>>, vector<16x128xf32>
    %c0_26 = arith.constant 0 : index
    %c0_27 = arith.constant 0 : index
    %85 = vector.load %arg3[%c0_26, %c0_27] : memref<16x1xi32, #tpu.memory_space<vmem>>, vector<16x1xi32>
    %cst_28 = arith.constant 0.000000e+00 : f32
    %86 = vector.broadcast %cst_28 : f32 to vector<16x16xf32>
    %cst_29 = arith.constant 0.000000e+00 : f32
    %87 = vector.broadcast %cst_29 : f32 to vector<16x16xf32>
    %c0_30 = arith.constant 0 : index
    %c0_31 = arith.constant 0 : index
    %88 = vector.load %arg23[%c0_30, %c0_31] : memref<96x128xf32, #tpu.memory_space<vmem>>, vector<16x128xf32>
    %cst_32 = arith.constant dense<0.000000e+00> : vector<16x128xf32>
    %89 = tpu.matmul %86, %84, %cst_32 {dimension_numbers = #tpu.dot_dimension_numbers<[1], [0], [0], [1], [0, 0, 1, 1], [], []>} : vector<16x16xf32>, vector<16x128xf32>, vector<16x128xf32> -> vector<16x128xf32>
    %90 = arith.addf %88, %89 : vector<16x128xf32>
    %91 = arith.negf %90 : vector<16x128xf32>
    %92 = math.exp %91 : vector<16x128xf32>
    %cst_33 = arith.constant 1.000000e+00 : f32
    %93 = vector.broadcast %cst_33 : f32 to vector<16x128xf32>
    %94 = arith.addf %93, %92 : vector<16x128xf32>
    %95 = arith.divf %93, %94 : vector<16x128xf32>
    %96 = math.tanh %90 : vector<16x128xf32>
    %97 = vector.extract_strided_slice %95 {offsets = [0, 0], sizes = [16, 16], strides = [1, 1]} : vector<16x128xf32> to vector<16x16xf32>
    %98 = vector.extract_strided_slice %95 {offsets = [0, 16], sizes = [16, 16], strides = [1, 1]} : vector<16x128xf32> to vector<16x16xf32>
    %99 = vector.extract_strided_slice %96 {offsets = [0, 32], sizes = [16, 16], strides = [1, 1]} : vector<16x128xf32> to vector<16x16xf32>
    %100 = vector.extract_strided_slice %95 {offsets = [0, 48], sizes = [16, 16], strides = [1, 1]} : vector<16x128xf32> to vector<16x16xf32>
    %101 = arith.mulf %98, %87 : vector<16x16xf32>
    %102 = arith.mulf %97, %99 : vector<16x16xf32>
    %103 = arith.addf %101, %102 : vector<16x16xf32>
    %104 = math.tanh %103 : vector<16x16xf32>
    %105 = arith.mulf %100, %104 : vector<16x16xf32>
    %c0_i32_34 = arith.constant 0 : i32
    %106 = vector.broadcast %c0_i32_34 : i32 to vector<16x1xi32>
    %107 = arith.cmpi sgt, %85, %106 : vector<16x1xi32>
    %108 = vector.shape_cast %107 : vector<16x1xi1> to vector<16x1xi1>
    %109 = vector.broadcast %108 : vector<16x1xi1> to vector<16x16xi1>
    %110 = arith.select %109, %105, %86 : vector<16x16xi1>, vector<16x16xf32>
    %111 = vector.shape_cast %107 : vector<16x1xi1> to vector<16x1xi1>
    %112 = vector.broadcast %111 : vector<16x1xi1> to vector<16x16xi1>
    %113 = arith.select %112, %103, %87 : vector<16x16xi1>, vector<16x16xf32>
    %c16_35 = arith.constant 16 : index
    %c0_36 = arith.constant 0 : index
    %114 = vector.load %arg23[%c16_35, %c0_36] : memref<96x128xf32, #tpu.memory_space<vmem>>, vector<16x128xf32>
    %cst_37 = arith.constant dense<0.000000e+00> : vector<16x128xf32>
    %115 = tpu.matmul %110, %84, %cst_37 {dimension_numbers = #tpu.dot_dimension_numbers<[1], [0], [0], [1], [0, 0, 1, 1], [], []>} : vector<16x16xf32>, vector<16x128xf32>, vector<16x128xf32> -> vector<16x128xf32>
    %116 = arith.addf %114, %115 : vector<16x128xf32>
    %117 = arith.negf %116 : vector<16x128xf32>
    %118 = math.exp %117 : vector<16x128xf32>
    %cst_38 = arith.constant 1.000000e+00 : f32
    %119 = vector.broadcast %cst_38 : f32 to vector<16x128xf32>
    %120 = arith.addf %119, %118 : vector<16x128xf32>
    %121 = arith.divf %119, %120 : vector<16x128xf32>
    %122 = math.tanh %116 : vector<16x128xf32>
    %123 = vector.extract_strided_slice %121 {offsets = [0, 0], sizes = [16, 16], strides = [1, 1]} : vector<16x128xf32> to vector<16x16xf32>
    %124 = vector.extract_strided_slice %121 {offsets = [0, 16], sizes = [16, 16], strides = [1, 1]} : vector<16x128xf32> to vector<16x16xf32>
    %125 = vector.extract_strided_slice %122 {offsets = [0, 32], sizes = [16, 16], strides = [1, 1]} : vector<16x128xf32> to vector<16x16xf32>
    %126 = vector.extract_strided_slice %121 {offsets = [0, 48], sizes = [16, 16], strides = [1, 1]} : vector<16x128xf32> to vector<16x16xf32>
    %127 = arith.mulf %124, %113 : vector<16x16xf32>
    %128 = arith.mulf %123, %125 : vector<16x16xf32>
    %129 = arith.addf %127, %128 : vector<16x16xf32>
    %130 = math.tanh %129 : vector<16x16xf32>
    %131 = arith.mulf %126, %130 : vector<16x16xf32>
    %c1_i32 = arith.constant 1 : i32
    %132 = vector.broadcast %c1_i32 : i32 to vector<16x1xi32>
    %133 = arith.cmpi sgt, %85, %132 : vector<16x1xi32>
    %134 = vector.shape_cast %133 : vector<16x1xi1> to vector<16x1xi1>
    %135 = vector.broadcast %134 : vector<16x1xi1> to vector<16x16xi1>
    %136 = arith.select %135, %131, %110 : vector<16x16xi1>, vector<16x16xf32>
    %137 = vector.shape_cast %133 : vector<16x1xi1> to vector<16x1xi1>
    %138 = vector.broadcast %137 : vector<16x1xi1> to vector<16x16xi1>
    %139 = arith.select %138, %129, %113 : vector<16x16xi1>, vector<16x16xf32>
    %c32_39 = arith.constant 32 : index
    %c0_40 = arith.constant 0 : index
    %140 = vector.load %arg23[%c32_39, %c0_40] : memref<96x128xf32, #tpu.memory_space<vmem>>, vector<16x128xf32>
    %cst_41 = arith.constant dense<0.000000e+00> : vector<16x128xf32>
    %141 = tpu.matmul %136, %84, %cst_41 {dimension_numbers = #tpu.dot_dimension_numbers<[1], [0], [0], [1], [0, 0, 1, 1], [], []>} : vector<16x16xf32>, vector<16x128xf32>, vector<16x128xf32> -> vector<16x128xf32>
    %142 = arith.addf %140, %141 : vector<16x128xf32>
    %143 = arith.negf %142 : vector<16x128xf32>
    %144 = math.exp %143 : vector<16x128xf32>
    %cst_42 = arith.constant 1.000000e+00 : f32
    %145 = vector.broadcast %cst_42 : f32 to vector<16x128xf32>
    %146 = arith.addf %145, %144 : vector<16x128xf32>
    %147 = arith.divf %145, %146 : vector<16x128xf32>
    %148 = math.tanh %142 : vector<16x128xf32>
    %149 = vector.extract_strided_slice %147 {offsets = [0, 0], sizes = [16, 16], strides = [1, 1]} : vector<16x128xf32> to vector<16x16xf32>
    %150 = vector.extract_strided_slice %147 {offsets = [0, 16], sizes = [16, 16], strides = [1, 1]} : vector<16x128xf32> to vector<16x16xf32>
    %151 = vector.extract_strided_slice %148 {offsets = [0, 32], sizes = [16, 16], strides = [1, 1]} : vector<16x128xf32> to vector<16x16xf32>
    %152 = vector.extract_strided_slice %147 {offsets = [0, 48], sizes = [16, 16], strides = [1, 1]} : vector<16x128xf32> to vector<16x16xf32>
    %153 = arith.mulf %150, %139 : vector<16x16xf32>
    %154 = arith.mulf %149, %151 : vector<16x16xf32>
    %155 = arith.addf %153, %154 : vector<16x16xf32>
    %156 = math.tanh %155 : vector<16x16xf32>
    %157 = arith.mulf %152, %156 : vector<16x16xf32>
    %c2_i32 = arith.constant 2 : i32
    %158 = vector.broadcast %c2_i32 : i32 to vector<16x1xi32>
    %159 = arith.cmpi sgt, %85, %158 : vector<16x1xi32>
    %160 = vector.shape_cast %159 : vector<16x1xi1> to vector<16x1xi1>
    %161 = vector.broadcast %160 : vector<16x1xi1> to vector<16x16xi1>
    %162 = arith.select %161, %157, %136 : vector<16x16xi1>, vector<16x16xf32>
    %163 = vector.shape_cast %159 : vector<16x1xi1> to vector<16x1xi1>
    %164 = vector.broadcast %163 : vector<16x1xi1> to vector<16x16xi1>
    %165 = arith.select %164, %155, %139 : vector<16x16xi1>, vector<16x16xf32>
    %c48_43 = arith.constant 48 : index
    %c0_44 = arith.constant 0 : index
    %166 = vector.load %arg23[%c48_43, %c0_44] : memref<96x128xf32, #tpu.memory_space<vmem>>, vector<16x128xf32>
    %cst_45 = arith.constant dense<0.000000e+00> : vector<16x128xf32>
    %167 = tpu.matmul %162, %84, %cst_45 {dimension_numbers = #tpu.dot_dimension_numbers<[1], [0], [0], [1], [0, 0, 1, 1], [], []>} : vector<16x16xf32>, vector<16x128xf32>, vector<16x128xf32> -> vector<16x128xf32>
    %168 = arith.addf %166, %167 : vector<16x128xf32>
    %169 = arith.negf %168 : vector<16x128xf32>
    %170 = math.exp %169 : vector<16x128xf32>
    %cst_46 = arith.constant 1.000000e+00 : f32
    %171 = vector.broadcast %cst_46 : f32 to vector<16x128xf32>
    %172 = arith.addf %171, %170 : vector<16x128xf32>
    %173 = arith.divf %171, %172 : vector<16x128xf32>
    %174 = math.tanh %168 : vector<16x128xf32>
    %175 = vector.extract_strided_slice %173 {offsets = [0, 0], sizes = [16, 16], strides = [1, 1]} : vector<16x128xf32> to vector<16x16xf32>
    %176 = vector.extract_strided_slice %173 {offsets = [0, 16], sizes = [16, 16], strides = [1, 1]} : vector<16x128xf32> to vector<16x16xf32>
    %177 = vector.extract_strided_slice %174 {offsets = [0, 32], sizes = [16, 16], strides = [1, 1]} : vector<16x128xf32> to vector<16x16xf32>
    %178 = vector.extract_strided_slice %173 {offsets = [0, 48], sizes = [16, 16], strides = [1, 1]} : vector<16x128xf32> to vector<16x16xf32>
    %179 = arith.mulf %176, %165 : vector<16x16xf32>
    %180 = arith.mulf %175, %177 : vector<16x16xf32>
    %181 = arith.addf %179, %180 : vector<16x16xf32>
    %182 = math.tanh %181 : vector<16x16xf32>
    %183 = arith.mulf %178, %182 : vector<16x16xf32>
    %c3_i32 = arith.constant 3 : i32
    %184 = vector.broadcast %c3_i32 : i32 to vector<16x1xi32>
    %185 = arith.cmpi sgt, %85, %184 : vector<16x1xi32>
    %186 = vector.shape_cast %185 : vector<16x1xi1> to vector<16x1xi1>
    %187 = vector.broadcast %186 : vector<16x1xi1> to vector<16x16xi1>
    %188 = arith.select %187, %183, %162 : vector<16x16xi1>, vector<16x16xf32>
    %189 = vector.shape_cast %185 : vector<16x1xi1> to vector<16x1xi1>
    %190 = vector.broadcast %189 : vector<16x1xi1> to vector<16x16xi1>
    %191 = arith.select %190, %181, %165 : vector<16x16xi1>, vector<16x16xf32>
    %c64_47 = arith.constant 64 : index
    %c0_48 = arith.constant 0 : index
    %192 = vector.load %arg23[%c64_47, %c0_48] : memref<96x128xf32, #tpu.memory_space<vmem>>, vector<16x128xf32>
    %cst_49 = arith.constant dense<0.000000e+00> : vector<16x128xf32>
    %193 = tpu.matmul %188, %84, %cst_49 {dimension_numbers = #tpu.dot_dimension_numbers<[1], [0], [0], [1], [0, 0, 1, 1], [], []>} : vector<16x16xf32>, vector<16x128xf32>, vector<16x128xf32> -> vector<16x128xf32>
    %194 = arith.addf %192, %193 : vector<16x128xf32>
    %195 = arith.negf %194 : vector<16x128xf32>
    %196 = math.exp %195 : vector<16x128xf32>
    %cst_50 = arith.constant 1.000000e+00 : f32
    %197 = vector.broadcast %cst_50 : f32 to vector<16x128xf32>
    %198 = arith.addf %197, %196 : vector<16x128xf32>
    %199 = arith.divf %197, %198 : vector<16x128xf32>
    %200 = math.tanh %194 : vector<16x128xf32>
    %201 = vector.extract_strided_slice %199 {offsets = [0, 0], sizes = [16, 16], strides = [1, 1]} : vector<16x128xf32> to vector<16x16xf32>
    %202 = vector.extract_strided_slice %199 {offsets = [0, 16], sizes = [16, 16], strides = [1, 1]} : vector<16x128xf32> to vector<16x16xf32>
    %203 = vector.extract_strided_slice %200 {offsets = [0, 32], sizes = [16, 16], strides = [1, 1]} : vector<16x128xf32> to vector<16x16xf32>
    %204 = vector.extract_strided_slice %199 {offsets = [0, 48], sizes = [16, 16], strides = [1, 1]} : vector<16x128xf32> to vector<16x16xf32>
    %205 = arith.mulf %202, %191 : vector<16x16xf32>
    %206 = arith.mulf %201, %203 : vector<16x16xf32>
    %207 = arith.addf %205, %206 : vector<16x16xf32>
    %208 = math.tanh %207 : vector<16x16xf32>
    %209 = arith.mulf %204, %208 : vector<16x16xf32>
    %c4_i32 = arith.constant 4 : i32
    %210 = vector.broadcast %c4_i32 : i32 to vector<16x1xi32>
    %211 = arith.cmpi sgt, %85, %210 : vector<16x1xi32>
    %212 = vector.shape_cast %211 : vector<16x1xi1> to vector<16x1xi1>
    %213 = vector.broadcast %212 : vector<16x1xi1> to vector<16x16xi1>
    %214 = arith.select %213, %209, %188 : vector<16x16xi1>, vector<16x16xf32>
    %215 = vector.shape_cast %211 : vector<16x1xi1> to vector<16x1xi1>
    %216 = vector.broadcast %215 : vector<16x1xi1> to vector<16x16xi1>
    %217 = arith.select %216, %207, %191 : vector<16x16xi1>, vector<16x16xf32>
    %c80_51 = arith.constant 80 : index
    %c0_52 = arith.constant 0 : index
    %218 = vector.load %arg23[%c80_51, %c0_52] : memref<96x128xf32, #tpu.memory_space<vmem>>, vector<16x128xf32>
    %cst_53 = arith.constant dense<0.000000e+00> : vector<16x128xf32>
    %219 = tpu.matmul %214, %84, %cst_53 {dimension_numbers = #tpu.dot_dimension_numbers<[1], [0], [0], [1], [0, 0, 1, 1], [], []>} : vector<16x16xf32>, vector<16x128xf32>, vector<16x128xf32> -> vector<16x128xf32>
    %220 = arith.addf %218, %219 : vector<16x128xf32>
    %221 = arith.negf %220 : vector<16x128xf32>
    %222 = math.exp %221 : vector<16x128xf32>
    %cst_54 = arith.constant 1.000000e+00 : f32
    %223 = vector.broadcast %cst_54 : f32 to vector<16x128xf32>
    %224 = arith.addf %223, %222 : vector<16x128xf32>
    %225 = arith.divf %223, %224 : vector<16x128xf32>
    %226 = math.tanh %220 : vector<16x128xf32>
    %227 = vector.extract_strided_slice %225 {offsets = [0, 0], sizes = [16, 16], strides = [1, 1]} : vector<16x128xf32> to vector<16x16xf32>
    %228 = vector.extract_strided_slice %225 {offsets = [0, 16], sizes = [16, 16], strides = [1, 1]} : vector<16x128xf32> to vector<16x16xf32>
    %229 = vector.extract_strided_slice %226 {offsets = [0, 32], sizes = [16, 16], strides = [1, 1]} : vector<16x128xf32> to vector<16x16xf32>
    %230 = vector.extract_strided_slice %225 {offsets = [0, 48], sizes = [16, 16], strides = [1, 1]} : vector<16x128xf32> to vector<16x16xf32>
    %231 = arith.mulf %228, %217 : vector<16x16xf32>
    %232 = arith.mulf %227, %229 : vector<16x16xf32>
    %233 = arith.addf %231, %232 : vector<16x16xf32>
    %234 = math.tanh %233 : vector<16x16xf32>
    %235 = arith.mulf %230, %234 : vector<16x16xf32>
    %c5_i32 = arith.constant 5 : i32
    %236 = vector.broadcast %c5_i32 : i32 to vector<16x1xi32>
    %237 = arith.cmpi sgt, %85, %236 : vector<16x1xi32>
    %238 = vector.shape_cast %237 : vector<16x1xi1> to vector<16x1xi1>
    %239 = vector.broadcast %238 : vector<16x1xi1> to vector<16x16xi1>
    %240 = arith.select %239, %235, %214 : vector<16x16xi1>, vector<16x16xf32>
    %c0_55 = arith.constant 0 : index
    %c0_56 = arith.constant 0 : index
    %241 = vector.load %arg4[%c0_55, %c0_56] : memref<16x8xf32, #tpu.memory_space<vmem>>, vector<16x8xf32>
    %c0_57 = arith.constant 0 : index
    %c0_58 = arith.constant 0 : index
    %242 = vector.load %arg13[%c0_57, %c0_58] : memref<8x16xf32, #tpu.memory_space<vmem>>, vector<8x16xf32>
    %cst_59 = arith.constant dense<0.000000e+00> : vector<16x16xf32>
    %243 = tpu.matmul %241, %242, %cst_59 {dimension_numbers = #tpu.dot_dimension_numbers<[1], [0], [0], [1], [0, 0, 1, 1], [], []>} : vector<16x8xf32>, vector<8x16xf32>, vector<16x16xf32> -> vector<16x16xf32>
    %c0_60 = arith.constant 0 : index
    %c0_61 = arith.constant 0 : index
    %244 = vector.load %arg14[%c0_60, %c0_61] : memref<16x16xf32, #tpu.memory_space<vmem>>, vector<16x16xf32>
    %cst_62 = arith.constant dense<0.000000e+00> : vector<16x16xf32>
    %245 = tpu.matmul %240, %244, %cst_62 {dimension_numbers = #tpu.dot_dimension_numbers<[1], [0], [0], [1], [0, 0, 1, 1], [], []>} : vector<16x16xf32>, vector<16x16xf32>, vector<16x16xf32> -> vector<16x16xf32>
    %246 = arith.addf %243, %245 : vector<16x16xf32>
    %c0_63 = arith.constant 0 : index
    %c0_64 = arith.constant 0 : index
    %247 = vector.load %arg15[%c0_63, %c0_64] : memref<1x16xf32, #tpu.memory_space<vmem>>, vector<1x16xf32>
    %248 = vector.broadcast %247 : vector<1x16xf32> to vector<16x16xf32>
    %249 = arith.addf %246, %248 : vector<16x16xf32>
    %cst_65 = arith.constant 0.000000e+00 : f32
    %250 = vector.broadcast %cst_65 : f32 to vector<16x16xf32>
    %251 = arith.maximumf %249, %250 : vector<16x16xf32>
    %252 = tpu.iota {dimensions = array<i32: 0>} : vector<8x16xi32>
    %c0_66 = arith.constant 0 : index
    %c0_67 = arith.constant 0 : index
    %253 = vector.load %arg5[%c0_66, %c0_67] : memref<1x16xi32, #tpu.memory_space<vmem>>, vector<1x16xi32>
    %254 = vector.broadcast %253 : vector<1x16xi32> to vector<8x16xi32>
    %255 = arith.cmpi eq, %252, %254 : vector<8x16xi32>
    %256 = arith.extui %255 : vector<8x16xi1> to vector<8x16xi32>
    %257 = arith.sitofp %256 : vector<8x16xi32> to vector<8x16xf32>
    %c0_68 = arith.constant 0 : index
    %c0_69 = arith.constant 0 : index
    %258 = vector.load %arg22[%c0_68, %c0_69] : memref<8x16xf32, #tpu.memory_space<vmem>>, vector<8x16xf32>
    %cst_70 = arith.constant dense<0.000000e+00> : vector<8x16xf32>
    %259 = tpu.matmul %257, %251, %cst_70 {dimension_numbers = #tpu.dot_dimension_numbers<[1], [0], [0], [1], [0, 0, 1, 1], [], []>} : vector<8x16xf32>, vector<16x16xf32>, vector<8x16xf32> -> vector<8x16xf32>
    %260 = arith.addf %258, %259 : vector<8x16xf32>
    %c0_71 = arith.constant 0 : index
    %c0_72 = arith.constant 0 : index
    %261 = vector.load %arg22[%c0_71, %c0_72] : memref<8x16xf32, #tpu.memory_space<vmem>>, vector<8x16xf32>
    tpu.vector_store %arg22[%c0_71, %c0_72], %260 {strides = array<i32>} : memref<8x16xf32, #tpu.memory_space<vmem>>, vector<8x16xf32>,
    %c0_i32_73 = arith.constant 0 : i32
    %262 = arith.cmpi eq, %arg0, %c0_i32_73 : i32
    %263 = arith.extui %262 : i1 to i32
    %c0_i32_74 = arith.constant 0 : i32
    %264 = arith.cmpi ne, %263, %c0_i32_74 : i32
    scf.if %264 {
      %c0_75 = arith.constant 0 : index
      %c0_76 = arith.constant 0 : index
      %265 = vector.load %arg6[%c0_75, %c0_76] : memref<8x8xf32, #tpu.memory_space<vmem>>, vector<8x8xf32>
      %c0_77 = arith.constant 0 : index
      %c0_78 = arith.constant 0 : index
      %266 = vector.load %arg13[%c0_77, %c0_78] : memref<8x16xf32, #tpu.memory_space<vmem>>, vector<8x16xf32>
      %cst_79 = arith.constant dense<0.000000e+00> : vector<8x16xf32>
      %267 = tpu.matmul %265, %266, %cst_79 {dimension_numbers = #tpu.dot_dimension_numbers<[1], [0], [0], [1], [0, 0, 1, 1], [], []>} : vector<8x8xf32>, vector<8x16xf32>, vector<8x16xf32> -> vector<8x16xf32>
      %c0_80 = arith.constant 0 : index
      %c0_81 = arith.constant 0 : index
      %268 = vector.load %arg15[%c0_80, %c0_81] : memref<1x16xf32, #tpu.memory_space<vmem>>, vector<1x16xf32>
      %269 = vector.broadcast %268 : vector<1x16xf32> to vector<8x16xf32>
      %270 = arith.addf %267, %269 : vector<8x16xf32>
      %c0_82 = arith.constant 0 : index
      %c0_83 = arith.constant 0 : index
      %271 = vector.load %arg22[%c0_82, %c0_83] : memref<8x16xf32, #tpu.memory_space<vmem>>, vector<8x16xf32>
      %272 = arith.subf %271, %270 : vector<8x16xf32>
      %c0_84 = arith.constant 0 : index
      %c0_85 = arith.constant 0 : index
      %273 = vector.load %arg7[%c0_84, %c0_85] : memref<8x1xf32, #tpu.memory_space<vmem>>, vector<8x1xf32>
      %274 = vector.broadcast %273 : vector<8x1xf32> to vector<8x16xf32>
      %275 = arith.mulf %272, %274 : vector<8x16xf32>
      %c0_86 = arith.constant 0 : index
      %c0_87 = arith.constant 0 : index
      %276 = vector.load %arg16[%c0_86, %c0_87] : memref<8x16xf32, #tpu.memory_space<vmem>>, vector<8x16xf32>
      %cst_88 = arith.constant dense<0.000000e+00> : vector<8x16xf32>
      %277 = tpu.matmul %265, %276, %cst_88 {dimension_numbers = #tpu.dot_dimension_numbers<[1], [0], [0], [1], [0, 0, 1, 1], [], []>} : vector<8x8xf32>, vector<8x16xf32>, vector<8x16xf32> -> vector<8x16xf32>
      %c0_89 = arith.constant 0 : index
      %c0_90 = arith.constant 0 : index
      %278 = vector.load %arg17[%c0_89, %c0_90] : memref<16x16xf32, #tpu.memory_space<vmem>>, vector<16x16xf32>
      %cst_91 = arith.constant dense<0.000000e+00> : vector<8x16xf32>
      %279 = tpu.matmul %275, %278, %cst_91 {dimension_numbers = #tpu.dot_dimension_numbers<[1], [0], [0], [1], [0, 0, 1, 1], [], []>} : vector<8x16xf32>, vector<16x16xf32>, vector<8x16xf32> -> vector<8x16xf32>
      %280 = arith.addf %277, %279 : vector<8x16xf32>
      %c0_92 = arith.constant 0 : index
      %c0_93 = arith.constant 0 : index
      %281 = vector.load %arg18[%c0_92, %c0_93] : memref<1x16xf32, #tpu.memory_space<vmem>>, vector<1x16xf32>
      %282 = vector.broadcast %281 : vector<1x16xf32> to vector<8x16xf32>
      %283 = arith.addf %280, %282 : vector<8x16xf32>
      %cst_94 = arith.constant 0.000000e+00 : f32
      %284 = vector.broadcast %cst_94 : f32 to vector<8x16xf32>
      %285 = arith.maximumf %283, %284 : vector<8x16xf32>
      %c0_95 = arith.constant 0 : index
      %c0_96 = arith.constant 0 : index
      %286 = vector.load %arg19[%c0_95, %c0_96] : memref<16x128xf32, #tpu.memory_space<vmem>>, vector<16x128xf32>
      %cst_97 = arith.constant dense<0.000000e+00> : vector<8x128xf32>
      %287 = tpu.matmul %285, %286, %cst_97 {dimension_numbers = #tpu.dot_dimension_numbers<[1], [0], [0], [1], [0, 0, 1, 1], [], []>} : vector<8x16xf32>, vector<16x128xf32>, vector<8x128xf32> -> vector<8x128xf32>
      %c0_98 = arith.constant 0 : index
      %c0_99 = arith.constant 0 : index
      %288 = vector.load %arg20[%c0_98, %c0_99] : memref<1x128xf32, #tpu.memory_space<vmem>>, vector<1x128xf32>
      %289 = vector.broadcast %288 : vector<1x128xf32> to vector<8x128xf32>
      %290 = arith.addf %287, %289 : vector<8x128xf32>
      %c0_100 = arith.constant 0 : index
      %c0_101 = arith.constant 0 : index
      %291 = vector.load %arg21[%c0_100, %c0_101] : memref<8x128xf32, #tpu.memory_space<vmem>>, vector<8x128xf32>
      tpu.vector_store %arg21[%c0_100, %c0_101], %290 {strides = array<i32>} : memref<8x128xf32, #tpu.memory_space<vmem>>, vector<8x128xf32>,
    } else {
    }
    return
  }
  func.func @transform_0(%arg0: i32) -> (i32, i32) {
    %c0_i32 = arith.constant 0 : i32
    %c0_i32_0 = arith.constant 0 : i32
    return %arg0, %c0_i32 : i32, i32
  }
  func.func @transform_1(%arg0: i32) -> (i32, i32) {
    %c0_i32 = arith.constant 0 : i32
    %c0_i32_0 = arith.constant 0 : i32
    return %arg0, %c0_i32 : i32, i32
  }
  func.func @transform_2(%arg0: i32) -> (i32, i32) {
    %c0_i32 = arith.constant 0 : i32
    %c0_i32_0 = arith.constant 0 : i32
    return %arg0, %c0_i32 : i32, i32
  }
  func.func @transform_3(%arg0: i32) -> (i32, i32) {
    %c0_i32 = arith.constant 0 : i32
    %c0_i32_0 = arith.constant 0 : i32
    return %arg0, %c0_i32 : i32, i32
  }
  func.func @transform_4(%arg0: i32) -> (i32, i32) {
    %c0_i32 = arith.constant 0 : i32
    %c0_i32_0 = arith.constant 0 : i32
    return %c0_i32, %arg0 : i32, i32
  }
  func.func @transform_5(%arg0: i32) -> (i32, i32) {
    %c0_i32 = arith.constant 0 : i32
    %c0_i32_0 = arith.constant 0 : i32
    %c0_i32_1 = arith.constant 0 : i32
    return %c0_i32, %c0_i32_0 : i32, i32
  }
  func.func @transform_6(%arg0: i32) -> (i32, i32) {
    %c0_i32 = arith.constant 0 : i32
    %c0_i32_0 = arith.constant 0 : i32
    %c0_i32_1 = arith.constant 0 : i32
    return %c0_i32, %c0_i32_0 : i32, i32
  }
  func.func @transform_7(%arg0: i32) -> (i32, i32) {
    %c0_i32 = arith.constant 0 : i32
    %c0_i32_0 = arith.constant 0 : i32
    %c0_i32_1 = arith.constant 0 : i32
    return %c0_i32, %c0_i32_0 : i32, i32
  }
  func.func @transform_8(%arg0: i32) -> (i32, i32) {
    %c0_i32 = arith.constant 0 : i32
    %c0_i32_0 = arith.constant 0 : i32
    %c0_i32_1 = arith.constant 0 : i32
    return %c0_i32, %c0_i32_0 : i32, i32
  }
  func.func @transform_9(%arg0: i32) -> (i32, i32) {
    %c0_i32 = arith.constant 0 : i32
    %c0_i32_0 = arith.constant 0 : i32
    %c0_i32_1 = arith.constant 0 : i32
    return %c0_i32, %c0_i32_0 : i32, i32
  }
  func.func @transform_10(%arg0: i32) -> (i32, i32) {
    %c0_i32 = arith.constant 0 : i32
    %c0_i32_0 = arith.constant 0 : i32
    %c0_i32_1 = arith.constant 0 : i32
    return %c0_i32, %c0_i32_0 : i32, i32
  }
  func.func @transform_11(%arg0: i32) -> (i32, i32) {
    %c0_i32 = arith.constant 0 : i32
    %c0_i32_0 = arith.constant 0 : i32
    %c0_i32_1 = arith.constant 0 : i32
    return %c0_i32, %c0_i32_0 : i32, i32
  }
  func.func @transform_12(%arg0: i32) -> (i32, i32) {
    %c0_i32 = arith.constant 0 : i32
    %c0_i32_0 = arith.constant 0 : i32
    %c0_i32_1 = arith.constant 0 : i32
    return %c0_i32, %c0_i32_0 : i32, i32
  }
  func.func @transform_13(%arg0: i32) -> (i32, i32) {
    %c0_i32 = arith.constant 0 : i32
    %c0_i32_0 = arith.constant 0 : i32
    %c0_i32_1 = arith.constant 0 : i32
    return %c0_i32, %c0_i32_0 : i32, i32
  }
  func.func @transform_14(%arg0: i32) -> (i32, i32) {
    %c0_i32 = arith.constant 0 : i32
    %c0_i32_0 = arith.constant 0 : i32
    %c0_i32_1 = arith.constant 0 : i32
    return %c0_i32, %c0_i32_0 : i32, i32
  }
  func.func @transform_15(%arg0: i32) -> (i32, i32) {
    %c0_i32 = arith.constant 0 : i32
    %c0_i32_0 = arith.constant 0 : i32
    %c0_i32_1 = arith.constant 0 : i32
    return %c0_i32, %c0_i32_0 : i32, i32
  }
  func.func @transform_16(%arg0: i32) -> (i32, i32) {
    %c0_i32 = arith.constant 0 : i32
    %c0_i32_0 = arith.constant 0 : i32
    %c0_i32_1 = arith.constant 0 : i32
    return %c0_i32, %c0_i32_0 : i32, i32
  }
  func.func @transform_17(%arg0: i32) -> (i32, i32) {
    %c0_i32 = arith.constant 0 : i32
    %c0_i32_0 = arith.constant 0 : i32
    %c0_i32_1 = arith.constant 0 : i32
    return %c0_i32, %c0_i32_0 : i32, i32
  }
  func.func @transform_18(%arg0: i32) -> (i32, i32) {
    %c0_i32 = arith.constant 0 : i32
    %c0_i32_0 = arith.constant 0 : i32
    %c0_i32_1 = arith.constant 0 : i32
    return %c0_i32, %c0_i32_0 : i32, i32
  }
  func.func @transform_19(%arg0: i32) -> (i32, i32) {
    %c0_i32 = arith.constant 0 : i32
    %c0_i32_0 = arith.constant 0 : i32
    %c0_i32_1 = arith.constant 0 : i32
    return %c0_i32, %c0_i32_0 : i32, i32
  }
  func.func @transform_20(%arg0: i32) -> (i32, i32) {
    %c0_i32 = arith.constant 0 : i32
    %c0_i32_0 = arith.constant 0 : i32
    %c0_i32_1 = arith.constant 0 : i32
    return %c0_i32, %c0_i32_0 : i32, i32
  }
}

</mosaic_0001>

<bundles_post_ra>
// kernel: tpu_custom_call.1
= control target key start
LH: loop header
LB: loop body
LE: loop exit
PB: predicated region body
PF: predicated region fallthrough
CT: control target
= control target key end

     0   :  { %s6188_s0 = inlined_call_operand.vmem [shape: f32[16,24], index: 0, kind: input, shape index: {}]   ;;  %s6189_s1 = inlined_call_operand.vmem [shape: f32[16,6], index: 1, kind: input, shape index: {}]   ;;  %s6190_s2 = inlined_call_operand.vmem [shape: s32[16,1], index: 2, kind: input, shape index: {}]   ;;  %s6191_s3 = inlined_call_operand.vmem [shape: f32[16,8], index: 3, kind: input, shape index: {}]   ;;  %s6192_s4 = inlined_call_operand.hbm [shape: s32[1,16], index: 4, kind: input, shape index: {}]   ;;  %s6193_s5 = inlined_call_operand.hbm [shape: f32[8,8], index: 5, kind: input, shape index: {}]   ;;  %s6194_s6 = inlined_call_operand.vmem [shape: f32[8,1], index: 6, kind: input, shape index: {}]   ;;  %s6195_s7 = inlined_call_operand.hbm [shape: f32[1,8], index: 7, kind: input, shape index: {}]   ;;  %s6196_s8 = inlined_call_operand.hbm [shape: f32[1,8], index: 8, kind: input, shape index: {}]   ;;  %s6197_s9 = inlined_call_operand.vmem [shape: f32[12,128], index: 9, kind: input, shape index: {}]   ;;  %s6198_s10 = inlined_call_operand.vmem [shape: f32[16,128], index: 10, kind: input, shape index: {}]   ;;  %s6199_s11 = inlined_call_operand.hbm [shape: f32[1,128], index: 11, kind: input, shape index: {}]   ;;  %s6200_s12 = inlined_call_operand.hbm [shape: f32[8,16], index: 12, kind: input, shape index: {}]   ;;  %s6201_s13 = inlined_call_operand.vmem [shape: f32[16,16], index: 13, kind: input, shape index: {}]   ;;  %s6202_s14 = inlined_call_operand.vmem [shape: f32[1,16], index: 14, kind: input, shape index: {}]   ;;  %s6203_s15 = inlined_call_operand.hbm [shape: f32[8,16], index: 15, kind: input, shape index: {}]   ;;  %s6204_s16 = inlined_call_operand.vmem [shape: f32[16,16], index: 16, kind: input, shape index: {}]   ;;  %s6205_s17 = inlined_call_operand.vmem [shape: f32[1,16], index: 17, kind: input, shape index: {}]   ;;  %s6206_s18 = inlined_call_operand.vmem [shape: f32[16,128], index: 18, kind: input, shape index: {}]   ;;  %s6207_s19 = inlined_call_operand.vmem [shape: f32[1,128], index: 19, kind: input, shape index: {}]   ;;  %s6208_s20 = inlined_call_operand.hbm [shape: f32[8,128], index: 20, kind: output, shape index: {}]  }
   0x1   :  { %6214 = sst [smem:[#allocation22_spill]] %s6188_s0 }
   0x2   :  { %6215 = sst [smem:[#allocation23_spill]] %s6189_s1 }
   0x3   :  { %6216 = sst [smem:[#allocation24_spill]] %s6190_s2 }
   0x4   :  { %6217 = sst [smem:[#allocation25_spill]] %s6191_s3 }
   0x5   :  { %6218 = sst [smem:[#allocation26_spill]] %s6192_s4 }
   0x6   :  { %25 = vsyncpa [#allocation5], 0 }
   0x7   :  { %26 = vsyncpa [#allocation8], 0 }
   0x8   :  { %27 = vsyncpa [#allocation11], 0 }
   0x9   :  { %28 = vsyncpa [#allocation14], 0 }
   0xa   :  { %29 = vsyncpa [#allocation6], 0  ;;  %s4364_s1 = smov [#allocation7]   ;;  %s4365_s23 = smov [#allocation10]  }
   0xb   :  { %s54_s22 = sshll.u32 %s4364_s1, 4  ;;  %s76_s24 = sshll.u32 %s4365_s23, 4  ;;  %s55_s22 = int_to_ptr.vmem [resolvable:$true] %s54_s22  ;;  %s77_s24 = int_to_ptr.vmem [resolvable:$true] %s76_s24 }
   0xc   :  { %s4202_s2 = scalar_lea.vmem %s55_s22, 128  ;;  %p4207_p1 = scmp.lt.s32.totalorder %s55_s22, %s55_s22 }
   0xd   :  { %p4203_p0 = scmp.ne.s32.totalorder %s55_s22, %s4202_s2  ;;  %p4208_p2 = scmp.lt.s32.totalorder %s4202_s2, %s4202_s2 }
   0xf   :  { %p4209_p3 = por %p4208_p2, %p4207_p1 }
  0x11   :  { %p4210_p4 = pnand %p4209_p3, %p4203_p0 }
  0x13   :  { %4213 = shalt.err (!%p4210_p4)
}
  0x14   :  { %57 = dma.hbm_to_vmem [thread:$0]  %s6193_s5, 128, %s55_s22, [#allocation8]  }
  0x15   :  { %s4222_s26 = scalar_lea.vmem %s77_s24, 16  ;;  %s4226_s27 = scalar_lea.vmem %s77_s24, 32 }
  0x16   :  { %p4223_p5 = scmp.ne.s32.totalorder %s77_s24, %s4222_s26  ;;  %p4227_p6 = scmp.lt.s32.totalorder %s77_s24, %s77_s24 }
  0x17   :  { %p4228_p7 = scmp.lt.s32.totalorder %s4226_s27, %s4222_s26 }
  0x19   :  { %p4229_p8 = por %p4228_p7, %p4227_p6 }
  0x1b   :  { %p4230_p9 = pnand %p4229_p8, %p4223_p5 }
  0x1d   :  { %4233 = shalt.err (!%p4230_p9)
}
  0x1e   :  { %79 = dma.hbm_to_vmem [thread:$0]  %s6196_s8, 16, %s77_s24, [#allocation11]  }
  0x1f   :  { %s4366_s29 = smov [#allocation13]   ;;  %s4367_s0 = smov [#allocation4]  }
  0x20   :  { %s100_s30 = sshll.u32 %s4366_s29, 4  ;;  %s44_s21 = sshll.u32 %s4367_s0, 4  ;;  %s101_s30 = int_to_ptr.vmem [resolvable:$true] %s100_s30  ;;  %s45_s21 = int_to_ptr.vmem [resolvable:$true] %s44_s21 }
  0x21   :  { %s4242_s1 = scalar_lea.vmem %s101_s30, 128  ;;  %p4247_p11 = scmp.lt.s32.totalorder %s101_s30, %s101_s30 }
  0x22   :  { %p4243_p10 = scmp.ne.s32.totalorder %s101_s30, %s4242_s1  ;;  %p4248_p12 = scmp.lt.s32.totalorder %s4242_s1, %s4242_s1 }
  0x24   :  { %p4249_p13 = por %p4248_p12, %p4247_p11 }
  0x26   :  { %p4250_p0 = pnand %p4249_p13, %p4243_p10 }
  0x28   :  { %4253 = shalt.err (!%p4250_p0)
}
  0x29   :  { %103 = dma.hbm_to_vmem [thread:$0]  %s6200_s12, 128, %s101_s30, [#allocation14]  }
  0x2a   :  { %s4262_s23 = scalar_lea.vmem %s45_s21, 16  ;;  %s4266_s8 = scalar_lea.vmem %s45_s21, 32 }
  0x2b   :  { %p4263_p1 = scmp.ne.s32.totalorder %s45_s21, %s4262_s23  ;;  %p4267_p2 = scmp.lt.s32.totalorder %s45_s21, %s45_s21 }
  0x2c   :  { %p4268_p3 = scmp.lt.s32.totalorder %s4266_s8, %s4262_s23 }
  0x2e   :  { %p4269_p4 = por %p4268_p3, %p4267_p2 }
  0x30   :  { %p4270_p5 = pnand %p4269_p4, %p4263_p1 }
  0x32   :  { %4273 = shalt.err (!%p4270_p5)
}
  0x33   :  { %s6219_s25 = sld [smem:[#allocation26_spill]]  ;;  %s4368_s3 = smov [#allocation9]  }
  0x34   :  { %s66_s26 = sshll.u32 %s4368_s3, 4  ;;  %s4369_s27 = smov [#allocation12]   ;;  %s67_s26 = int_to_ptr.vmem [resolvable:$true] %s66_s26 }
  0x35   :  { %s90_s28 = sshll.u32 %s4369_s27, 4  ;;  %s4282_s4 = scalar_lea.vmem %s67_s26, 16  ;;  %s91_s28 = int_to_ptr.vmem [resolvable:$true] %s90_s28 }
  0x36   :  { %p4283_p6 = scmp.ne.s32.totalorder %s67_s26, %s4282_s4  ;;  %s4286_s12 = scalar_lea.vmem %s67_s26, 32 }
  0x37   :  { %p4287_p7 = scmp.lt.s32.totalorder %s67_s26, %s67_s26  ;;  %p4288_p8 = scmp.lt.s32.totalorder %s4286_s12, %s4282_s4 }
  0x39   :  { %47 = dma.hbm_to_vmem [thread:$0]  %s6219_s25, 16, %s45_s21, [#allocation5]  }
  0x3a   :  { %p4289_p9 = por %p4288_p8, %p4287_p7 }
  0x3c   :  { %p4290_p10 = pnand %p4289_p9, %p4283_p6 }
  0x3e   :  { %4293 = shalt.err (!%p4290_p10)
}
  0x3f   :  { %69 = dma.hbm_to_vmem [thread:$0]  %s6195_s7, 16, %s67_s26, [#allocation8]  }
  0x40   :  { %s4302_s0 = scalar_lea.vmem %s91_s28, 16  ;;  %s4306_s21 = scalar_lea.vmem %s91_s28, 32 }
  0x41   :  { %p4303_p11 = scmp.ne.s32.totalorder %s91_s28, %s4302_s0  ;;  %p4307_p12 = scmp.lt.s32.totalorder %s91_s28, %s91_s28 }
  0x42   :  { %p4308_p13 = scmp.lt.s32.totalorder %s4306_s21, %s4302_s0 }
  0x44   :  { %p4309_p0 = por %p4308_p13, %p4307_p12 }
  0x46   :  { %p4310_p1 = pnand %p4309_p0, %p4303_p11 }
  0x48   :  { %4313 = shalt.err (!%p4310_p1)
}
  0x49   :  { %93 = dma.hbm_to_vmem [thread:$0]  %s6199_s11, 16, %s91_s28, [#allocation11]  }
  0x4a   :  { %s4370_s22 = smov [#allocation15]  }
  0x4b   :  { %s114_s23 = sshll.u32 %s4370_s22, 4  ;;  %s115_s23 = int_to_ptr.vmem [resolvable:$true] %s114_s23 }
  0x4c   :  { %s4322_s8 = scalar_lea.vmem %s115_s23, 128  ;;  %p4327_p3 = scmp.lt.s32.totalorder %s115_s23, %s115_s23 }
  0x4d   :  { %p4323_p2 = scmp.ne.s32.totalorder %s115_s23, %s4322_s8  ;;  %p4328_p4 = scmp.lt.s32.totalorder %s4322_s8, %s4322_s8 }
  0x4f   :  { %p4329_p5 = por %p4328_p4, %p4327_p3 }
  0x51   :  { %p4330_p6 = pnand %p4329_p5, %p4323_p2 }
  0x53   :  { %4333 = shalt.err (!%p4330_p6)
}
  0x54   :  { %117 = dma.hbm_to_vmem [thread:$0]  %s6203_s15, 128, %s115_s23, [#allocation14]  }
  0x55   :  { %4354 = dma.done.wait [#allocation5], 16  }
  0x56   :  { %4355 = vsyncadd [#allocation5], 4294967280 }
  0x57   :  { %4356 = dma.done.wait [#allocation8], 144  }
  0x58   :  { %4357 = vsyncadd [#allocation8], 4294967152 }
  0x59   :  { %4358 = dma.done.wait [#allocation11], 32  }
  0x5a   :  { %4359 = vsyncadd [#allocation11], 4294967264 }
  0x5b   :  { %4360 = dma.done.wait [#allocation14], 256  }
  0x5c   :  { %4361 = vsyncadd [#allocation14], 4294967040  ;;  %v4371_v0 = vmov 2   ;;  %v4372_v1 = vmov 0   ;;  %s6220_s25 = sld [smem:[#allocation23_spill]]  ;;  %v4373_v4 = vmov 4   ;;  %v6213_v45 = vlaneseq }
  0x5d   :  { %4028 = vset.pattern.permute.xlu1 %v4371_v0  ;;  %4027 = vset.pattern.permute.xlu0 %v4372_v1  ;;  %s6221_s28 = sld [smem:[#allocation22_spill]]  ;;  %s4374_s4 = smov 120   ;;  %v3646_v6 = vld [vmem:[#allocation9] ss:$0 sm:$0xff]  ;;  %v3647_v7 = vld [vmem:[#allocation10] ss:$0 sm:$0xff] }
  0x5e   :  { %v4375_v48 = vmov 2475754826   ;;  %v4376_v52 = vmov 2131351028   ;;  %v4377_v56 = vmov 683565275  }
  0x5f   :  { %v4378_v59 = vmov 2102212464   ;;  %s4381_s12 = smov 4   ;;  %s4382_s0 = smov 112  }
  0x60   :  { %s4385_s15 = smov 96   ;;  %s6232_s29 = sld [smem:[#allocation24_spill]] }
  0x61   :  { %s4388_s21 = smov 16   ;;  %s4389_s1 = smov 124  }
  0x62   :  { %v155_v2 = vld [vmem:[%s6220_s25] sm:$0xff]  ;;  %v156_v3 = vld [vmem:[%s6220_s25 + $0x8] sm:$0xff]  ;;  %s4390_s5 = smov 116   ;;  %s4391_s22 = smov 108  }
  0x63   :  { %830 = vperm.xlu1 %4028, %v155_v2   ;;  %185 = vperm.xlu0 %4027, %v155_v2   ;;  %v4532_v5 = vld [vmem:[%s6221_s28] sm:$0xff]  ;;  %s4392_s23 = smov 32   ;;  %s4393_s8 = smov 80  }
  0x67   :  { %834 = vperm.xlu1 %4028, %v156_v3   ;;  %190 = vperm.xlu0 %4027, %v156_v3  }
  0x6b   :  { %4030 = vset.pattern.permute.xlu1 %v4373_v4  ;;  %4029 = vset.pattern.permute.xlu0 %v4373_v4 }
  0x6c   :  { %1476 = vperm.xlu1 %4030, %v156_v3   ;;  %1472 = vperm.xlu0 %4029, %v155_v2  }
  0x70   :  { %1051 = vrot.lane.b32.xlu1 %v4532_v5, %s4374_s4 }
  0xde   :  { %v831_v8 = vpop.permute.xlu1 %830  ;;  %v186_v9 = vpop.permute.xlu0 %185 }
  0xdf   :  { %v837_v10 = vmul.f32 %v3646_v6, %v831_v8  ;;  %v193_v11 = vmul.f32 %v3646_v6, %v186_v9 }
  0xe1   :  { %v4536_v12 = vadd.f32 %v3647_v7, %v837_v10  ;;  %v4538_v13 = vadd.f32 %v3647_v7, %v193_v11 }
  0xe2   :  { %v835_v14 = vpop.permute.xlu1 %834  ;;  %v191_v15 = vpop.permute.xlu0 %190 }
  0xe3   :  { %v844_v16 = vand.u32 2139095040, %v4536_v12  ;;  %v200_v17 = vand.u32 2139095040, %v4538_v13  ;;  %v838_v18 = vmul.f32 %v3646_v6, %v835_v14  ;;  %v194_v19 = vmul.f32 %v3646_v6, %v191_v15 }
  0xe4   :  { %v197_v31 = vand.u32 2147483647, %v4538_v13  ;;  %vm199_vm14 = vcmp.lt.s32.totalorder %v4538_v13, 0 }
  0xe5   :  { %v845_v20 = vshrl.u32 %v844_v16, 23  ;;  %v201_v21 = vshrl.u32 %v200_v17, 23  ;;  %v4542_v22 = vadd.f32 %v3647_v7, %v194_v19  ;;  %v4544_v24 = vadd.f32 %v3647_v7, %v838_v18 }
  0xe6   :  { %v204_v40 = vand.u32 8388607, %v197_v31  ;;  %v4380_v17 = vmov 1326507024  }
  0xe7   :  { %v3649_v23 = vadd.s32 4294967169, %v201_v21  ;;  %v304_v25 = vand.u32 2139095040, %v4542_v22  ;;  %v3671_v26 = vadd.s32 4294967169, %v845_v20  ;;  %v1477_v29 = vpop.permute.xlu1 %1476  ;;  %v1473_v30 = vpop.permute.xlu0 %1472  ;;  %v948_v32 = vand.u32 2139095040, %v4544_v24 }
  0xe8   :  { %v1480_v36 = vmul.f32 %v3646_v6, %v1477_v29  ;;  %v1479_v38 = vmul.f32 %v3646_v6, %v1473_v30  ;;  %v205_v47 = vor.u32 8388608, %v204_v40  ;;  %v301_v54 = vand.u32 2147483647, %v4542_v22 }
  0xe9   :  { %v207_v27 = vadd.s32 1, %v3649_v23  ;;  %v305_v28 = vshrl.u32 %v304_v25, 23  ;;  %v851_v34 = vadd.s32 1, %v3671_v26  ;;  %v949_v42 = vshrl.u32 %v948_v32, 23 }
  0xea   :  { %v4551_v43 = vadd.f32 %v3647_v7, %v1480_v36  ;;  %v4553_v44 = vadd.f32 %v3647_v7, %v1479_v38  ;;  %v4379_v6 = vmov 920167782   ;;  %v245_v11 = vshll.u32 %v205_v47, 8 }
  0xeb   :  { %vm208_vm0 = vcmp.gt.s32.totalorder %v207_v27, 0  ;;  %v3653_v33 = vadd.s32 4294967169, %v305_v28  ;;  %vm852_vm1 = vcmp.gt.s32.totalorder %v851_v34, 0  ;;  %v3675_v51 = vadd.s32 4294967169, %v949_v42 }
  0xec   :  { %v209_v35 = vsel %vm208_vm0, %v207_v27, 0  ;;  %v4556_v50 = vsel %vm852_vm1, %v851_v34, 0  ;;  %v1590_v55 = vand.u32 2139095040, %v4551_v43  ;;  %v1486_v63 = vand.u32 2139095040, %v4553_v44 }
  0xed   :  { %v211_v37 = vand.u32 31, %v209_v35  ;;  %v311_v39 = vadd.s32 1, %v3653_v33  ;;  %v210_v61 = vshrl.u32 %v209_v35, 5  ;;  %v4569_v8 = vand.u32 31, %v4556_v50 }
  0xee   :  { %v4571_v9 = vadd.s32 1, %v3675_v51  ;;  %v4573_v14 = vshrl.u32 %v1590_v55, 23  ;;  %v4577_v20 = vshrl.u32 %v1486_v63, 23 }
  0xef   :  { %v212_v41 = vsub.s32 32, %v211_v37  ;;  %vm312_vm2 = vcmp.gt.s32.totalorder %v311_v39, 0  ;;  %v214_v57 = vshll.u32 %v4377_v56, %v211_v37  ;;  %v217_v58 = vshll.u32 %v4375_v48, %v211_v37 }
  0xf0   :  { %v313_v46 = vsel %vm312_vm2, %v311_v39, 0  ;;  %v220_v0 = vshll.u32 %v4376_v52, %v211_v37  ;;  %v223_v4 = vshll.u32 %v4378_v59, %v211_v37  ;;  %v226_v16 = vshll.u32 %v4379_v6, %v211_v37 }
  0xf1   :  { %v215_v49 = vshrl.u32 %v4375_v48, %v212_v41  ;;  %v218_v53 = vshrl.u32 %v4376_v52, %v212_v41  ;;  %v221_v60 = vshrl.u32 %v4378_v59, %v212_v41  ;;  %v315_v62 = vand.u32 31, %v313_v46 }
  0xf2   :  { %v224_v7 = vshrl.u32 %v4379_v6, %v212_v41  ;;  %v227_v18 = vshrl.u32 %v4380_v17, %v212_v41  ;;  %v213_v21 = vshrl.u32 %v4377_v56, %v212_v41  ;;  %vm229_vm3 = vcmp.lt.s32.totalorder %v210_v61, 1 }
  0xf3   :  { %v216_v2 = vor.u32 %v215_v49, %v214_v57  ;;  %v219_v3 = vor.u32 %v218_v53, %v217_v58  ;;  %v222_v10 = vor.u32 %v221_v60, %v220_v0  ;;  %v316_v19 = vsub.s32 32, %v315_v62 }
  0xf4   :  { %v225_v15 = vor.u32 %v224_v7, %v223_v4  ;;  %v228_v23 = vor.u32 %v227_v18, %v226_v16  ;;  %vm231_vm4 = vcmp.lt.s32.totalorder %v210_v61, 3  ;;  %vm232_vm5 = vcmp.lt.s32.totalorder %v210_v61, 4 }
  0xf5   :  { %v237_v25 = vsel %vm229_vm3, %v216_v2, %v219_v3  ;;  %v233_v26 = vsel %vm229_vm3, %v213_v21, %v216_v2  ;;  %v234_v27 = vsel %vm232_vm5, %v222_v10, 2102212464  ;;  %v241_v29 = vsel %vm229_vm3, %v219_v3, %v222_v10 }
  0xf6   :  { %v238_v28 = vsel %vm232_vm5, %v225_v15, 920167782  ;;  %vm230_vm6 = vcmp.lt.s32.totalorder %v210_v61, 2  ;;  %v235_v30 = vsel %vm231_vm4, %v219_v3, %v234_v27  ;;  %v242_v33 = vsel %vm232_vm5, %v228_v23, 1326507024 }
  0xf7   :  { %v239_v32 = vsel %vm231_vm4, %v222_v10, %v238_v28  ;;  %v314_v34 = vshrl.u32 %v313_v46, 5  ;;  %v243_v36 = vsel %vm231_vm4, %v225_v15, %v242_v33  ;;  %v308_v37 = vand.u32 8388607, %v301_v54 }
  0xf8   :  { %v240_v35 = vsel %vm230_vm6, %v237_v25, %v239_v32  ;;  %vm956_vm7 = vcmp.gt.s32.totalorder %v4571_v9, 0  ;;  %v236_v38 = vsel %vm230_vm6, %v233_v26, %v235_v30  ;;  %v244_v39 = vsel %vm230_vm6, %v241_v29, %v243_v36 }
  0xf9   :  { %v4583_v40 = vmul.u32.u64.low %v245_v11, %v240_v35  ;;  %v4584_v41 = vmul.u32.u64.high %v245_v11, %v240_v35, %v4583_v40  ;;  %v4587_v42 = vmul.u32.u64.low %v245_v11, %v244_v39  ;;  %v4588_v47 = vmul.u32.u64.high %v245_v11, %v244_v39, %v4587_v42 }
  0xfa   :  { %v317_v49 = vshrl.u32 %v4377_v56, %v316_v19  ;;  %v318_v46 = vshll.u32 %v4377_v56, %v315_v62  ;;  %v319_v51 = vshrl.u32 %v4375_v48, %v316_v19  ;;  %v321_v53 = vshll.u32 %v4375_v48, %v315_v62 }
  0xfb   :  { %v322_v55 = vshrl.u32 %v4376_v52, %v316_v19  ;;  %v324_v57 = vshll.u32 %v4376_v52, %v315_v62  ;;  %v325_v58 = vshrl.u32 %v4378_v59, %v316_v19  ;;  %v327_v60 = vshll.u32 %v4378_v59, %v315_v62 }
  0xfc   :  { %v328_v61 = vshrl.u32 %v4379_v6, %v316_v19  ;;  %v330_v63 = vshll.u32 %v4379_v6, %v315_v62  ;;  %v255_v0 = vadd.s32 1, %v4584_v41  ;;  %v320_v2 = vor.u32 %v319_v51, %v318_v46 }
  0xfd   :  { %v323_v3 = vor.u32 %v322_v55, %v321_v53  ;;  %v331_v4 = vshrl.u32 %v4380_v17, %v316_v19  ;;  %v252_v7 = vmul.u32 %v245_v11, %v236_v38  ;;  %vm254_vm8 = vc.u32 %v4588_v47, %v4583_v40 }
  0xfe   :  { %v326_v10 = vor.u32 %v325_v58, %v324_v57  ;;  %v329_v15 = vor.u32 %v328_v61, %v327_v60  ;;  %v256_v16 = vsel %vm254_vm8, %v255_v0, %v4584_v41  ;;  %v309_v18 = vor.u32 8388608, %v308_v37 }
  0xff   :  { %v332_v21 = vor.u32 %v331_v4, %v330_v63  ;;  %vm333_vm9 = vcmp.lt.s32.totalorder %v314_v34, 1  ;;  %v257_v23 = vadd.s32 %v256_v16, %v252_v7  ;;  %vm334_vm10 = vcmp.lt.s32.totalorder %v314_v34, 2 }
 0x100   :  { %vm335_vm11 = vcmp.lt.s32.totalorder %v314_v34, 3  ;;  %vm336_vm12 = vcmp.lt.s32.totalorder %v314_v34, 4  ;;  %v341_v25 = vsel %vm333_vm9, %v320_v2, %v323_v3  ;;  %v345_v27 = vsel %vm333_vm9, %v323_v3, %v326_v10 }
 0x101   :  { %v338_v62 = vsel %vm336_vm12, %v326_v10, 2102212464  ;;  %v342_v26 = vsel %vm336_vm12, %v329_v15, 920167782  ;;  %v258_v19 = vadd.s32 536870912, %v257_v23  ;;  %v337_v11 = vsel %vm333_vm9, %v317_v49, %v320_v2 }
 0x102   :  { %v343_v28 = vsel %vm335_vm11, %v326_v10, %v342_v26  ;;  %v346_v29 = vsel %vm336_vm12, %v332_v21, 1326507024  ;;  %v339_v30 = vsel %vm335_vm11, %v323_v3, %v338_v62  ;;  %v349_v35 = vshll.u32 %v309_v18, 8 }
 0x103   :  { %v344_v32 = vsel %vm334_vm10, %v341_v25, %v343_v28  ;;  %v347_v33 = vsel %vm335_vm11, %v329_v15, %v346_v29  ;;  %v957_v36 = vsel %vm956_vm7, %v4571_v9, 0  ;;  %v3697_v37 = vadd.s32 4294967169, %v4573_v14 }
 0x104   :  { %v259_v38 = vshrl.u32 %v258_v19, 30  ;;  %v348_v39 = vsel %vm334_vm10, %v345_v27, %v347_v33  ;;  %v4614_v49 = vmul.u32.u64.low %v349_v35, %v344_v32  ;;  %v4615_v46 = vmul.u32.u64.high %v349_v35, %v344_v32, %v4614_v49 }
 0x105   :  { %v4611_v41 = vmul.u32.u64.low %v349_v35, %v348_v39  ;;  %v4612_v42 = vmul.u32.u64.high %v349_v35, %v348_v39, %v4611_v41  ;;  %v856_v51 = vsub.s32 32, %v4569_v8  ;;  %v340_v55 = vsel %vm334_vm10, %v337_v11, %v339_v30 }
 0x106   :  { %v260_v53 = vshll.u32 %v259_v38, 30  ;;  %v4621_v57 = vshrl.u32 %v4556_v50, 5  ;;  %v3693_v9 = vadd.s32 4294967169, %v4577_v20  ;;  %v4625_v14 = vand.u32 127, %v6213_v45 }
 0x107   :  { %v841_v58 = vand.u32 2147483647, %v4536_v12  ;;  %v4628_v60 = vshrl.u32 %v957_v36, 5  ;;  %v4630_v61 = vand.u32 31, %v957_v36  ;;  %v4632_v63 = vadd.s32 1, %v3697_v37 }
 0x108   :  { %v4634_v0 = vsub.s32 %v257_v23, %v260_v53  ;;  %v356_v34 = vmul.u32 %v349_v35, %v340_v55  ;;  %vm358_vm13 = vc.u32 %v4612_v42, %v4614_v49  ;;  %v359_v50 = vadd.s32 1, %v4615_v46 }
 0x109   :  { %v858_v20 = vshll.u32 %v4377_v56, %v4569_v8  ;;  %v859_v3 = vshrl.u32 %v4375_v48, %v856_v51  ;;  %v861_v4 = vshll.u32 %v4375_v48, %v4569_v8  ;;  %v862_v7 = vshrl.u32 %v4376_v52, %v856_v51 }
 0x10a   :  { %v263_v2 = vsub.s32 0, %v4634_v0  ;;  %v360_v10 = vsel %vm358_vm13, %v359_v50, %v4615_v46  ;;  %v864_v15 = vshll.u32 %v4376_v52, %v4569_v8  ;;  %v865_v16 = vshrl.u32 %v4378_v59, %v856_v51 }
 0x10b   :  { %v867_v18 = vshll.u32 %v4378_v59, %v4569_v8  ;;  %v4653_v21 = vadd.s32 1, %v3693_v9  ;;  %v361_v62 = vadd.s32 %v360_v10, %v356_v34  ;;  %v868_v25 = vshrl.u32 %v4379_v6, %v856_v51 }
 0x10c   :  { %v3650_v23 = vmin.u32 %v263_v2, %v4634_v0  ;;  %v283_v26 = vsub.s32 4, %v259_v38  ;;  %v848_v27 = vand.u32 8388607, %v841_v58  ;;  %v870_v19 = vshll.u32 %v4379_v6, %v4569_v8 }
 0x10d   :  { %v871_v11 = vshrl.u32 %v4380_v17, %v856_v51  ;;  %v860_v29 = vor.u32 %v859_v3, %v858_v20  ;;  %v863_v30 = vor.u32 %v862_v7, %v861_v4  ;;  %v866_v32 = vor.u32 %v865_v16, %v864_v15 }
 0x10e   :  { %v265_v28 = vclz %v3650_v23  ;;  %v362_v33 = vadd.s32 536870912, %v361_v62  ;;  %v857_v35 = vshrl.u32 %v4377_v56, %v856_v51  ;;  %v869_v36 = vor.u32 %v868_v25, %v867_v18 }
 0x10f   :  { %vm873_vm15 = vcmp.lt.s32.totalorder %v4621_v57, 1  ;;  %vm1598_vm0 = vcmp.gt.s32.totalorder %v4632_v63, 0  ;;  %v253_v37 = vadd.s32 %v4583_v40, %v4588_v47  ;;  %vm875_vm1 = vcmp.lt.s32.totalorder %v4621_v57, 3 }
 0x110   :  { %v3651_v39 = vadd.s32 4294967294, %v265_v28  ;;  %vm876_vm2 = vcmp.lt.s32.totalorder %v4621_v57, 4  ;;  %vm4671_vm3 = vcmp.le.f32.partialorder %v197_v31, 0.7853982  ;;  %v363_v41 = vshrl.u32 %v362_v33, 30 }
 0x111   :  { %v849_v46 = vor.u32 8388608, %v848_v27  ;;  %v872_v51 = vor.u32 %v871_v11, %v870_v19  ;;  %v882_v53 = vsel %vm876_vm2, %v869_v36, 920167782  ;;  %vm874_vm5 = vcmp.lt.s32.totalorder %v4621_v57, 2 }
 0x112   :  { %vm3652_vm4 = vcmp.lt.s32.totalorder %v3651_v39, 0  ;;  %v881_v40 = vsel %vm873_vm15, %v860_v29, %v863_v30  ;;  %v883_v47 = vsel %vm875_vm1, %v866_v32, %v882_v53  ;;  %v284_v31 = vsel %vm199_vm14, %v283_v26, %v259_v38 }
 0x113   :  { %v268_v55 = vsel %vm3652_vm4, 0, %v3651_v39  ;;  %v364_v9 = vshll.u32 %v363_v41, 30  ;;  %v877_v34 = vsel %vm873_vm15, %v857_v35, %v860_v29  ;;  %v878_v2 = vsel %vm876_vm2, %v866_v32, 2102212464 }
 0x114   :  { %v269_v50 = vsub.s32 32, %v268_v55  ;;  %v273_v20 = vsub.s32 4294967266, %v268_v55  ;;  %v885_v3 = vsel %vm873_vm15, %v863_v30, %v866_v32  ;;  %v270_v4 = vshll.u32 %v4634_v0, %v268_v55 }
 0x115   :  { %vm4693_vm6 = vcmp.le.f32.partialorder %v301_v54, 0.7853982  ;;  %v4697_v38 = vsub.s32 %v361_v62, %v364_v9  ;;  %v884_v10 = vsel %vm874_vm5, %v881_v40, %v883_v47  ;;  %v886_v15 = vsel %vm876_vm2, %v872_v51, 1326507024 }
 0x116   :  { %v271_v16 = vshrl.u32 %v253_v37, %v269_v50  ;;  %v274_v18 = vadd.s32 127, %v273_v20  ;;  %v887_v23 = vsel %vm875_vm1, %v869_v36, %v886_v15  ;;  %v889_v0 = vshll.u32 %v849_v46, 8 }
 0x117   :  { %v367_v25 = vsub.s32 0, %v4697_v38  ;;  %v387_v54 = vsub.s32 4, %v363_v41  ;;  %v879_v26 = vsel %vm875_vm1, %v863_v30, %v878_v2  ;;  %v888_v62 = vsel %vm874_vm5, %v885_v3, %v887_v23 }
 0x118   :  { %v272_v27 = vor.u32 %v271_v16, %v270_v4  ;;  %v275_v19 = vshll.u32 %v274_v18, 23  ;;  %v4710_v11 = vmul.u32.u64.low %v889_v0, %v888_v62  ;;  %v4711_v28 = vmul.u32.u64.high %v889_v0, %v888_v62, %v4710_v11 }
 0x119   :  { %vm1494_vm7 = vcmp.gt.s32.totalorder %v4653_v21, 0  ;;  %v3654_v29 = vmin.u32 %v367_v25, %v4697_v38  ;;  %v4715_v32 = vmul.u32.u64.low %v889_v0, %v884_v10  ;;  %v4716_v33 = vmul.u32.u64.high %v889_v0, %v884_v10, %v4715_v32 }
 0x11a   :  { %v4720_v35 = vsub.s32 32, %v4630_v61  ;;  %v276_v30 = vor.u32 4788187, %v275_v19  ;;  %v286_v36 = vsel %vm4671_vm3, 0, %v284_v31  ;;  %vm303_vm8 = vcmp.lt.s32.totalorder %v4542_v22, 0 }
 0x11b   :  { %v4728_v37 = vsel %vm1598_vm0, %v4632_v63, 0  ;;  %v369_v39 = vclz %v3654_v29  ;;  %v388_v46 = vsel %vm303_vm8, %v387_v54, %v363_v41  ;;  %v880_v51 = vsel %vm874_vm5, %v877_v34, %v879_v26 }
 0x11c   :  { %v4735_v53 = vsel %vm1494_vm7, %v4653_v21, 0  ;;  %v277_v40 = vand.u32 2147483647, %v276_v30  ;;  %v279_v47 = vcvt.s32.f32 %v272_v27  ;;  %vm898_vm9 = vc.u32 %v4711_v28, %v4715_v32 }
 0x11d   :  { %v290_v55 = vadd.s32 3, %v286_v36  ;;  %v357_v63 = vadd.s32 %v4614_v49, %v4612_v42  ;;  %v3655_v31 = vadd.s32 4294967294, %v369_v39  ;;  %v899_v9 = vadd.s32 1, %v4716_v33 }
 0x11e   :  { %v280_v50 = vmul.f32 %v279_v47, %v277_v40  ;;  %v390_v57 = vsel %vm4693_vm6, 0, %v388_v46  ;;  %v896_v41 = vmul.u32 %v889_v0, %v880_v51  ;;  %v945_v21 = vand.u32 2147483647, %v4544_v24 }
 0x11f   :  { %vm3656_vm10 = vcmp.lt.s32.totalorder %v3655_v31, 0  ;;  %v900_v34 = vsel %vm898_vm9, %v899_v9, %v4716_v33  ;;  %v962_v20 = vshll.u32 %v4377_v56, %v4630_v61  ;;  %v963_v2 = vshrl.u32 %v4375_v48, %v4720_v35 }
 0x120   :  { %v281_v42 = vxor.u32 2147483648, %v280_v50  ;;  %v372_v49 = vsel %vm3656_vm10, 0, %v3655_v31  ;;  %v901_v3 = vadd.s32 %v900_v34, %v896_v41  ;;  %v965_v4 = vshll.u32 %v4375_v48, %v4630_v61 }
 0x121   :  { %v373_v10 = vsub.s32 32, %v372_v49  ;;  %v374_v15 = vshll.u32 %v4697_v38, %v372_v49  ;;  %v377_v16 = vsub.s32 4294967266, %v372_v49  ;;  %v966_v18 = vshrl.u32 %v4376_v52, %v4720_v35 }
 0x122   :  { %v282_v23 = vsel %vm199_vm14, %v281_v42, %v280_v50  ;;  %v902_v0 = vadd.s32 536870912, %v901_v3  ;;  %v968_v25 = vshll.u32 %v4376_v52, %v4630_v61  ;;  %v969_v54 = vshrl.u32 %v4378_v59, %v4720_v35 }
 0x123   :  { %v285_v26 = vsel %vm4671_vm3, %v4538_v13, %v282_v23  ;;  %v375_v62 = vshrl.u32 %v357_v63, %v373_v10  ;;  %v378_v38 = vadd.s32 127, %v377_v16  ;;  %v971_v27 = vshll.u32 %v4378_v59, %v4630_v61 }
 0x124   :  { %4038 = vcosq.f32 %v285_v26  ;;  %v4766_v19 = vshrl.u32 %v902_v0, 30  ;;  %v952_v11 = vand.u32 8388607, %v945_v21  ;;  %v972_v29 = vshrl.u32 %v4379_v6, %v4720_v35 }
 0x125   :  { %4040 = vsinq.f32 %v285_v26  ;;  %v376_v33 = vor.u32 %v375_v62, %v374_v15  ;;  %v379_v30 = vshll.u32 %v378_v38, 23  ;;  %v974_v8 = vshll.u32 %v4379_v6, %v4630_v61 }
 0x126   :  { %v904_v36 = vshll.u32 %v4766_v19, 30  ;;  %v964_v39 = vor.u32 %v963_v2, %v962_v20  ;;  %v967_v46 = vor.u32 %v966_v18, %v965_v4  ;;  %v975_v51 = vshrl.u32 %v4380_v17, %v4720_v35 }
 0x127   :  { %v4778_v40 = vand.u32 31, %v4735_v53  ;;  %v380_v47 = vor.u32 4788187, %v379_v30  ;;  %v970_v63 = vor.u32 %v969_v54, %v968_v25  ;;  %v973_v31 = vor.u32 %v972_v29, %v971_v27 }
 0x128   :  { %v4780_v9 = vand.u32 3, %v290_v55  ;;  %v394_v50 = vadd.s32 3, %v390_v57  ;;  %v4782_v41 = vsub.s32 %v901_v3, %v904_v36  ;;  %v953_v34 = vor.u32 8388608, %v952_v11 }
 0x129   :  { %v381_v61 = vand.u32 2147483647, %v380_v47  ;;  %v383_v42 = vcvt.s32.f32 %v376_v33  ;;  %v976_v49 = vor.u32 %v975_v51, %v974_v8  ;;  %vm977_vm11 = vcmp.lt.s32.totalorder %v4628_v60, 1 }
 0x12a   :  { %v907_v20 = vsub.s32 0, %v4782_v41  ;;  %v961_v2 = vshrl.u32 %v4377_v56, %v4720_v35  ;;  %vm980_vm12 = vcmp.lt.s32.totalorder %v4628_v60, 4  ;;  %v985_v55 = vsel %vm977_vm11, %v964_v39, %v967_v46 }
 0x12b   :  { %v384_v4 = vmul.f32 %v383_v42, %v381_v61  ;;  %vm979_vm13 = vcmp.lt.s32.totalorder %v4628_v60, 3  ;;  %v982_v57 = vsel %vm980_vm12, %v970_v63, 2102212464  ;;  %v986_v3 = vsel %vm980_vm12, %v973_v31, 920167782 }
 0x12c   :  { %v3672_v10 = vmin.u32 %v907_v20, %v4782_v41  ;;  %vm978_vm14 = vcmp.lt.s32.totalorder %v4628_v60, 2  ;;  %v987_v15 = vsel %vm979_vm13, %v970_v63, %v986_v3  ;;  %v989_v35 = vsel %vm977_vm11, %v967_v46, %v970_v63 }
 0x12d   :  { %vm182_vm15 = vcmp.lt.s32.totalorder %v4625_v14, 7  ;;  %vm292_vm0 = vcmp.lt.s32.totalorder %v4780_v9, 2  ;;  %v385_v16 = vxor.u32 2147483648, %v384_v4  ;;  %v988_v18 = vsel %vm978_vm14, %v985_v55, %v987_v15 }
 0x12e   :  { %v990_v23 = vsel %vm980_vm12, %v976_v49, 1326507024  ;;  %v993_v0 = vshll.u32 %v953_v34, 8  ;;  %vm289_vm1 = vweird.f32 %v4538_v13  ;;  %vm293_vm2 = vcmp.eq.s32.totalorder %v4780_v9, 0 }
 0x12f   :  { %vm843_vm3 = vcmp.lt.s32.totalorder %v4536_v12, 0  ;;  %v909_v25 = vclz %v3672_v10  ;;  %v981_v54 = vsel %vm977_vm11, %v961_v2, %v964_v39  ;;  %v983_v26 = vsel %vm979_vm13, %v967_v46, %v982_v57 }
 0x130   :  { %v386_v62 = vsel %vm303_vm8, %v385_v16, %v384_v4  ;;  %v991_v38 = vsel %vm979_vm13, %v973_v31, %v990_v23  ;;  %v4813_v27 = vmul.u32.u64.low %v993_v0, %v988_v18  ;;  %v4814_v11 = vmul.u32.u64.high %v993_v0, %v988_v18, %v4813_v27 }
 0x131   :  { %vm296_vm4 = vcmp.eq.s32.totalorder %v4780_v9, 2  ;;  %v389_v29 = vsel %vm4693_vm6, %v4542_v22, %v386_v62  ;;  %v3673_v33 = vadd.s32 4294967294, %v909_v25  ;;  %v992_v30 = vsel %vm978_vm14, %v989_v35, %v991_v38  ;;  %v4039_v8 = vpop.eup %4038 }
 0x132   :  { %4042 = vcosq.f32 %v389_v29  ;;  %v4823_v36 = vand.u32 3, %v394_v50  ;;  %v4825_v39 = vmul.u32.u64.low %v993_v0, %v992_v30  ;;  %v4826_v46 = vmul.u32.u64.high %v993_v0, %v992_v30, %v4825_v39  ;;  %v4041_v51 = vpop.eup %4040 }
 0x133   :  { %v297_v47 = vxor.u32 2147483648, %v4039_v8  ;;  %4044 = vsinq.f32 %v389_v29  ;;  %vm3674_vm5 = vcmp.lt.s32.totalorder %v3673_v33, 0  ;;  %v984_v63 = vsel %vm978_vm14, %v981_v54, %v983_v26 }
 0x134   :  { %v294_v7 = vxor.u32 2147483648, %v4041_v51  ;;  %v912_v31 = vsel %vm3674_vm5, 0, %v3673_v33  ;;  %v927_v34 = vsub.s32 4, %v4766_v19  ;;  %v1003_v61 = vadd.s32 1, %v4814_v11 }
 0x135   :  { %v298_v50 = vsel %vm296_vm4, %v297_v47, %v4041_v51  ;;  %v897_v42 = vadd.s32 %v4715_v32, %v4711_v28  ;;  %v913_v49 = vsub.s32 32, %v912_v31  ;;  %v917_v20 = vsub.s32 4294967266, %v912_v31 }
 0x136   :  { %v295_v2 = vsel %vm293_vm2, %v4039_v8, %v294_v7  ;;  %v914_v60 = vshll.u32 %v4782_v41, %v912_v31  ;;  %v1000_v55 = vmul.u32 %v993_v0, %v984_v63  ;;  %vm1002_vm6 = vc.u32 %v4826_v46, %v4813_v27 }
 0x137   :  { %v299_v4 = vsel %vm292_vm0, %v295_v2, %v298_v50  ;;  %v915_v57 = vshrl.u32 %v897_v42, %v913_v49  ;;  %v918_v3 = vadd.s32 127, %v917_v20  ;;  %v1004_v10 = vsel %vm1002_vm6, %v1003_v61, %v4814_v11 }
 0x138   :  { %v1498_v28 = vsub.s32 32, %v4778_v40  ;;  %v300_v32 = vsel %vm289_vm1, nan, %v299_v4  ;;  %v928_v41 = vsel %vm843_vm3, %v927_v34, %v4766_v19  ;;  %v1005_v15 = vadd.s32 %v1004_v10, %v1000_v55 }
 0x139   :  { %v405_v35 = vsel %vm182_vm15, %v300_v32, %v4538_v13  ;;  %vm4855_vm7 = vcmp.le.f32.partialorder %v841_v58, 0.7853982  ;;  %v916_v16 = vor.u32 %v915_v57, %v914_v60  ;;  %v919_v18 = vshll.u32 %v918_v3, 23  ;;  %v4870_v58 = vld [vmem:[%s6221_s28 + $0x8] sm:$0xff] }
 0x13a   :  { %v4860_v23 = vand.u32 31, %v4728_v37  ;;  %v4863_v0 = vshrl.u32 %v4735_v53, 5  ;;  %409 = vrot.lane.b32.xlu1 %v405_v35, %s4381_s12  ;;  %vm397_vm8 = vcmp.eq.s32.totalorder %v4823_v36, 0  ;;  %v1006_v13 = vadd.s32 536870912, %v1005_v15 }
 0x13b   :  { %vm396_vm9 = vcmp.lt.s32.totalorder %v4823_v36, 2  ;;  %vm400_vm10 = vcmp.eq.s32.totalorder %v4823_v36, 2  ;;  %v920_v19 = vor.u32 4788187, %v919_v18  ;;  %v930_v53 = vsel %vm4855_vm7, 0, %v928_v41 }
 0x13c   :  { %v1483_v25 = vand.u32 2147483647, %v4553_v44  ;;  %vm393_vm11 = vweird.f32 %v4542_v22  ;;  %v4878_v54 = vshrl.u32 %v1006_v13, 30  ;;  %v1500_v26 = vshll.u32 %v4377_v56, %v4778_v40 }
 0x13d   :  { %v1501_v62 = vshrl.u32 %v4375_v48, %v1498_v28  ;;  %v1503_v38 = vshll.u32 %v4375_v48, %v4778_v40  ;;  %v921_v11 = vand.u32 2147483647, %v920_v19  ;;  %v923_v29 = vcvt.s32.f32 %v916_v16 }
 0x13e   :  { %v1504_v33 = vshrl.u32 %v4376_v52, %v1498_v28  ;;  %v1506_v30 = vshll.u32 %v4376_v52, %v4778_v40  ;;  %v1008_v8 = vshll.u32 %v4878_v54, 30  ;;  %1053 = vrot.lane.b32.xlu1 %v4870_v58, %s4374_s4  ;;  %v1507_v39 = vshrl.u32 %v4378_v59, %v1498_v28 }
 0x13f   :  { %v1509_v51 = vshll.u32 %v4378_v59, %v4778_v40  ;;  %v1510_v47 = vshrl.u32 %v4379_v6, %v1498_v28  ;;  %v4043_v63 = vpop.eup %4042  ;;  %v924_v7 = vmul.f32 %v923_v29, %v921_v11  ;;  %v934_v31 = vadd.s32 3, %v930_v53 }
 0x140   :  { %v1490_v34 = vand.u32 8388607, %v1483_v25  ;;  %v1499_v61 = vshrl.u32 %v4377_v56, %v1498_v28  ;;  %v4045_v50 = vpop.eup %4044  ;;  %v401_v42 = vxor.u32 2147483648, %v4043_v63  ;;  %v4898_v49 = vsub.s32 %v1005_v15, %v1008_v8 }
 0x141   :  { %v1512_v20 = vshll.u32 %v4379_v6, %v4778_v40  ;;  %v1513_v2 = vshrl.u32 %v4380_v17, %v1498_v28  ;;  %v398_v60 = vxor.u32 2147483648, %v4045_v50  ;;  %v925_v55 = vxor.u32 2147483648, %v924_v7 }
 0x142   :  { %v1502_v4 = vor.u32 %v1501_v62, %v1500_v26  ;;  %v1505_v57 = vor.u32 %v1504_v33, %v1503_v38  ;;  %v402_v3 = vsel %vm400_vm10, %v401_v42, %v4045_v50  ;;  %v1011_v10 = vsub.s32 0, %v4898_v49  ;;  %1693 = vrot.lane.b32.xlu1 %v4532_v5, %s4382_s0 }
 0x143   :  { %v1508_v32 = vor.u32 %v1507_v39, %v1506_v30  ;;  %v1511_v41 = vor.u32 %v1510_v47, %v1509_v51  ;;  %v399_v15 = vsel %vm397_vm8, %v4043_v63, %v398_v60  ;;  %v926_v40 = vsel %vm843_vm3, %v925_v55, %v924_v7 }
 0x144   :  { %vm1515_vm12 = vcmp.lt.s32.totalorder %v4863_v0, 1  ;;  %vm1518_vm13 = vcmp.lt.s32.totalorder %v4863_v0, 4  ;;  %v403_v28 = vsel %vm396_vm9, %v399_v15, %v402_v3  ;;  %v929_v35 = vsel %vm4855_vm7, %v4536_v12, %v926_v40 }
 0x145   :  { %v3676_v16 = vmin.u32 %v1011_v10, %v4898_v49  ;;  %v1514_v5 = vor.u32 %v1513_v2, %v1512_v20  ;;  %v404_v18 = vsel %vm393_vm11, nan, %v403_v28  ;;  %4046 = vcosq.f32 %v929_v35 }
 0x146   :  { %v1491_v13 = vor.u32 8388608, %v1490_v34  ;;  %vm1517_vm14 = vcmp.lt.s32.totalorder %v4863_v0, 3  ;;  %v406_v19 = vsel %vm182_vm15, %v404_v18, %v4542_v22  ;;  %4048 = vsinq.f32 %v929_v35  ;;  %1695 = vrot.lane.b32.xlu1 %v4870_v58, %s4382_s0  ;;  %s6241_s0 = sld [smem:[#allocation25_spill]] }
 0x147   :  { %v1013_v36 = vclz %v3676_v16  ;;  %v1520_v9 = vsel %vm1518_vm13, %v1508_v32, 2102212464  ;;  %411 = vrot.lane.b32.xlu0 %v406_v19, %s4381_s12  ;;  %v4929_v53 = vand.u32 3, %v934_v31  ;;  %vm1516_vm0 = vcmp.lt.s32.totalorder %v4863_v0, 2 }
 0x148   :  { %v1523_v26 = vsel %vm1515_vm12, %v1502_v4, %v1505_v57  ;;  %v1524_v62 = vsel %vm1518_vm13, %v1511_v41, 920167782  ;;  %v1527_v11 = vsel %vm1515_vm12, %v1505_v57, %v1508_v32  ;;  %v1528_v29 = vsel %vm1518_vm13, %v1514_v5, 1326507024 }
 0x149   :  { %v3677_v22 = vadd.s32 4294967294, %v1013_v36  ;;  %v1525_v38 = vsel %vm1517_vm14, %v1508_v32, %v1524_v62  ;;  %v1519_v33 = vsel %vm1515_vm12, %v1499_v61, %v1502_v4  ;;  %v1521_v30 = vsel %vm1517_vm14, %v1505_v57, %v1520_v9 }
 0x14a   :  { %v1529_v8 = vsel %vm1517_vm14, %v1511_v41, %v1528_v29  ;;  %v1531_v39 = vshll.u32 %v1491_v13, 8  ;;  %v4949_v51 = vsub.s32 32, %v4860_v23  ;;  %v1526_v47 = vsel %vm1516_vm0, %v1523_v26, %v1525_v38 }
 0x14b   :  { %vm3678_vm1 = vcmp.lt.s32.totalorder %v3677_v22, 0  ;;  %v1530_v63 = vsel %vm1516_vm0, %v1527_v11, %v1529_v8  ;;  %v4956_v7 = vshrl.u32 %v4728_v37, 5  ;;  %v1001_v50 = vadd.s32 %v4813_v27, %v4826_v46 }
 0x14c   :  { %v1016_v31 = vsel %vm3678_vm1, 0, %v3677_v22  ;;  %v4958_v34 = vmul.u32.u64.low %v1531_v39, %v1530_v63  ;;  %v4959_v61 = vmul.u32.u64.high %v1531_v39, %v1530_v63, %v4958_v34  ;;  %v1522_v2 = vsel %vm1516_vm0, %v1519_v33, %v1521_v30 }
 0x14d   :  { %v1017_v42 = vsub.s32 32, %v1016_v31  ;;  %v1021_v20 = vsub.s32 4294967266, %v1016_v31  ;;  %vm937_vm2 = vcmp.eq.s32.totalorder %v4929_v53, 0  ;;  %v1018_v60 = vshll.u32 %v4898_v49, %v1016_v31 }
 0x14e   :  { %v4967_v55 = vmul.u32.u64.low %v1531_v39, %v1526_v47  ;;  %v4968_v4 = vmul.u32.u64.high %v1531_v39, %v1526_v47, %v4967_v55  ;;  %v1587_v37 = vand.u32 2147483647, %v4551_v43  ;;  %vm936_vm3 = vcmp.lt.s32.totalorder %v4929_v53, 2 }
 0x14f   :  { %v1019_v57 = vshrl.u32 %v1001_v50, %v1017_v42  ;;  %v1022_v3 = vadd.s32 127, %v1021_v20  ;;  %v1604_v27 = vshll.u32 %v4377_v56, %v4860_v23  ;;  %v1605_v46 = vshrl.u32 %v4375_v48, %v4949_v51 }
 0x150   :  { %vm933_vm4 = vweird.f32 %v4536_v12  ;;  %vm940_vm5 = vcmp.eq.s32.totalorder %v4929_v53, 2  ;;  %v1031_v0 = vsub.s32 4, %v4878_v54  ;;  %v1538_v49 = vmul.u32 %v1531_v39, %v1522_v2 }
 0x151   :  { %vm1540_vm6 = vc.u32 %v4959_v61, %v4967_v55  ;;  %v1020_v10 = vor.u32 %v1019_v57, %v1018_v60  ;;  %v1023_v32 = vshll.u32 %v1022_v3, 23  ;;  %v1607_v41 = vshll.u32 %v4375_v48, %v4860_v23 }
 0x152   :  { %v1608_v15 = vshrl.u32 %v4376_v52, %v4949_v51  ;;  %vm947_vm7 = vcmp.lt.s32.totalorder %v4544_v24, 0  ;;  %v1541_v40 = vadd.s32 1, %v4968_v4  ;;  %v1610_v28 = vshll.u32 %v4376_v52, %v4860_v23  ;;  %v4047_v5 = vpop.eup %4046 }
 0x153   :  { %v1611_v35 = vshrl.u32 %v4378_v59, %v4949_v51  ;;  %v1613_v16 = vshll.u32 %v4378_v59, %v4860_v23  ;;  %vm4996_vm8 = vcmp.le.f32.partialorder %v945_v21, 0.7853982  ;;  %v1024_v13 = vor.u32 4788187, %v1023_v32  ;;  %v4049_v26 = vpop.eup %4048 }
 0x154   :  { %v1594_v19 = vand.u32 8388607, %v1587_v37  ;;  %v1606_v36 = vor.u32 %v1605_v46, %v1604_v27  ;;  %v1614_v9 = vshrl.u32 %v4379_v6, %v4949_v51  ;;  %v941_v62 = vxor.u32 2147483648, %v4047_v5 }
 0x155   :  { %v1027_v22 = vcvt.s32.f32 %v1020_v10  ;;  %v1542_v38 = vsel %vm1540_vm6, %v1541_v40, %v4968_v4  ;;  %v1616_v21 = vshll.u32 %v4379_v6, %v4860_v23  ;;  %v938_v11 = vxor.u32 2147483648, %v4049_v26 }
 0x156   :  { %v1025_v29 = vand.u32 2147483647, %v1024_v13  ;;  %v1543_v33 = vadd.s32 %v1542_v38, %v1538_v49  ;;  %v1609_v30 = vor.u32 %v1608_v15, %v1607_v41  ;;  %v942_v8 = vsel %vm940_vm5, %v941_v62, %v4049_v26  ;;  %v5066_v26 = vld [vmem:[%s6197_s9 + $0x8] sm:$0xf] }
 0x157   :  { %v1612_v39 = vor.u32 %v1611_v35, %v1610_v28  ;;  %v1615_v47 = vor.u32 %v1614_v9, %v1613_v16  ;;  %v1617_v63 = vshrl.u32 %v4380_v17, %v4949_v51  ;;  %v939_v31 = vsel %vm937_vm2, %v4047_v5, %v938_v11 }
 0x158   :  { %v1028_v34 = vmul.f32 %v1027_v22, %v1025_v29  ;;  %v1544_v50 = vadd.s32 536870912, %v1543_v33  ;;  %vm1619_vm9 = vcmp.lt.s32.totalorder %v4956_v7, 1  ;;  %v943_v23 = vsel %vm936_vm3, %v939_v31, %v942_v8 }
 0x159   :  { %v1595_v42 = vor.u32 8388608, %v1594_v19  ;;  %v1618_v20 = vor.u32 %v1617_v63, %v1616_v21  ;;  %vm1622_vm10 = vcmp.lt.s32.totalorder %v4956_v7, 4  ;;  %v944_v2 = vsel %vm933_vm4, nan, %v943_v23  ;;  %v5080_v21 = vld [vmem:[%s6197_s9] sm:$0xff] }
 0x15a   :  { %v1029_v60 = vxor.u32 2147483648, %v1028_v34  ;;  %v5022_v4 = vshrl.u32 %v1544_v50, 30  ;;  %vm1621_vm11 = vcmp.lt.s32.totalorder %v4956_v7, 3  ;;  %v1049_v57 = vsel %vm182_vm15, %v944_v2, %v4536_v12 }
 0x15b   :  { %vm1620_vm12 = vcmp.lt.s32.totalorder %v4956_v7, 2  ;;  %v1627_v53 = vsel %vm1619_vm9, %v1606_v36, %v1609_v30  ;;  %v1628_v3 = vsel %vm1622_vm10, %v1615_v47, 920167782  ;;  %1059 = vrot.lane.b32.xlu0 %v1049_v57, %s4381_s12  ;;  %v1603_v49 = vshrl.u32 %v4377_v56, %v4949_v51 }
 0x15c   :  { %v1030_v27 = vsel %vm947_vm7, %v1029_v60, %v1028_v34  ;;  %v1546_v46 = vshll.u32 %v5022_v4, 30  ;;  %v1624_v12 = vsel %vm1622_vm10, %v1612_v39, 2102212464  ;;  %v1629_v32 = vsel %vm1621_vm11, %v1612_v39, %v1628_v3 }
 0x15d   :  { %v1033_v10 = vsel %vm4996_vm8, %v4544_v24, %v1030_v27  ;;  %v1631_v41 = vsel %vm1619_vm9, %v1609_v30, %v1612_v39  ;;  %v1632_v15 = vsel %vm1622_vm10, %v1618_v20, 1326507024  ;;  %v1630_v51 = vsel %vm1620_vm12, %v1627_v53, %v1629_v32 }
 0x15e   :  { %4050 = vcosq.f32 %v1033_v10  ;;  %v1547_v40 = vsub.s32 %v1543_v33, %v1546_v46  ;;  %v1032_v28 = vsel %vm947_vm7, %v1031_v0, %v4878_v54  ;;  %v1633_v35 = vsel %vm1621_vm11, %v1615_v47, %v1632_v15 }
 0x15f   :  { %4052 = vsinq.f32 %v1033_v10  ;;  %v1635_v16 = vshll.u32 %v1595_v42, 8  ;;  %v1623_v13 = vsel %vm1619_vm9, %v1603_v49, %v1606_v36  ;;  %v1625_v19 = vsel %vm1621_vm11, %v1609_v30, %v1624_v12 }
 0x160   :  { %v1549_v5 = vsub.s32 0, %v1547_v40  ;;  %v1634_v9 = vsel %vm1620_vm12, %v1631_v41, %v1633_v35  ;;  %v1034_v36 = vsel %vm4996_vm8, 0, %v1032_v28  ;;  %vm425_vm13 = vcmask 1043456  }
 0x161   :  { %v5068_v54 = vmul.u32.u64.low %v1635_v16, %v1634_v9  ;;  %v5069_v0 = vmul.u32.u64.high %v1635_v16, %v1634_v9, %v5068_v54  ;;  %v5071_v62 = vmul.u32.u64.low %v1635_v16, %v1630_v51  ;;  %v5072_v22 = vmul.u32.u64.high %v1635_v16, %v1630_v51, %v5071_v62  ;;  %3820 = vmatprep.subr.msk.mxu0 %vm425_vm13, %v5066_v26  ;;  %3827 = vmatprep.subr.msk.mxu1 %vm425_vm13, %v5066_v26 }
 0x162   :  { %v3694_v38 = vmin.u32 %v1549_v5, %v1547_v40  ;;  %v1626_v11 = vsel %vm1620_vm12, %v1623_v13, %v1625_v19  ;;  %3821 = vmatpush3.msk.msra.mxu0 %vm425_vm13, %v5066_v26  ;;  %3828 = vmatpush3.msk.msra.mxu1 %vm425_vm13, %v5066_v26  ;;  %v1038_v18 = vadd.s32 3, %v1034_v36  ;;  %v1539_v31 = vadd.s32 %v4967_v55, %v4959_v61 }
 0x163   :  { %vm1644_vm14 = vc.u32 %v5069_v0, %v5071_v62  ;;  %v1645_v7 = vadd.s32 1, %v5072_v22  ;;  %3822 = vmatprep.subr.mxu0 %v5080_v21  ;;  %3829 = vmatprep.subr.mxu1 %v5080_v21  ;;  %v1642_v30 = vmul.u32 %v1635_v16, %v1626_v11  ;;  %vm1037_vm4 = vweird.f32 %v4544_v24 }
 0x164   :  { %v1551_v29 = vclz %v3694_v38  ;;  %3823 = vmatpush3.msra.mxu0 %v5080_v21  ;;  %3830 = vmatpush3.msra.mxu1 %v5080_v21  ;;  %v1039_v47 = vand.u32 3, %v1038_v18  ;;  %vm1485_vm5 = vcmp.lt.s32.totalorder %v4553_v44, 0  ;;  %v1569_v9 = vsub.s32 4, %v5022_v4 }
 0x165   :  { %v1646_v8 = vsel %vm1644_vm14, %v1645_v7, %v5072_v22  ;;  %3834 = vmatprep.subr.msk.mxu0 %vm425_vm13, %v5066_v26  ;;  %3841 = vmatprep.subr.msk.mxu1 %vm425_vm13, %v5066_v26  ;;  %vm5118_vm6 = vcmp.le.f32.partialorder %v1483_v25, 0.7853982  ;;  %vm1589_vm9 = vcmp.lt.s32.totalorder %v4551_v43, 0  ;;  %vm1588_vm11 = vcmp.le.f32.partialorder %v1587_v37, 0.7853982 }
 0x166   :  { %v3695_v33 = vadd.s32 4294967294, %v1551_v29  ;;  %v1647_v39 = vadd.s32 %v1646_v8, %v1642_v30  ;;  %vm1041_vm1 = vcmp.eq.s32.totalorder %v1039_v47, 0  ;;  %vm1044_vm2 = vcmp.eq.s32.totalorder %v1039_v47, 2 }
 0x167   :  { %vm1040_vm3 = vcmp.lt.s32.totalorder %v1039_v47, 2  ;;  %v1570_v38 = vsel %vm1485_vm5, %v1569_v9, %v5022_v4  ;;  %v1643_v29 = vadd.s32 %v5071_v62, %v5069_v0  ;;  %vm1575_vm14 = vweird.f32 %v4553_v44 }
 0x168   :  { %vm3696_vm0 = vcmp.lt.s32.totalorder %v3695_v33, 0  ;;  %v1648_v23 = vadd.s32 536870912, %v1647_v39  ;;  %v1572_v7 = vsel %vm5118_vm6, 0, %v1570_v38 }
 0x169   :  { %v1554_v63 = vsel %vm3696_vm0, 0, %v3695_v33 }
 0x16a   :  { %v1555_v34 = vsub.s32 32, %v1554_v63  ;;  %v1559_v50 = vsub.s32 4294967266, %v1554_v63  ;;  %v1556_v20 = vshll.u32 %v1547_v40, %v1554_v63  ;;  %v5106_v3 = vshrl.u32 %v1648_v23, 30 }
 0x16b   :  { %v4051_v42 = vpop.eup %4050  ;;  %v1576_v63 = vadd.s32 3, %v1572_v7 }
 0x16c   :  { %v4053_v2 = vpop.eup %4052  ;;  %v1045_v60 = vxor.u32 2147483648, %v4051_v42  ;;  %v1557_v57 = vshrl.u32 %v1539_v31, %v1555_v34  ;;  %v1560_v53 = vadd.s32 127, %v1559_v50  ;;  %v1650_v10 = vshll.u32 %v5106_v3, 30 }
 0x16d   :  { %v1042_v27 = vxor.u32 2147483648, %v4053_v2  ;;  %v1577_v4 = vand.u32 3, %v1576_v63 }
 0x16e   :  { %v1046_v46 = vsel %vm1044_vm2, %v1045_v60, %v4053_v2  ;;  %v1558_v49 = vor.u32 %v1557_v57, %v1556_v20  ;;  %v1561_v12 = vshll.u32 %v1560_v53, 23  ;;  %v1651_v41 = vsub.s32 %v1647_v39, %v1650_v10 }
 0x16f   :  { %v1043_v61 = vsel %vm1041_vm1, %v4051_v42, %v1042_v27  ;;  %vm1582_vm8 = vcmp.eq.s32.totalorder %v1577_v4, 2  ;;  %v1673_v60 = vsub.s32 4, %v5106_v3  ;;  %vm1579_vm10 = vcmp.eq.s32.totalorder %v1577_v4, 0 }
 0x170   :  { %v1047_v55 = vsel %vm1040_vm3, %v1043_v61, %v1046_v46  ;;  %v1562_v32 = vor.u32 4788187, %v1561_v12  ;;  %v1565_v28 = vcvt.s32.f32 %v1558_v49  ;;  %v1653_v35 = vsub.s32 0, %v1651_v41 }
 0x171   :  { %v1048_v15 = vsel %vm1037_vm4, nan, %v1047_v55  ;;  %vm1578_vm12 = vcmp.lt.s32.totalorder %v1577_v4, 2  ;;  %v1674_v10 = vsel %vm1589_vm9, %v1673_v60, %v5106_v3  ;;  %vm1679_vm3 = vweird.f32 %v4551_v43 }
 0x172   :  { %v1050_v40 = vsel %vm182_vm15, %v1048_v15, %v4544_v24  ;;  %v1563_v51 = vand.u32 2147483647, %v1562_v32  ;;  %v3698_v5 = vmin.u32 %v1653_v35, %v1651_v41  ;;  %v1676_v37 = vsel %vm1588_vm11, 0, %v1674_v10 }
 0x173   :  { %1061 = vrot.lane.b32.xlu0 %v1050_v40, %s4381_s12  ;;  %v1680_v55 = vadd.s32 3, %v1676_v37  ;;  %vm415_vm4 = vcmask 31744  }
 0x174   :  { %v1566_v16 = vmul.f32 %v1565_v28, %v1563_v51  ;;  %v1655_v19 = vclz %v3698_v5  ;;  %v1052_v5 = vpop.permute.xlu1 %1051 }
 0x175   :  { %v1681_v32 = vand.u32 3, %v1680_v55 }
 0x176   :  { %v1567_v13 = vxor.u32 2147483648, %v1566_v16  ;;  %v3699_v22 = vadd.s32 4294967294, %v1655_v19  ;;  %v5149_v19 = vld [vmem:[%s6221_s28] sm:$0xff] }
 0x177   :  { %vm1686_vm0 = vcmp.eq.s32.totalorder %v1681_v32, 2  ;;  %vm1683_vm1 = vcmp.eq.s32.totalorder %v1681_v32, 0  ;;  %vm1682_vm2 = vcmp.lt.s32.totalorder %v1681_v32, 2 }
 0x178   :  { %v1568_v24 = vsel %vm1485_vm5, %v1567_v13, %v1566_v16  ;;  %vm3700_vm7 = vcmp.lt.s32.totalorder %v3699_v22, 0  ;;  %vm418_vm5 = vcmask 97280  }
 0x179   :  { %v1571_v36 = vsel %vm5118_vm6, %v4553_v44, %v1568_v24  ;;  %v1658_v11 = vsel %vm3700_vm7, 0, %v3699_v22 }
 0x17a   :  { %4054 = vcosq.f32 %v1571_v36  ;;  %v1659_v18 = vsub.s32 32, %v1658_v11  ;;  %v1663_v25 = vsub.s32 4294967266, %v1658_v11  ;;  %v1660_v33 = vshll.u32 %v1651_v41, %v1658_v11 }
 0x17b   :  { %4056 = vsinq.f32 %v1571_v36 }
 0x17c   :  { %v1661_v30 = vshrl.u32 %v1643_v29, %v1659_v18  ;;  %v1664_v8 = vadd.s32 127, %v1663_v25  ;;  %v2114_v29 = vld [vmem:[%s6198_s10 + $0x8] sm:$0xff] }
 0x17e   :  { %v1662_v39 = vor.u32 %v1661_v30, %v1660_v33  ;;  %v1665_v47 = vshll.u32 %v1664_v8, 23 }
 0x180   :  { %v1666_v31 = vor.u32 4788187, %v1665_v47  ;;  %v1669_v50 = vcvt.s32.f32 %v1662_v39  ;;  %v4383_v39 = vmov 0.0  }
 0x182   :  { %v1667_v34 = vand.u32 2147483647, %v1666_v31 }
 0x184   :  { %v1670_v23 = vmul.f32 %v1669_v50, %v1667_v34  ;;  %v3648_v50 = vld [vmem:[#allocation12] ss:$0 sm:$0xff] }
 0x186   :  { %v1671_v0 = vxor.u32 2147483648, %v1670_v23 }
 0x187   :  { %v4055_v42 = vpop.eup %4054 }
 0x188   :  { %v4057_v20 = vpop.eup %4056  ;;  %v1583_v2 = vxor.u32 2147483648, %v4055_v42  ;;  %v1672_v53 = vsel %vm1589_vm9, %v1671_v0, %v1670_v23 }
 0x189   :  { %v1580_v62 = vxor.u32 2147483648, %v4057_v20  ;;  %v1675_v46 = vsel %vm1588_vm11, %v4551_v43, %v1672_v53 }
 0x18a   :  { %v1584_v57 = vsel %vm1582_vm8, %v1583_v2, %v4057_v20  ;;  %4058 = vcosq.f32 %v1675_v46 }
 0x18b   :  { %v1581_v27 = vsel %vm1579_vm10, %v4055_v42, %v1580_v62  ;;  %4060 = vsinq.f32 %v1675_v46  ;;  %v4184_v46 = vld [vmem:[%s6220_s25] sm:$0xff] }
 0x18c   :  { %v1585_v49 = vsel %vm1578_vm12, %v1581_v27, %v1584_v57  ;;  %v4183_v27 = vld [vmem:[%s6220_s25 + $0x8] sm:$0xff] }
 0x18d   :  { %v1586_v12 = vsel %vm1575_vm14, nan, %v1585_v49  ;;  %v4386_v49 = vmov 5  }
 0x18e   :  { %v1691_v61 = vsel %vm182_vm15, %v1586_v12, %v4553_v44  ;;  %v4387_v12 = vmov 3  }
 0x18f   :  { %1701 = vrot.lane.b32.xlu0 %v1691_v61, %s4381_s12 }
 0x197   :  { %v4059_v41 = vpop.eup %4058 }
 0x198   :  { %v4061_v15 = vpop.eup %4060  ;;  %v1687_v40 = vxor.u32 2147483648, %v4059_v41 }
 0x199   :  { %v1684_v51 = vxor.u32 2147483648, %v4061_v15 }
 0x19a   :  { %v1688_v28 = vsel %vm1686_vm0, %v1687_v40, %v4061_v15  ;;  %v2116_v15 = vld [vmem:[%s6232_s29 + $0x8] sm:$0xff] }
 0x19b   :  { %v1685_v35 = vsel %vm1683_vm1, %v4059_v41, %v1684_v51  ;;  %vm2249_vm6 = vcmp.gt.s32.totalorder %v2116_v15, 0 }
 0x19c   :  { %v1689_v3 = vsel %vm1682_vm2, %v1685_v35, %v1688_v28  ;;  %v2115_v35 = vld [vmem:[%s6232_s29] sm:$0xff] }
 0x19d   :  { %v1690_v16 = vsel %vm1679_vm3, nan, %v1689_v3  ;;  %vm2248_vm7 = vcmp.gt.s32.totalorder %v2115_v35, 0 }
 0x19e   :  { %v1692_v44 = vsel %vm182_vm15, %v1690_v16, %v4551_v43 }
 0x19f   :  { %1703 = vrot.lane.b32.xlu0 %v1692_v44, %s4381_s12 }
 0x1ac   :  { %v410_v13 = vpop.permute.xlu1 %409 }
 0x1ad   :  { %v416_v9 = vsel %vm415_vm4, %v5149_v19, %v410_v13  ;;  %v2250_v13 = vsel %vm2248_vm7, 1, %v4372_v1 }
 0x1ae   :  { %3824 = vmatprep.mubr.msk.f32.mxu0 %vm418_vm5, %v416_v9 }
 0x1b0   :  { %v1054_v36 = vpop.permute.xlu1 %1053 }
 0x1b4   :  { %v1694_v18 = vpop.permute.xlu1 %1693 }
 0x1b8   :  { %v1696_v33 = vpop.permute.xlu1 %1695 }
 0x1b9   :  { %v412_v54 = vpop.permute.xlu0 %411 }
 0x1ba   :  { %v417_v43 = vsel %vm415_vm4, %v4870_v58, %v412_v54  ;;  %v5217_v54 = vld [vmem:[#allocation9] ss:$0 sm:$0xff] }
 0x1bb   :  { %3825 = vmatmul.mubr.msk.f32.vlgmr.msra.gmra.mxu0 %vm418_vm5, %v417_v43 }
 0x1bc   :  { %3835 = vmatpush3.msk.msra.mxu0 %vm425_vm13, %v5066_v26 }
 0x1bd   :  { %3836 = vmatprep.subr.mxu0 %v5080_v21 }
 0x1be   :  { %3837 = vmatpush3.msra.mxu0 %v5080_v21 }
 0x1bf   :  { %3848 = vmatprep.subr.msk.mxu0 %vm425_vm13, %v5066_v26 }
 0x1cd   :  { %v1060_v24 = vpop.permute.xlu0 %1059 }
 0x1ce   :  { %v1065_v22 = vsel %vm415_vm4, %v1052_v5, %v1060_v24  ;;  %v2251_v5 = vsel %vm2249_vm6, 1, %v4372_v1 }
 0x1cf   :  { %3838 = vmatprep.mubr.msk.f32.mxu0 %vm418_vm5, %v1065_v22  ;;  %v5221_v22 = vld [vmem:[#allocation10] ss:$0 sm:$0xff] }
 0x1e5   :  { %v1062_v38 = vpop.permute.xlu0 %1061 }
 0x1e6   :  { %v1066_v11 = vsel %vm415_vm4, %v1054_v36, %v1062_v38 }
 0x1e7   :  { %3839 = vmatmul.mubr.msk.f32.vlgmr.msra.gmra.mxu0 %vm418_vm5, %v1066_v11 }
 0x1e8   :  { %3849 = vmatpush3.msk.msra.mxu0 %vm425_vm13, %v5066_v26  ;;  %v2113_v26 = vld [vmem:[%s6198_s10] sm:$0xff] }
 0x1e9   :  { %3850 = vmatprep.subr.mxu0 %v5080_v21 }
 0x1ea   :  { %3851 = vmatpush3.msra.mxu0 %v5080_v21  ;;  %v4384_v21 = vmov 1  }
 0x1eb   :  { %3862 = vmatprep.subr.mxu0 %v2114_v29  ;;  %4031 = vset.pattern.permute.xlu1 %v4384_v21 }
 0x1ec   :  { %4032 = vset.pattern.permute.xlu0 %v4384_v21 }
 0x201   :  { %v1702_v25 = vpop.permute.xlu0 %1701 }
 0x202   :  { %v1707_v7 = vsel %vm415_vm4, %v1694_v18, %v1702_v25 }
 0x203   :  { %3852 = vmatprep.mubr.msk.f32.mxu0 %vm418_vm5, %v1707_v7 }
 0x211   :  { %v1704_v30 = vpop.permute.xlu0 %1703 }
 0x212   :  { %v1708_v8 = vsel %vm415_vm4, %v1696_v33, %v1704_v30 }
 0x213   :  { %3853 = vmatmul.mubr.msk.f32.vlgmr.msra.gmra.mxu0 %vm418_vm5, %v1708_v8 }
 0x214   :  { %3863 = vmatpush3.msra.mxu0 %v2114_v29  ;;  %3866 = vmatprep.mubr.f32.mxu0 %v4383_v39 }
 0x215   :  { %3864 = vmatprep.subr.mxu0 %v2113_v26 }
 0x216   :  { %3865 = vmatpush3.msra.mxu0 %v2113_v26 }
 0x217   :  { %3867 = vmatmul.mubr.f32.vlgmr.msra.gmra.mxu0 %v4383_v39  ;;  %3876 = vmatprep.subr.mxu0 %v2114_v29 }
 0x218   :  { %3877 = vmatpush3.msra.mxu0 %v2114_v29 }
 0x219   :  { %3878 = vmatprep.subr.mxu0 %v2113_v26 }
 0x21a   :  { %3879 = vmatpush3.msra.mxu0 %v2113_v26 }
 0x21b   :  { %3890 = vmatprep.subr.mxu0 %v2114_v29 }
 0x27b   :  { %v3826_v47 = vpop.f32.mrf.mxu0 }
 0x27c   :  { %v501_v42 = vadd.f32 %v3826_v47, %v3648_v50 }
 0x27d   :  { %v495_v63 = vpop.f32.mrf.mxu0 }
 0x27e   :  { %v496_v2 = vadd.f32 %v3648_v50, %v495_v63 }
 0x2a7   :  { %v5183_v31 = vpop.f32.mrf.mxu0 }
 0x2a9   :  { %v5185_v34 = vpop.f32.mrf.mxu0 }
 0x2d3   :  { %v5187_v4 = vpop.f32.mrf.mxu0 }
 0x2d5   :  { %v5189_v23 = vpop.f32.mrf.mxu0 }
 0x2d7   :  { %v3868_v20 = vpop.f32.mrf.mxu0 }
 0x2d8   :  { %v2199_v0 = vadd.f32 %v3868_v20, %v501_v42 }
 0x2d9   :  { %v2189_v62 = vpop.f32.mrf.mxu0 }
 0x2da   :  { %4062 = vtanh.f32 %v2199_v0  ;;  %v2198_v60 = vadd.f32 %v2189_v62, %v496_v2  ;;  %v3716_v10 = vmul.f32 -1.442695, %v2199_v0 }
 0x2dc   :  { %4064 = vtanh.f32 %v2198_v60  ;;  %v3715_v61 = vmul.f32 -1.442695, %v2198_v60 }
 0x2dd   :  { %4066 = vpow2.f32 %v3716_v10 }
 0x2de   :  { %4068 = vpow2.f32 %v3715_v61 }
 0x2e7   :  { %v4063_v57 = vpop.eup %4062 }
 0x2e8   :  { %2220 = vrot.lane.b32.xlu0 %v4063_v57, %s4385_s15 }
 0x2e9   :  { %v4065_v53 = vpop.eup %4064 }
 0x2ea   :  { %2218 = vrot.lane.b32.xlu1 %v4065_v53, %s4385_s15  ;;  %v4067_v37 = vpop.eup %4066 }
 0x2eb   :  { %v4069_v55 = vpop.eup %4068  ;;  %v2207_v32 = vadd.f32 1.0, %v4067_v37 }
 0x2ec   :  { %511 = vperm.xlu0 %4032, %v4183_v27   ;;  %v2206_v41 = vadd.f32 1.0, %v4069_v55 }
 0x2ed   :  { %4070 = vrcp.f32 %v2207_v32 }
 0x2ee   :  { %507 = vperm.xlu1 %4031, %v4184_v46   ;;  %4072 = vrcp.f32 %v2206_v41 }
 0x2f0   :  { %4034 = vset.pattern.permute.xlu0 %v4386_v49 }
 0x2f1   :  { %1793 = vperm.xlu0 %4034, %v4184_v46  }
 0x2f2   :  { %4033 = vset.pattern.permute.xlu1 %v4387_v12 }
 0x2f3   :  { %1151 = vperm.xlu1 %4033, %v4184_v46  }
 0x2f5   :  { %4037 = vset.pattern.permute.xlu0 %v4372_v1 }
 0x2f7   :  { %1155 = vperm.xlu1 %4033, %v4183_v27  }
 0x2fa   :  { %v5204_v40 = vpop.eup %4070 }
 0x2fb   :  { %4035 = vset.pattern.permute.xlu1 %v4386_v49  ;;  %v5210_v3 = vpop.eup %4072 }
 0x2fc   :  { %1797 = vperm.xlu1 %4035, %v4183_v27  }
 0x300   :  { %4036 = vset.pattern.permute.xlu1 %v4372_v1 }
 0x35a   :  { %v2221_v51 = vpop.permute.xlu0 %2220 }
 0x35b   :  { %v2225_v28 = vmul.f32 %v5204_v40, %v2221_v51 }
 0x35c   :  { %v2219_v16 = vpop.permute.xlu1 %2218 }
 0x35d   :  { %2230 = vrot.lane.b32.xlu0 %v2225_v28, %s4388_s21  ;;  %v2224_v44 = vmul.f32 %v5210_v3, %v2219_v16 }
 0x35f   :  { %2228 = vrot.lane.b32.xlu1 %v2224_v44, %s4388_s21 }
 0x361   :  { %2256 = vperm.xlu0 %4037, %v2251_v5  }
 0x363   :  { %2253 = vperm.xlu1 %4036, %v2250_v13  }
 0x365   :  { %730 = vrot.lane.b32.xlu0 %v5149_v19, %s4389_s1 }
 0x367   :  { %v512_v9 = vpop.permute.xlu0 %511 }
 0x368   :  { %v515_v43 = vmul.f32 %v5217_v54, %v512_v9 }
 0x369   :  { %v508_v24 = vpop.permute.xlu1 %507  ;;  %732 = vrot.lane.b32.xlu0 %v4870_v58, %s4389_s1 }
 0x36a   :  { %v5224_v36 = vadd.f32 %v5221_v22, %v515_v43  ;;  %v514_v38 = vmul.f32 %v5217_v54, %v508_v24 }
 0x36c   :  { %v625_v11 = vand.u32 2139095040, %v5224_v36  ;;  %v5230_v29 = vadd.f32 %v5221_v22, %v514_v38  ;;  %v1794_v18 = vpop.permute.xlu0 %1793  ;;  %v622_v47 = vand.u32 2147483647, %v5224_v36 }
 0x36d   :  { %v1800_v26 = vmul.f32 %v5217_v54, %v1794_v18  ;;  %1372 = vrot.lane.b32.xlu0 %v5149_v19, %s4390_s5 }
 0x36e   :  { %v626_v25 = vshrl.u32 %v625_v11, 23  ;;  %v521_v7 = vand.u32 2139095040, %v5230_v29  ;;  %v1152_v33 = vpop.permute.xlu1 %1151  ;;  %v518_v62 = vand.u32 2147483647, %v5230_v29  ;;  %v629_v60 = vand.u32 8388607, %v622_v47 }
 0x36f   :  { %v1158_v30 = vmul.f32 %v5217_v54, %v1152_v33  ;;  %v5242_v2 = vadd.f32 %v5221_v22, %v1800_v26 }
 0x370   :  { %v3664_v8 = vadd.s32 4294967169, %v626_v25  ;;  %v522_v21 = vshrl.u32 %v521_v7, 23  ;;  %v525_v10 = vand.u32 8388607, %v518_v62  ;;  %v630_v61 = vor.u32 8388608, %v629_v60 }
 0x371   :  { %v5238_v63 = vadd.f32 %v5221_v22, %v1158_v30  ;;  %1374 = vrot.lane.b32.xlu0 %v4870_v58, %s4390_s5  ;;  %v1807_v46 = vand.u32 2139095040, %v5242_v2 }
 0x372   :  { %v3660_v50 = vadd.s32 4294967169, %v522_v21  ;;  %v632_v20 = vadd.s32 1, %v3664_v8  ;;  %v1156_v57 = vpop.permute.xlu1 %1155  ;;  %v526_v51 = vor.u32 8388608, %v525_v10  ;;  %v5255_v28 = vshll.u32 %v630_v61, 8 }
 0x373   :  { %v1165_v42 = vand.u32 2139095040, %v5238_v63  ;;  %v1159_v12 = vmul.f32 %v5217_v54, %v1156_v57  ;;  %v1808_v41 = vshrl.u32 %v1807_v46, 23  ;;  %v1162_v25 = vand.u32 2147483647, %v5238_v63 }
 0x374   :  { %v528_v0 = vadd.s32 1, %v3660_v50  ;;  %vm633_vm9 = vcmp.gt.s32.totalorder %v632_v20, 0  ;;  %v5273_v8 = vshll.u32 %v526_v51, 8 }
 0x375   :  { %v1166_v27 = vshrl.u32 %v1165_v42, 23  ;;  %v634_v55 = vsel %vm633_vm9, %v632_v20, 0  ;;  %v5253_v15 = vadd.f32 %v5221_v22, %v1159_v12  ;;  %v5265_v11 = vadd.s32 4294967169, %v1808_v41  ;;  %2014 = vrot.lane.b32.xlu0 %v5149_v19, %s4391_s22 }
 0x376   :  { %vm529_vm8 = vcmp.gt.s32.totalorder %v528_v0, 0  ;;  %v5257_v35 = vand.u32 31, %v634_v55  ;;  %v5270_v33 = vshrl.u32 %v634_v55, 5 }
 0x377   :  { %v530_v53 = vsel %vm529_vm8, %v528_v0, 0  ;;  %v3682_v32 = vadd.s32 4294967169, %v1166_v27  ;;  %v1269_v7 = vand.u32 2139095040, %v5253_v15  ;;  %v1798_v0 = vpop.permute.xlu1 %1797 }
 0x378   :  { %v532_v49 = vand.u32 31, %v530_v53  ;;  %v531_v13 = vshrl.u32 %v530_v53, 5  ;;  %v637_v20 = vsub.s32 32, %v5257_v35  ;;  %v1801_v12 = vmul.f32 %v5217_v54, %v1798_v0 }
 0x379   :  { %v1172_v38 = vadd.s32 1, %v3682_v32  ;;  %2016 = vrot.lane.b32.xlu0 %v4870_v58, %s4391_s22  ;;  %v648_v0 = vshll.u32 %v4378_v59, %v5257_v35  ;;  %vm654_vm1 = vcmp.lt.s32.totalorder %v5270_v33, 1  ;;  %vm655_vm3 = vcmp.lt.s32.totalorder %v5270_v33, 2 }
 0x37a   :  { %v533_v37 = vsub.s32 32, %v532_v49  ;;  %v535_v16 = vshll.u32 %v4377_v56, %v532_v49  ;;  %v538_v5 = vshll.u32 %v4375_v48, %v532_v49  ;;  %v541_v43 = vshll.u32 %v4376_v52, %v532_v49 }
 0x37b   :  { %v544_v18 = vshll.u32 %v4378_v59, %v532_v49  ;;  %v547_v42 = vshll.u32 %v4379_v6, %v532_v49  ;;  %vm550_vm10 = vcmp.lt.s32.totalorder %v531_v13, 1  ;;  %vm1173_vm11 = vcmp.gt.s32.totalorder %v1172_v38, 0 }
 0x37c   :  { %v536_v44 = vshrl.u32 %v4375_v48, %v533_v37  ;;  %v539_v9 = vshrl.u32 %v4376_v52, %v533_v37  ;;  %v542_v24 = vshrl.u32 %v4378_v59, %v533_v37  ;;  %v534_v30 = vshrl.u32 %v4377_v56, %v533_v37 }
 0x37d   :  { %v545_v50 = vshrl.u32 %v4379_v6, %v533_v37  ;;  %v548_v57 = vshrl.u32 %v4380_v17, %v533_v37  ;;  %vm552_vm12 = vcmp.lt.s32.totalorder %v531_v13, 3  ;;  %vm553_vm14 = vcmp.lt.s32.totalorder %v531_v13, 4 }
 0x37e   :  { %v537_v26 = vor.u32 %v536_v44, %v535_v16  ;;  %v540_v21 = vor.u32 %v539_v9, %v538_v5  ;;  %v543_v60 = vor.u32 %v542_v24, %v541_v43  ;;  %vm551_vm0 = vcmp.lt.s32.totalorder %v531_v13, 2 }
 0x37f   :  { %v546_v53 = vor.u32 %v545_v50, %v544_v18  ;;  %v549_v27 = vor.u32 %v548_v57, %v547_v42  ;;  %v1270_v37 = vshrl.u32 %v1269_v7, 23  ;;  %v638_v41 = vshrl.u32 %v4377_v56, %v637_v20 }
 0x380   :  { %v554_v46 = vsel %vm550_vm10, %v534_v30, %v537_v26  ;;  %v555_v49 = vsel %vm553_vm14, %v543_v60, 2102212464  ;;  %v558_v10 = vsel %vm550_vm10, %v537_v26, %v540_v21  ;;  %v1174_v51 = vsel %vm1173_vm11, %v1172_v38, 0 }
 0x381   :  { %v556_v19 = vsel %vm552_vm12, %v540_v21, %v555_v49  ;;  %v559_v61 = vsel %vm553_vm14, %v546_v53, 920167782  ;;  %v562_v54 = vsel %vm550_vm10, %v540_v21, %v543_v60  ;;  %v563_v44 = vsel %vm553_vm14, %v549_v27, 1326507024 }
 0x382   :  { %v557_v55 = vsel %vm551_vm0, %v554_v46, %v556_v19  ;;  %v560_v32 = vsel %vm552_vm12, %v543_v60, %v559_v61  ;;  %v564_v5 = vsel %vm552_vm12, %v546_v53, %v563_v44  ;;  %v639_v38 = vshll.u32 %v4377_v56, %v5257_v35 }
 0x383   :  { %v561_v16 = vsel %vm551_vm0, %v558_v10, %v560_v32  ;;  %v573_v43 = vmul.u32 %v5273_v8, %v557_v55  ;;  %v565_v24 = vsel %vm551_vm0, %v562_v54, %v564_v5  ;;  %v640_v18 = vshrl.u32 %v4375_v48, %v637_v20 }
 0x384   :  { %v5296_v9 = vmul.u32.u64.low %v5273_v8, %v561_v16  ;;  %v5297_v58 = vmul.u32.u64.high %v5273_v8, %v561_v16, %v5296_v9  ;;  %v642_v7 = vshll.u32 %v4375_v48, %v5257_v35  ;;  %v643_v21 = vshrl.u32 %v4376_v52, %v637_v20 }
 0x385   :  { %v5308_v30 = vmul.u32.u64.low %v5273_v8, %v565_v24  ;;  %v5309_v26 = vmul.u32.u64.high %v5273_v8, %v565_v24, %v5308_v30  ;;  %v645_v50 = vshll.u32 %v4376_v52, %v5257_v35  ;;  %v641_v42 = vor.u32 %v640_v18, %v639_v38 }
 0x386   :  { %v646_v13 = vshrl.u32 %v4378_v59, %v637_v20  ;;  %v649_v60 = vshrl.u32 %v4379_v6, %v637_v20  ;;  %v576_v57 = vadd.s32 1, %v5297_v58  ;;  %v644_v53 = vor.u32 %v643_v21, %v642_v7 }
 0x387   :  { %v651_v8 = vshll.u32 %v4379_v6, %v5257_v35  ;;  %v652_v27 = vshrl.u32 %v4380_v17, %v637_v20  ;;  %v1176_v46 = vand.u32 31, %v1174_v51  ;;  %vm575_vm2 = vc.u32 %v5309_v26, %v5296_v9 }
 0x388   :  { %v647_v49 = vor.u32 %v646_v13, %v645_v50  ;;  %v650_v19 = vor.u32 %v649_v60, %v648_v0  ;;  %vm656_vm6 = vcmp.lt.s32.totalorder %v5270_v33, 3  ;;  %v577_v61 = vsel %vm575_vm2, %v576_v57, %v5297_v58 }
 0x389   :  { %v653_v10 = vor.u32 %v652_v27, %v651_v8  ;;  %vm657_vm7 = vcmp.lt.s32.totalorder %v5270_v33, 4  ;;  %v658_v35 = vsel %vm654_vm1, %v638_v41, %v641_v42  ;;  %v662_v55 = vsel %vm654_vm1, %v641_v42, %v644_v53 }
 0x38a   :  { %v578_v20 = vadd.s32 %v577_v61, %v573_v43  ;;  %v659_v32 = vsel %vm657_vm7, %v647_v49, 2102212464  ;;  %v663_v16 = vsel %vm657_vm7, %v650_v19, 920167782  ;;  %v666_v54 = vsel %vm654_vm1, %v644_v53, %v647_v49 }
 0x38b   :  { %v3686_v44 = vadd.s32 4294967169, %v1270_v37  ;;  %v660_v5 = vsel %vm656_vm6, %v644_v53, %v659_v32  ;;  %v664_v24 = vsel %vm656_vm6, %v647_v49, %v663_v16  ;;  %v667_v38 = vsel %vm657_vm7, %v653_v10, 1326507024 }
 0x38c   :  { %v1177_v18 = vsub.s32 32, %v1176_v46  ;;  %v579_v7 = vadd.s32 536870912, %v578_v20  ;;  %v665_v58 = vsel %vm655_vm3, %v662_v55, %v664_v24  ;;  %v668_v41 = vsel %vm656_vm6, %v650_v19, %v667_v38 }
 0x38d   :  { %v661_v43 = vsel %vm655_vm3, %v658_v35, %v660_v5  ;;  %v669_v37 = vsel %vm655_vm3, %v666_v54, %v668_v41  ;;  %v5342_v30 = vmul.u32.u64.low %v5255_v28, %v665_v58  ;;  %v5343_v21 = vmul.u32.u64.high %v5255_v28, %v665_v58, %v5342_v30 }
 0x38e   :  { %v5346_v50 = vshrl.u32 %v579_v7, 30  ;;  %v5349_v42 = vmul.u32.u64.low %v5255_v28, %v669_v37  ;;  %v5350_v13 = vmul.u32.u64.high %v5255_v28, %v669_v37, %v5349_v42  ;;  %v5353_v0 = vadd.f32 %v5221_v22, %v1801_v12 }
 0x38f   :  { %v5356_v60 = vadd.s32 1, %v5265_v11  ;;  %v5359_v33 = vmul.f32 0.0, %v5204_v40  ;;  %v5362_v57 = vmul.f32 0.0, %v5210_v3  ;;  %v5364_v53 = vshrl.u32 %v1174_v51, 5 }
 0x390   :  { %v1276_v8 = vadd.s32 1, %v3686_v44  ;;  %v581_v27 = vshll.u32 %v5346_v50, 30  ;;  %v677_v49 = vmul.u32 %v5255_v28, %v661_v43  ;;  %v680_v19 = vadd.s32 1, %v5343_v21 }
 0x391   :  { %v1169_v22 = vand.u32 8388607, %v1162_v25  ;;  %v1179_v11 = vshll.u32 %v4377_v56, %v1176_v46  ;;  %v1180_v12 = vshrl.u32 %v4375_v48, %v1177_v18  ;;  %vm679_vm8 = vc.u32 %v5350_v13, %v5342_v30 }
 0x392   :  { %v5373_v10 = vsub.s32 %v578_v20, %v581_v27  ;;  %v1182_v51 = vshll.u32 %v4375_v48, %v1176_v46  ;;  %v1188_v61 = vshll.u32 %v4378_v59, %v1176_v46  ;;  %v681_v28 = vsel %vm679_vm8, %v680_v19, %v5343_v21 }
 0x393   :  { %v1183_v35 = vshrl.u32 %v4376_v52, %v1177_v18  ;;  %v1185_v55 = vshll.u32 %v4376_v52, %v1176_v46  ;;  %v1186_v32 = vshrl.u32 %v4378_v59, %v1177_v18  ;;  %v1911_v16 = vand.u32 2139095040, %v5353_v0 }
 0x394   :  { %v584_v20 = vsub.s32 0, %v5373_v10  ;;  %v682_v54 = vadd.s32 %v681_v28, %v677_v49  ;;  %v1189_v44 = vshrl.u32 %v4379_v6, %v1177_v18  ;;  %vm1277_vm9 = vcmp.gt.s32.totalorder %v1276_v8, 0 }
 0x395   :  { %v1170_v5 = vor.u32 8388608, %v1169_v22  ;;  %v1191_v24 = vshll.u32 %v4379_v6, %v1176_v46  ;;  %v1192_v38 = vshrl.u32 %v4380_v17, %v1177_v18  ;;  %v1178_v41 = vshrl.u32 %v4377_v56, %v1177_v18 }
 0x396   :  { %v3661_v7 = vmin.u32 %v584_v20, %v5373_v10  ;;  %v683_v58 = vadd.s32 536870912, %v682_v54  ;;  %v1190_v43 = vor.u32 %v1189_v44, %v1188_v61  ;;  %v1181_v37 = vor.u32 %v1180_v12, %v1179_v11 }
 0x397   :  { %v1184_v21 = vor.u32 %v1183_v35, %v1182_v51  ;;  %v1187_v42 = vor.u32 %v1186_v32, %v1185_v55  ;;  %vm1197_vm10 = vcmp.lt.s32.totalorder %v5364_v53, 4  ;;  %vm1815_vm11 = vcmp.gt.s32.totalorder %v5356_v60, 0 }
 0x398   :  { %v586_v27 = vclz %v3661_v7  ;;  %v1193_v49 = vor.u32 %v1192_v38, %v1191_v24  ;;  %vm1194_vm12 = vcmp.lt.s32.totalorder %v5364_v53, 1  ;;  %vm1196_vm14 = vcmp.lt.s32.totalorder %v5364_v53, 3 }
 0x399   :  { %v1278_v46 = vsel %vm1277_vm9, %v1276_v8, 0  ;;  %v1912_v19 = vshrl.u32 %v1911_v16, 23  ;;  %v5395_v22 = vshrl.u32 %v683_v58, 30  ;;  %v1203_v18 = vsel %vm1197_vm10, %v1190_v43, 920167782 }
 0x39a   :  { %v574_v11 = vadd.s32 %v5296_v9, %v5309_v26  ;;  %v3662_v12 = vadd.s32 4294967294, %v586_v27  ;;  %vm1195_vm0 = vcmp.lt.s32.totalorder %v5364_v53, 2  ;;  %v1199_v51 = vsel %vm1197_vm10, %v1187_v42, 2102212464 }
 0x39b   :  { %v685_v61 = vshll.u32 %v5395_v22, 30  ;;  %v1198_v28 = vsel %vm1194_vm12, %v1178_v41, %v1181_v37  ;;  %v1202_v35 = vsel %vm1194_vm12, %v1181_v37, %v1184_v21  ;;  %v1204_v8 = vsel %vm1196_vm14, %v1187_v42, %v1203_v18 }
 0x39c   :  { %vm3663_vm1 = vcmp.lt.s32.totalorder %v3662_v12, 0  ;;  %v1206_v55 = vsel %vm1194_vm12, %v1184_v21, %v1187_v42  ;;  %v1207_v32 = vsel %vm1197_vm10, %v1193_v49, 1326507024  ;;  %v1210_v16 = vshll.u32 %v1170_v5, 8 }
 0x39d   :  { %v589_v9 = vsel %vm3663_vm1, 0, %v3662_v12  ;;  %v5409_v26 = vsub.s32 %v682_v54, %v685_v61  ;;  %v1200_v20 = vsel %vm1196_vm14, %v1184_v21, %v1199_v51  ;;  %v1208_v44 = vsel %vm1196_vm14, %v1190_v43, %v1207_v32 }
 0x39e   :  { %v590_v24 = vsub.s32 32, %v589_v9  ;;  %v591_v38 = vshll.u32 %v5373_v10, %v589_v9  ;;  %v594_v7 = vsub.s32 4294967266, %v589_v9  ;;  %v1205_v58 = vsel %vm1195_vm0, %v1202_v35, %v1204_v8 }
 0x39f   :  { %v5418_v41 = vand.u32 31, %v1278_v46  ;;  %v604_v5 = vsub.s32 4, %v5346_v50  ;;  %v688_v54 = vsub.s32 0, %v5409_v26  ;;  %v1209_v37 = vsel %vm1195_vm0, %v1206_v55, %v1208_v44 }
 0x3a0   :  { %v592_v21 = vshrl.u32 %v574_v11, %v590_v24  ;;  %v595_v42 = vadd.s32 127, %v594_v7  ;;  %v5424_v27 = vmul.u32.u64.low %v1210_v16, %v1209_v37  ;;  %v5425_v43 = vmul.u32.u64.high %v1210_v16, %v1209_v37, %v5424_v27 }
 0x3a1   :  { %v3665_v10 = vmin.u32 %v688_v54, %v5409_v26  ;;  %v1201_v49 = vsel %vm1195_vm0, %v1198_v28, %v1200_v20  ;;  %v5430_v18 = vmul.u32.u64.low %v1210_v16, %v1205_v58  ;;  %v5431_v12 = vmul.u32.u64.high %v1210_v16, %v1205_v58, %v5430_v18 }
 0x3a2   :  { %v3708_v51 = vadd.s32 4294967169, %v1912_v19  ;;  %vm520_vm2 = vcmp.lt.s32.totalorder %v5230_v29, 0  ;;  %v593_v61 = vor.u32 %v592_v21, %v591_v38  ;;  %v596_v35 = vshll.u32 %v595_v42, 23 }
 0x3a3   :  { %v5438_v11 = vsel %vm1815_vm11, %v5356_v60, 0  ;;  %vm5442_vm3 = vcmp.le.f32.partialorder %v518_v62, 0.7853982  ;;  %v5449_v53 = vsel %vm520_vm2, %v604_v5, %v5346_v50  ;;  %v690_v19 = vclz %v3665_v10 }
 0x3a4   :  { %v597_v28 = vor.u32 4788187, %v596_v35  ;;  %v600_v55 = vcvt.s32.f32 %v593_v61  ;;  %v1217_v32 = vmul.u32 %v1210_v16, %v1201_v49  ;;  %vm1219_vm6 = vc.u32 %v5425_v43, %v5430_v18 }
 0x3a5   :  { %v5453_v60 = vshrl.u32 %v1278_v46, 5  ;;  %v1281_v9 = vsub.s32 32, %v5418_v41  ;;  %v3666_v62 = vadd.s32 4294967294, %v690_v19  ;;  %v1220_v20 = vadd.s32 1, %v5431_v12 }
 0x3a6   :  { %v5457_v44 = vadd.s32 1, %v3708_v51  ;;  %v598_v24 = vand.u32 2147483647, %v597_v28  ;;  %v607_v50 = vsel %vm5442_vm3, 0, %v5449_v53  ;;  %v678_v16 = vadd.s32 %v5342_v30, %v5350_v13 }
 0x3a7   :  { %vm3667_vm7 = vcmp.lt.s32.totalorder %v3666_v62, 0  ;;  %v708_v38 = vsub.s32 4, %v5395_v22  ;;  %v1221_v46 = vsel %vm1219_vm6, %v1220_v20, %v5431_v12  ;;  %v1266_v7 = vand.u32 2147483647, %v5253_v15 }
 0x3a8   :  { %v601_v58 = vmul.f32 %v600_v55, %v598_v24  ;;  %v693_v5 = vsel %vm3667_vm7, 0, %v3666_v62  ;;  %v1222_v54 = vadd.s32 %v1221_v46, %v1217_v32  ;;  %v1283_v37 = vshll.u32 %v4377_v56, %v5418_v41 }
 0x3a9   :  { %v694_v21 = vsub.s32 32, %v693_v5  ;;  %v695_v42 = vshll.u32 %v5409_v26, %v693_v5  ;;  %v698_v27 = vsub.s32 4294967266, %v693_v5  ;;  %v1284_v10 = vshrl.u32 %v4375_v48, %v1281_v9 }
 0x3aa   :  { %v602_v30 = vxor.u32 2147483648, %v601_v58  ;;  %v1223_v13 = vadd.s32 536870912, %v1222_v54  ;;  %v1286_v49 = vshll.u32 %v4375_v48, %v5418_v41  ;;  %v1287_v12 = vshrl.u32 %v4376_v52, %v1281_v9 }
 0x3ab   :  { %v696_v51 = vshrl.u32 %v678_v16, %v694_v21  ;;  %v699_v61 = vadd.s32 127, %v698_v27  ;;  %v1289_v35 = vshll.u32 %v4376_v52, %v5418_v41  ;;  %v1292_v19 = vshll.u32 %v4378_v59, %v5418_v41 }
 0x3ac   :  { %v603_v26 = vsel %vm520_vm2, %v602_v30, %v601_v58  ;;  %vm624_vm8 = vcmp.lt.s32.totalorder %v5224_v36, 0  ;;  %v1224_v28 = vshrl.u32 %v1223_v13, 30  ;;  %v1290_v55 = vshrl.u32 %v4378_v59, %v1281_v9 }
 0x3ad   :  { %v1293_v32 = vshrl.u32 %v4379_v6, %v1281_v9  ;;  %v697_v62 = vor.u32 %v696_v51, %v695_v42  ;;  %v700_v20 = vshll.u32 %v699_v61, 23  ;;  %v1273_v24 = vand.u32 8388607, %v1266_v7 }
 0x3ae   :  { %v1285_v16 = vor.u32 %v1284_v10, %v1283_v37  ;;  %v606_v46 = vsel %vm5442_vm3, %v5230_v29, %v603_v26  ;;  %v1225_v5 = vshll.u32 %v1224_v28, 30  ;;  %v1288_v21 = vor.u32 %v1287_v12, %v1286_v49 }
 0x3af   :  { %v1295_v58 = vshll.u32 %v4379_v6, %v5418_v41  ;;  %vm5492_vm9 = vcmp.le.f32.partialorder %v622_v47, 0.7853982  ;;  %v701_v42 = vor.u32 4788187, %v700_v20  ;;  %v704_v30 = vcvt.s32.f32 %v697_v62 }
 0x3b0   :  { %vm1164_vm10 = vcmp.lt.s32.totalorder %v5238_v63, 0  ;;  %v1294_v37 = vor.u32 %v1293_v32, %v1292_v19  ;;  %v1296_v10 = vshrl.u32 %v4380_v17, %v1281_v9  ;;  %v5498_v13 = vsub.s32 %v1222_v54, %v1225_v5 }
 0x3b1   :  { %v1282_v49 = vshrl.u32 %v4377_v56, %v1281_v9  ;;  %v1291_v12 = vor.u32 %v1290_v55, %v1289_v35  ;;  %vm1298_vm11 = vcmp.lt.s32.totalorder %v5453_v60, 1  ;;  %4074 = vcosq.f32 %v606_v46 }
 0x3b2   :  { %v702_v41 = vand.u32 2147483647, %v701_v42  ;;  %v1274_v47 = vor.u32 8388608, %v1273_v24  ;;  %vm1300_vm12 = vcmp.lt.s32.totalorder %v5453_v60, 3  ;;  %v1228_v51 = vsub.s32 0, %v5498_v13 }
 0x3b3   :  { %v1297_v61 = vor.u32 %v1296_v10, %v1295_v58  ;;  %vm1299_vm14 = vcmp.lt.s32.totalorder %v5453_v60, 2  ;;  %vm1301_vm0 = vcmp.lt.s32.totalorder %v5453_v60, 4  ;;  %vm5508_vm1 = vcmp.le.f32.partialorder %v1162_v25, 0.7853982 }
 0x3b4   :  { %v705_v19 = vmul.f32 %v704_v30, %v702_v41  ;;  %v1303_v54 = vsel %vm1301_vm0, %v1291_v12, 2102212464  ;;  %v1306_v35 = vsel %vm1298_vm11, %v1285_v16, %v1288_v21  ;;  %v1307_v26 = vsel %vm1301_vm0, %v1294_v37, 920167782 }
 0x3b5   :  { %4076 = vsinq.f32 %v606_v46  ;;  %v3683_v55 = vmin.u32 %v1228_v51, %v5498_v13  ;;  %v1248_v32 = vsub.s32 4, %v1224_v28  ;;  %v1308_v62 = vsel %vm1300_vm12, %v1291_v12, %v1307_v26 }
 0x3b6   :  { %vm1919_vm2 = vcmp.gt.s32.totalorder %v5457_v44, 0  ;;  %v611_v25 = vadd.s32 3, %v607_v50  ;;  %v706_v20 = vxor.u32 2147483648, %v705_v19  ;;  %v1302_v24 = vsel %vm1298_vm11, %v1282_v49, %v1285_v16 }
 0x3b7   :  { %v1230_v5 = vclz %v3683_v55  ;;  %v1304_v46 = vsel %vm1300_vm12, %v1288_v21, %v1303_v54  ;;  %v1309_v58 = vsel %vm1299_vm14, %v1306_v35, %v1308_v62  ;;  %v1310_v42 = vsel %vm1298_vm11, %v1288_v21, %v1291_v12 }
 0x3b8   :  { %v707_v8 = vsel %vm624_vm8, %v706_v20, %v705_v19  ;;  %v709_v53 = vsel %vm624_vm8, %v708_v38, %v5395_v22  ;;  %v1311_v50 = vsel %vm1301_vm0, %v1297_v61, 1326507024  ;;  %v1314_v16 = vshll.u32 %v1274_v47, 8 }
 0x3b9   :  { %v1218_v30 = vadd.s32 %v5430_v18, %v5425_v43  ;;  %v3684_v10 = vadd.s32 4294967294, %v1230_v5  ;;  %v1249_v21 = vsel %vm1164_vm10, %v1248_v32, %v1224_v28  ;;  %v1312_v49 = vsel %vm1300_vm12, %v1294_v37, %v1311_v50 }
 0x3ba   :  { %v1305_v12 = vsel %vm1299_vm14, %v1302_v24, %v1304_v46  ;;  %v1313_v22 = vsel %vm1299_vm14, %v1310_v42, %v1312_v49  ;;  %v5553_v38 = vmul.u32.u64.low %v1314_v16, %v1309_v58  ;;  %v5554_v41 = vmul.u32.u64.high %v1314_v16, %v1309_v58, %v5553_v38 }
 0x3bb   :  { %v710_v43 = vsel %vm5492_vm9, %v5224_v36, %v707_v8  ;;  %vm3685_vm3 = vcmp.lt.s32.totalorder %v3684_v10, 0  ;;  %v5560_v18 = vmul.u32.u64.low %v1314_v16, %v1313_v22  ;;  %v5561_v28 = vmul.u32.u64.high %v1314_v16, %v1313_v22, %v5560_v18 }
 0x3bc   :  { %v1920_v37 = vsel %vm1919_vm2, %v5457_v44, 0  ;;  %v1818_v47 = vand.u32 31, %v5438_v11  ;;  %v711_v60 = vsel %vm5492_vm9, 0, %v709_v53  ;;  %v1233_v51 = vsel %vm3685_vm3, 0, %v3684_v10 }
 0x3bd   :  { %v1234_v61 = vsub.s32 32, %v1233_v51  ;;  %v1235_v19 = vshll.u32 %v5498_v13, %v1233_v51  ;;  %v1238_v54 = vsub.s32 4294967266, %v1233_v51  ;;  %v1251_v35 = vsel %vm5508_vm1, 0, %v1249_v21 }
 0x3be   :  { %v5572_v26 = vand.u32 3, %v611_v25  ;;  %4078 = vcosq.f32 %v710_v43  ;;  %v1321_v55 = vmul.u32 %v1314_v16, %v1305_v12  ;;  %v1324_v32 = vadd.s32 1, %v5554_v41  ;;  %v4075_v44 = vpop.eup %4074 }
 0x3bf   :  { %4080 = vsinq.f32 %v710_v43  ;;  %v715_v62 = vadd.s32 3, %v711_v60  ;;  %v1236_v20 = vshrl.u32 %v1218_v30, %v1234_v61  ;;  %v1239_v27 = vadd.s32 127, %v1238_v54 }
 0x3c0   :  { %v5576_v24 = vshrl.u32 %v5438_v11, 5  ;;  %v1255_v5 = vadd.s32 3, %v1251_v35  ;;  %vm1323_vm6 = vc.u32 %v5561_v28, %v5553_v38  ;;  %v1804_v13 = vand.u32 2147483647, %v5242_v2 }
 0x3c1   :  { %v1819_v25 = vsub.s32 32, %v1818_v47  ;;  %v1237_v46 = vor.u32 %v1236_v20, %v1235_v19  ;;  %v1240_v58 = vshll.u32 %v1239_v27, 23  ;;  %v1325_v42 = vsel %vm1323_vm6, %v1324_v32, %v5554_v41 }
 0x3c2   :  { %v4077_v8 = vpop.eup %4076  ;;  %v5582_v53 = vshrl.u32 %v1920_v37, 5  ;;  %v5584_v50 = vand.u32 31, %v1920_v37  ;;  %vm614_vm7 = vcmp.eq.s32.totalorder %v5572_v26, 0  ;;  %v1326_v11 = vadd.s32 %v1325_v42, %v1321_v55 }
 0x3c3   :  { %vm617_vm8 = vcmp.eq.s32.totalorder %v5572_v26, 2  ;;  %v5588_v16 = vand.u32 3, %v715_v62  ;;  %v1241_v30 = vor.u32 4788187, %v1240_v58  ;;  %v1244_v10 = vcvt.s32.f32 %v1237_v46 }
 0x3c4   :  { %v618_v21 = vxor.u32 2147483648, %v4075_v44  ;;  %v5590_v49 = vand.u32 3, %v1255_v5  ;;  %v1327_v12 = vadd.s32 536870912, %v1326_v11  ;;  %v5594_v22 = vand.u32 8388607, %v1804_v13 }
 0x3c5   :  { %v615_v41 = vxor.u32 2147483648, %v4077_v8  ;;  %v1242_v43 = vand.u32 2147483647, %v1241_v30  ;;  %v1821_v18 = vshll.u32 %v4377_v56, %v1818_v47  ;;  %v1822_v37 = vshrl.u32 %v4375_v48, %v1819_v25 }
 0x3c6   :  { %vm613_vm9 = vcmp.lt.s32.totalorder %v5572_v26, 2  ;;  %v5599_v60 = vshrl.u32 %v1327_v12, 30  ;;  %v1824_v51 = vshll.u32 %v4375_v48, %v1818_v47  ;;  %v1825_v61 = vshrl.u32 %v4376_v52, %v1819_v25 }
 0x3c7   :  { %v1827_v19 = vshll.u32 %v4376_v52, %v1818_v47  ;;  %v1245_v54 = vmul.f32 %v1244_v10, %v1242_v43  ;;  %v1828_v35 = vshrl.u32 %v4378_v59, %v1819_v25  ;;  %v1830_v55 = vshll.u32 %v4378_v59, %v1818_v47 }
 0x3c8   :  { %v1831_v32 = vshrl.u32 %v4379_v6, %v1819_v25  ;;  %vm721_vm11 = vcmp.eq.s32.totalorder %v5588_v16, 2  ;;  %v1329_v62 = vshll.u32 %v5599_v60, 30  ;;  %v1812_v20 = vor.u32 8388608, %v5594_v22 }
 0x3c9   :  { %v1833_v27 = vshll.u32 %v4379_v6, %v1818_v47  ;;  %v1834_v5 = vshrl.u32 %v4380_v17, %v1819_v25  ;;  %v619_v46 = vsel %vm617_vm8, %v618_v21, %v4077_v8  ;;  %vm718_vm12 = vcmp.eq.s32.totalorder %v5588_v16, 0 }
 0x3ca   :  { %v1246_v58 = vxor.u32 2147483648, %v1245_v54  ;;  %v5617_v42 = vadd.s32 %v5553_v38, %v5561_v28  ;;  %v1820_v30 = vshrl.u32 %v4377_v56, %v1819_v25  ;;  %v616_v10 = vsel %vm614_vm7, %v4075_v44, %v615_v41 }
 0x3cb   :  { %v5622_v12 = vsub.s32 %v1326_v11, %v1329_v62  ;;  %v1823_v47 = vor.u32 %v1822_v37, %v1821_v18  ;;  %v1826_v22 = vor.u32 %v1825_v61, %v1824_v51  ;;  %v4079_v43 = vpop.eup %4078  ;;  %vm610_vm14 = vweird.f32 %v5230_v29 }
 0x3cc   :  { %v1247_v8 = vsel %vm1164_vm10, %v1246_v58, %v1245_v54  ;;  %v1829_v21 = vor.u32 %v1828_v35, %v1827_v19  ;;  %v1832_v45 = vor.u32 %v1831_v32, %v1830_v55  ;;  %vm1836_vm0 = vcmp.lt.s32.totalorder %v5576_v24, 1  ;;  %v4081_v38 = vpop.eup %4080 }
 0x3cd   :  { %vm717_vm2 = vcmp.lt.s32.totalorder %v5588_v16, 2  ;;  %v1250_v44 = vsel %vm5508_vm1, %v5238_v63, %v1247_v8  ;;  %v1332_v11 = vsub.s32 0, %v5622_v12  ;;  %v1835_v41 = vor.u32 %v1834_v5, %v1833_v27 }
 0x3ce   :  { %vm1837_vm3 = vcmp.lt.s32.totalorder %v5576_v24, 2  ;;  %4082 = vcosq.f32 %v1250_v44  ;;  %vm1838_vm10 = vcmp.lt.s32.totalorder %v5576_v24, 3  ;;  %vm1839_vm6 = vcmp.lt.s32.totalorder %v5576_v24, 4 }
 0x3cf   :  { %v2231_v28 = vpop.permute.xlu0 %2230  ;;  %v722_v37 = vxor.u32 2147483648, %v4079_v43  ;;  %4084 = vsinq.f32 %v1250_v44  ;;  %vm1268_vm7 = vcmp.lt.s32.totalorder %v5253_v15, 0  ;;  %v3687_v9 = vmin.u32 %v1332_v11, %v5622_v12 }
 0x3d0   :  { %v1841_v51 = vsel %vm1839_vm6, %v1829_v21, 2102212464  ;;  %v5642_v61 = vadd.f32 %v2231_v28, %v5359_v33  ;;  %vm714_vm1 = vweird.f32 %v5224_v36  ;;  %v1844_v19 = vsel %vm1836_vm0, %v1823_v47, %v1826_v22 }
 0x3d1   :  { %v2229_v25 = vpop.permute.xlu1 %2228  ;;  %v1334_v54 = vclz %v3687_v9  ;;  %v1845_v35 = vsel %vm1839_vm6, %v1832_v45, 920167782  ;;  %v1848_v55 = vsel %vm1836_vm0, %v1826_v22, %v1829_v21  ;;  %v1849_v32 = vsel %vm1839_vm6, %v1835_v41, 1326507024 }
 0x3d2   :  { %v5635_v18 = vadd.f32 %v2229_v25, %v5362_v57  ;;  %v719_v57 = vxor.u32 2147483648, %v4081_v38  ;;  %v620_v62 = vsel %vm613_vm9, %v616_v10, %v619_v46  ;;  %v1840_v33 = vsel %vm1836_vm0, %v1820_v30, %v1823_v47 }
 0x3d3   :  { %v1842_v27 = vsel %vm1838_vm10, %v1826_v22, %v1841_v51  ;;  %v1846_v5 = vsel %vm1838_vm10, %v1829_v21, %v1845_v35  ;;  %v3688_v58 = vadd.s32 4294967294, %v1334_v54  ;;  %v1850_v28 = vsel %vm1838_vm10, %v1832_v45, %v1849_v32 }
 0x3d4   :  { %4086 = vtanh.f32 %v5635_v18  ;;  %v1847_v8 = vsel %vm1837_vm3, %v1844_v19, %v1846_v5  ;;  %v1852_v25 = vshll.u32 %v1812_v20, 8  ;;  %v723_v26 = vsel %vm721_vm11, %v722_v37, %v4081_v38 }
 0x3d5   :  { %4088 = vtanh.f32 %v5642_v61  ;;  %v1352_v46 = vsub.s32 4, %v5599_v60  ;;  %v1851_v30 = vsel %vm1837_vm3, %v1848_v55, %v1850_v28  ;;  %v720_v10 = vsel %vm718_vm12, %v4079_v43, %v719_v57 }
 0x3d6   :  { %vm3689_vm8 = vcmp.lt.s32.totalorder %v3688_v58, 0  ;;  %v5670_v47 = vmul.u32.u64.low %v1852_v25, %v1851_v30  ;;  %v5671_v22 = vmul.u32.u64.high %v1852_v25, %v1851_v30, %v5670_v47  ;;  %v1843_v45 = vsel %vm1837_vm3, %v1840_v33, %v1842_v27 }
 0x3d7   :  { %v1337_v21 = vsel %vm3689_vm8, 0, %v3688_v58  ;;  %v5675_v20 = vmul.u32.u64.low %v1852_v25, %v1847_v8  ;;  %v5676_v44 = vmul.u32.u64.high %v1852_v25, %v1847_v8, %v5675_v20  ;;  %v621_v38 = vsel %vm610_vm14, nan, %v620_v62 }
 0x3d8   :  { %v1338_v11 = vsub.s32 32, %v1337_v21  ;;  %v1339_v41 = vshll.u32 %v5622_v12, %v1337_v21  ;;  %v1342_v37 = vsub.s32 4294967266, %v1337_v21  ;;  %v1923_v43 = vsub.s32 32, %v5584_v50 }
 0x3d9   :  { %v724_v9 = vsel %vm717_vm2, %v720_v10, %v723_v26  ;;  %vm5687_vm9 = vcmp.le.f32.partialorder %v1266_v7, 0.7853982  ;;  %v5694_v51 = vsel %vm1268_vm7, %v1352_v46, %v5599_v60  ;;  %vm1257_vm11 = vcmp.lt.s32.totalorder %v5590_v49, 2 }
 0x3da   :  { %vm1258_vm12 = vcmp.eq.s32.totalorder %v5590_v49, 0  ;;  %v1340_v12 = vshrl.u32 %v5617_v42, %v1338_v11  ;;  %v1343_v57 = vadd.s32 127, %v1342_v37  ;;  %v1859_v16 = vmul.u32 %v1852_v25, %v1843_v45 }
 0x3db   :  { %v726_v7 = vsel %vm182_vm15, %v621_v38, %v5230_v29  ;;  %vm1261_vm14 = vcmp.eq.s32.totalorder %v5590_v49, 2  ;;  %vm1861_vm0 = vc.u32 %v5671_v22, %v5675_v20  ;;  %v1862_v60 = vadd.s32 1, %v5676_v44  ;;  %v4083_v19 = vpop.eup %4082 }
 0x3dc   :  { %v5708_v54 = vsel %vm714_vm1, nan, %v724_v9  ;;  %v1341_v35 = vor.u32 %v1340_v12, %v1339_v41  ;;  %v1344_v42 = vshll.u32 %v1343_v57, 23  ;;  %v1355_v55 = vsel %vm5687_vm9, 0, %v5694_v51  ;;  %v4085_v32 = vpop.eup %4084 }
 0x3dd   :  { %v1262_v29 = vxor.u32 2147483648, %v4083_v19  ;;  %v1863_v62 = vsel %vm1861_vm0, %v1862_v60, %v5676_v44  ;;  %v1908_v33 = vand.u32 2147483647, %v5353_v0  ;;  %v1925_v27 = vshll.u32 %v4377_v56, %v5584_v50 }
 0x3de   :  { %v1259_v58 = vxor.u32 2147483648, %v4085_v32  ;;  %v1345_v8 = vor.u32 4788187, %v1344_v42  ;;  %v1348_v28 = vcvt.s32.f32 %v1341_v35  ;;  %v1864_v25 = vadd.s32 %v1863_v62, %v1859_v16 }
 0x3df   :  { %v1926_v26 = vshrl.u32 %v4375_v48, %v1923_v43  ;;  %v1928_v46 = vshll.u32 %v4375_v48, %v5584_v50  ;;  %v1929_v30 = vshrl.u32 %v4376_v52, %v1923_v43  ;;  %v1931_v10 = vshll.u32 %v4376_v52, %v5584_v50 }
 0x3e0   :  { %vm1254_vm2 = vweird.f32 %v5238_v63  ;;  %v1346_v47 = vand.u32 2147483647, %v1345_v8  ;;  %v1865_v21 = vadd.s32 536870912, %v1864_v25  ;;  %v1932_v45 = vshrl.u32 %v4378_v59, %v1923_v43 }
 0x3e1   :  { %v4087_v5 = vpop.eup %4086  ;;  %v1934_v44 = vshll.u32 %v4378_v59, %v5584_v50  ;;  %v1263_v38 = vsel %vm1261_vm14, %v1262_v29, %v4085_v32  ;;  %v1915_v48 = vand.u32 8388607, %v1908_v33  ;;  %v1935_v11 = vshrl.u32 %v4379_v6, %v1923_v43 }
 0x3e2   :  { %2240 = vrot.lane.b32.xlu1 %v4087_v5, %s4392_s23  ;;  %v1937_v52 = vshll.u32 %v4379_v6, %v5584_v50  ;;  %v4089_v41 = vpop.eup %4088  ;;  %v1260_v37 = vsel %vm1258_vm12, %v4083_v19, %v1259_v58  ;;  %v1349_v9 = vmul.f32 %v1348_v28, %v1346_v47  ;;  %v5737_v12 = vshrl.u32 %v1865_v21, 30 }
 0x3e3   :  { %v1938_v59 = vshrl.u32 %v4380_v17, %v1923_v43  ;;  %v1924_v57 = vshrl.u32 %v4377_v56, %v1923_v43  ;;  %v1927_v16 = vor.u32 %v1926_v26, %v1925_v27  ;;  %v1930_v60 = vor.u32 %v1929_v30, %v1928_v46 }
 0x3e4   :  { %v1936_v35 = vor.u32 %v1935_v11, %v1934_v44  ;;  %v1350_v42 = vxor.u32 2147483648, %v1349_v9  ;;  %v1867_v32 = vshll.u32 %v5737_v12, 30  ;;  %v1933_v6 = vor.u32 %v1932_v45, %v1931_v10 }
 0x3e5   :  { %vm1940_vm3 = vcmp.lt.s32.totalorder %v5582_v53, 1  ;;  %v1264_v50 = vsel %vm1257_vm11, %v1260_v37, %v1263_v38  ;;  %v1916_v19 = vor.u32 8388608, %v1915_v48  ;;  %v1939_v29 = vor.u32 %v1938_v59, %v1937_v52 }
 0x3e6   :  { %2242 = vrot.lane.b32.xlu1 %v4089_v41, %s4392_s23  ;;  %vm1943_vm10 = vcmp.lt.s32.totalorder %v5582_v53, 4  ;;  %v1351_v17 = vsel %vm1268_vm7, %v1350_v42, %v1349_v9  ;;  %v1868_v56 = vsub.s32 %v1864_v25, %v1867_v32  ;;  %vm1942_vm6 = vcmp.lt.s32.totalorder %v5582_v53, 3 }
 0x3e7   :  { %v1945_v43 = vsel %vm1943_vm10, %v1933_v6, 2102212464  ;;  %v1354_v49 = vsel %vm5687_vm9, %v5253_v15, %v1351_v17  ;;  %vm1941_vm1 = vcmp.lt.s32.totalorder %v5582_v53, 2  ;;  %v1948_v62 = vsel %vm1940_vm3, %v1927_v16, %v1930_v60 }
 0x3e8   :  { %v1949_v27 = vsel %vm1943_vm10, %v1936_v35, 920167782  ;;  %4090 = vcosq.f32 %v1354_v49  ;;  %v1870_v5 = vsub.s32 0, %v1868_v56  ;;  %v1944_v58 = vsel %vm1940_vm3, %v1924_v57, %v1927_v16 }
 0x3e9   :  { %4092 = vsinq.f32 %v1354_v49  ;;  %v1950_v8 = vsel %vm1942_vm6, %v1933_v6, %v1949_v27  ;;  %v1952_v28 = vsel %vm1940_vm3, %v1930_v60, %v1933_v6  ;;  %v1953_v25 = vsel %vm1943_vm10, %v1939_v29, 1326507024 }
 0x3ea   :  { %738 = vrot.lane.b32.xlu1 %v726_v7, %s4381_s12  ;;  %v1946_v7 = vsel %vm1942_vm6, %v1930_v60, %v1945_v43  ;;  %v727_v26 = vsel %vm182_vm15, %v5708_v54, %v5224_v36  ;;  %v3705_v46 = vmin.u32 %v1870_v5, %v1868_v56  ;;  %v1951_v30 = vsel %vm1941_vm1, %v1948_v62, %v1950_v8 }
 0x3eb   :  { %v1954_v10 = vsel %vm1942_vm6, %v1936_v35, %v1953_v25  ;;  %v1265_v47 = vsel %vm1254_vm2, nan, %v1264_v50  ;;  %v1956_v45 = vshll.u32 %v1916_v19, 8  ;;  %v1359_v36 = vadd.s32 3, %v1355_v55 }
 0x3ec   :  { %v1955_v21 = vsel %vm1941_vm1, %v1952_v28, %v1954_v10  ;;  %v1872_v54 = vclz %v3705_v46  ;;  %v1947_v44 = vsel %vm1941_vm1, %v1944_v58, %v1946_v7  ;;  %v1370_v41 = vsel %vm182_vm15, %v1265_v47, %v5238_v63 }
 0x3ed   :  { %v5790_v38 = vmul.u32.u64.low %v1956_v45, %v1955_v21  ;;  %v5791_v48 = vmul.u32.u64.high %v1956_v45, %v1955_v21, %v5790_v38  ;;  %v5793_v11 = vmul.u32.u64.low %v1956_v45, %v1951_v30  ;;  %v5794_v52 = vmul.u32.u64.high %v1956_v45, %v1951_v30, %v5793_v11 }
 0x3ee   :  { %740 = vrot.lane.b32.xlu1 %v727_v26, %s4381_s12  ;;  %v3706_v37 = vadd.s32 4294967294, %v1872_v54  ;;  %v1860_v24 = vadd.s32 %v5675_v20, %v5671_v22  ;;  %v1963_v51 = vmul.u32 %v1956_v45, %v1947_v44  ;;  %v1360_v53 = vand.u32 3, %v1359_v36 }
 0x3ef   :  { %vm1965_vm8 = vc.u32 %v5791_v48, %v5793_v11  ;;  %v1966_v9 = vadd.s32 1, %v5794_v52  ;;  %vm1358_vm12 = vweird.f32 %v5253_v15  ;;  %vm1806_vm0 = vcmp.lt.s32.totalorder %v5242_v2, 0 }
 0x3f0   :  { %vm3707_vm7 = vcmp.lt.s32.totalorder %v3706_v37, 0  ;;  %vm1362_vm9 = vcmp.eq.s32.totalorder %v1360_v53, 0  ;;  %vm1365_vm11 = vcmp.eq.s32.totalorder %v1360_v53, 2  ;;  %vm1361_vm14 = vcmp.lt.s32.totalorder %v1360_v53, 2 }
 0x3f1   :  { %v1875_v55 = vsel %vm3707_vm7, 0, %v3706_v37  ;;  %v1967_v60 = vsel %vm1965_vm8, %v1966_v9, %v5794_v52  ;;  %v1890_v26 = vsub.s32 4, %v5737_v12  ;;  %vm1805_vm2 = vcmp.le.f32.partialorder %v1804_v13, 0.7853982 }
 0x3f2   :  { %1380 = vrot.lane.b32.xlu1 %v1370_v41, %s4381_s12  ;;  %v1876_v59 = vsub.s32 32, %v1875_v55  ;;  %v1877_v57 = vshll.u32 %v1868_v56, %v1875_v55  ;;  %v1880_v16 = vsub.s32 4294967266, %v1875_v55  ;;  %v1968_v42 = vadd.s32 %v1967_v60, %v1963_v51 }
 0x3f3   :  { %v1891_v21 = vsel %vm1806_vm0, %v1890_v26, %v5737_v12  ;;  %v1964_v44 = vadd.s32 %v5793_v11, %v5791_v48  ;;  %vm1896_vm7 = vweird.f32 %v5242_v2  ;;  %vm1910_vm8 = vcmp.lt.s32.totalorder %v5353_v0, 0  ;;  %v5835_v26 = vpop.permute.xlu0 %2256 }
 0x3f4   :  { %v1878_v63 = vshrl.u32 %v1860_v24, %v1876_v59  ;;  %v1881_v35 = vadd.s32 127, %v1880_v16  ;;  %v1969_v19 = vadd.s32 536870912, %v1968_v42  ;;  %v1893_v36 = vsel %vm1805_vm2, 0, %v1891_v21 }
 0x3f5   :  { %v4091_v32 = vpop.eup %4090  ;;  %v1897_v38 = vadd.s32 3, %v1893_v36 }
 0x3f6   :  { %v4093_v22 = vpop.eup %4092  ;;  %v1366_v20 = vxor.u32 2147483648, %v4091_v32  ;;  %v1879_v6 = vor.u32 %v1878_v63, %v1877_v57  ;;  %v1882_v50 = vshll.u32 %v1881_v35, 23  ;;  %v1970_v49 = vshrl.u32 %v1969_v19, 30 }
 0x3f7   :  { %v1363_v29 = vxor.u32 2147483648, %v4093_v22  ;;  %v1898_v53 = vand.u32 3, %v1897_v38 }
 0x3f8   :  { %v1367_v17 = vsel %vm1365_vm11, %v1366_v20, %v4093_v22  ;;  %v1883_v56 = vor.u32 4788187, %v1882_v50  ;;  %v1886_v43 = vcvt.s32.f32 %v1879_v6  ;;  %v1971_v58 = vshll.u32 %v1970_v49, 30 }
 0x3f9   :  { %v1364_v62 = vsel %vm1362_vm9, %v4091_v32, %v1363_v29  ;;  %vm1903_vm10 = vcmp.eq.s32.totalorder %v1898_v53, 2  ;;  %vm1900_vm6 = vcmp.eq.s32.totalorder %v1898_v53, 0  ;;  %vm1899_vm1 = vcmp.lt.s32.totalorder %v1898_v53, 2 }
 0x3fa   :  { %v1368_v27 = vsel %vm1361_vm14, %v1364_v62, %v1367_v17  ;;  %v1884_v5 = vand.u32 2147483647, %v1883_v56  ;;  %v1972_v25 = vsub.s32 %v1968_v42, %v1971_v58  ;;  %v1994_v32 = vsub.s32 4, %v1970_v49 }
 0x3fb   :  { %v1369_v7 = vsel %vm1358_vm12, nan, %v1368_v27  ;;  %vm1909_vm9 = vcmp.le.f32.partialorder %v1908_v33, 0.7853982 }
 0x3fc   :  { %v1371_v8 = vsel %vm182_vm15, %v1369_v7, %v5253_v15  ;;  %v1887_v28 = vmul.f32 %v1886_v43, %v1884_v5  ;;  %v1974_v30 = vsub.s32 0, %v1972_v25  ;;  %v1995_v29 = vsel %vm1910_vm8, %v1994_v32, %v1970_v49 }
 0x3fd   :  { %1382 = vrot.lane.b32.xlu1 %v1371_v8, %s4381_s12  ;;  %v1997_v56 = vsel %vm1909_vm9, 0, %v1995_v29 }
 0x3fe   :  { %v1888_v46 = vxor.u32 2147483648, %v1887_v28  ;;  %v3709_v47 = vmin.u32 %v1974_v30, %v1972_v25  ;;  %v2001_v43 = vadd.s32 3, %v1997_v56 }
 0x400   :  { %v1889_v10 = vsel %vm1806_vm0, %v1888_v46, %v1887_v28  ;;  %v1976_v15 = vclz %v3709_v47  ;;  %v2002_v62 = vand.u32 3, %v2001_v43  ;;  %vm2000_vm0 = vweird.f32 %v5353_v0 }
 0x401   :  { %v1892_v45 = vsel %vm1805_vm2, %v5242_v2, %v1889_v10  ;;  %vm151_vm2 = vcmask 130048   ;;  %v731_v10 = vpop.permute.xlu0 %730 }
 0x402   :  { %4094 = vcosq.f32 %v1892_v45  ;;  %v3710_v54 = vadd.s32 4294967294, %v1976_v15  ;;  %vm2007_vm11 = vcmp.eq.s32.totalorder %v2002_v62, 2  ;;  %vm2004_vm12 = vcmp.eq.s32.totalorder %v2002_v62, 0  ;;  %152 = vst.msk [vmem:[#allocation2] sm:$0xff] %vm151_vm2, %v4383_v39 }
 0x403   :  { %4096 = vsinq.f32 %v1892_v45  ;;  %vm2003_vm14 = vcmp.lt.s32.totalorder %v2002_v62, 2 }
 0x404   :  { %vm3711_vm3 = vcmp.lt.s32.totalorder %v3710_v54, 0 }
 0x405   :  { %v1979_v52 = vsel %vm3711_vm3, 0, %v3710_v54  ;;  %v733_v45 = vpop.permute.xlu0 %732 }
 0x406   :  { %v1980_v41 = vsub.s32 32, %v1979_v52  ;;  %v1981_v13 = vshll.u32 %v1972_v25, %v1979_v52  ;;  %v1984_v37 = vsub.s32 4294967266, %v1979_v52  ;;  %v5833_v25 = vpop.permute.xlu1 %2253  ;;  %v4188_v52 = vld [vmem:[%s6197_s9] sm:$0xff] }
 0x407   :  { %vm2258_vm3 = vcmp.eq.s32.totalorder %v5833_v25, 1 }
 0x408   :  { %v1982_v24 = vshrl.u32 %v1964_v44, %v1980_v41  ;;  %v1985_v51 = vadd.s32 127, %v1984_v37  ;;  %v4187_v44 = vld [vmem:[%s6197_s9 + $0x8] sm:$0xf] }
 0x40a   :  { %v1983_v55 = vor.u32 %v1982_v24, %v1981_v13  ;;  %v1986_v12 = vshll.u32 %v1985_v51, 23  ;;  %v5873_v51 = vld [vmem:[%s6198_s10 + $0x8] sm:$0xff] }
 0x40c   :  { %v1987_v9 = vor.u32 4788187, %v1986_v12  ;;  %v1990_v59 = vcvt.s32.f32 %v1983_v55 }
 0x40e   :  { %v1988_v63 = vand.u32 2147483647, %v1987_v9 }
 0x40f   :  { %v4095_v57 = vpop.eup %4094 }
 0x410   :  { %v4097_v16 = vpop.eup %4096  ;;  %v1904_v60 = vxor.u32 2147483648, %v4095_v57  ;;  %v1991_v35 = vmul.f32 %v1990_v59, %v1988_v63 }
 0x411   :  { %v1901_v48 = vxor.u32 2147483648, %v4097_v16 }
 0x412   :  { %v1905_v11 = vsel %vm1903_vm10, %v1904_v60, %v4097_v16  ;;  %v1992_v20 = vxor.u32 2147483648, %v1991_v35  ;;  %v5884_v16 = vld [vmem:[%s6198_s10] sm:$0xff] }
 0x413   :  { %v1902_v42 = vsel %vm1900_vm6, %v4095_v57, %v1901_v48 }
 0x414   :  { %v1906_v22 = vsel %vm1899_vm1, %v1902_v42, %v1905_v11  ;;  %v1993_v19 = vsel %vm1910_vm8, %v1992_v20, %v1991_v35  ;;  %v5903_v20 = vld [vmem:[#allocation12] ss:$0 sm:$0xff] }
 0x415   :  { %v1907_v6 = vsel %vm1896_vm7, nan, %v1906_v22  ;;  %v1996_v17 = vsel %vm1909_vm9, %v5353_v0, %v1993_v19 }
 0x416   :  { %v2012_v50 = vsel %vm182_vm15, %v1907_v6, %v5242_v2  ;;  %4098 = vcosq.f32 %v1996_v17 }
 0x417   :  { %2022 = vrot.lane.b32.xlu1 %v2012_v50, %s4381_s12  ;;  %4100 = vsinq.f32 %v1996_v17 }
 0x423   :  { %v4099_v27 = vpop.eup %4098 }
 0x424   :  { %v4101_v33 = vpop.eup %4100  ;;  %v2008_v5 = vxor.u32 2147483648, %v4099_v27 }
 0x425   :  { %v2005_v58 = vxor.u32 2147483648, %v4101_v33 }
 0x426   :  { %v2009_v2 = vsel %vm2007_vm11, %v2008_v5, %v4101_v33 }
 0x427   :  { %v2006_v7 = vsel %vm2004_vm12, %v4099_v27, %v2005_v58 }
 0x428   :  { %v2010_v8 = vsel %vm2003_vm14, %v2006_v7, %v2009_v2 }
 0x429   :  { %v2011_v49 = vsel %vm2000_vm0, nan, %v2010_v8 }
 0x42a   :  { %v2013_v28 = vsel %vm182_vm15, %v2011_v49, %v5353_v0  ;;  %vm2259_vm15 = vcmp.eq.s32.totalorder %v5835_v26, 1 }
 0x42b   :  { %2024 = vrot.lane.b32.xlu1 %v2013_v28, %s4381_s12 }
 0x454   :  { %v2241_v46 = vpop.permute.xlu1 %2240 }
 0x455   :  { %v2246_v30 = vmul.f32 %v5210_v3, %v2241_v46  ;;  %v5912_v46 = vld [vmem:[%s6232_s29 + $0x8] sm:$0xff] }
 0x456   :  { %vm2555_vm6 = vcmp.gt.s32.totalorder %v5912_v46, 2  ;;  %vm2708_vm9 = vcmp.gt.s32.totalorder %v5912_v46, 3  ;;  %vm2861_vm0 = vcmp.gt.s32.totalorder %v5912_v46, 4 }
 0x457   :  { %v5841_v14 = vsel %vm2258_vm3, %v2246_v30, 0.0 }
 0x458   :  { %2268 = vrot.lane.b32.xlu0 %v5841_v14, %s4393_s8  ;;  %v2243_v0 = vpop.permute.xlu1 %2242 }
 0x459   :  { %v2247_v47 = vmul.f32 %v5204_v40, %v2243_v0  ;;  %v1373_v40 = vpop.permute.xlu0 %1372 }
 0x45b   :  { %v5849_v21 = vsel %vm2259_vm15, %v2247_v47, 0.0 }
 0x45c   :  { %2270 = vrot.lane.b32.xlu1 %v5849_v21, %s4393_s8  ;;  %v739_v3 = vpop.permute.xlu1 %738 }
 0x45d   :  { %v744_v15 = vsel %vm415_vm4, %v731_v10, %v739_v3  ;;  %v1375_v13 = vpop.permute.xlu0 %1374  ;;  %v5920_v3 = vld [vmem:[%s6232_s29] sm:$0xff] }
 0x45e   :  { %3831 = vmatprep.mubr.msk.f32.mxu1 %vm418_vm5, %v744_v15  ;;  %v5928_v15 = vsel %vm2259_vm15, %v5642_v61, 0.0  ;;  %vm2554_vm1 = vcmp.gt.s32.totalorder %v5920_v3, 2  ;;  %vm2707_vm11 = vcmp.gt.s32.totalorder %v5920_v3, 3 }
 0x460   :  { %v741_v36 = vpop.permute.xlu1 %740 }
 0x461   :  { %v745_v54 = vsel %vm415_vm4, %v733_v45, %v741_v36  ;;  %v2015_v53 = vpop.permute.xlu0 %2014 }
 0x462   :  { %3832 = vmatmul.mubr.msk.f32.vlgmr.msra.gmra.mxu1 %vm418_vm5, %v745_v54 }
 0x463   :  { %3842 = vmatpush3.msk.msra.mxu1 %vm425_vm13, %v4187_v44 }
 0x464   :  { %v1381_v38 = vpop.permute.xlu1 %1380  ;;  %3843 = vmatprep.subr.mxu1 %v4188_v52 }
 0x465   :  { %v1386_v41 = vsel %vm415_vm4, %v1373_v40, %v1381_v38  ;;  %3844 = vmatpush3.msra.mxu1 %v4188_v52  ;;  %v2017_v9 = vpop.permute.xlu0 %2016  ;;  %v5934_v40 = vsel %vm2258_vm3, %v5635_v18, 0.0  ;;  %vm2860_vm3 = vcmp.gt.s32.totalorder %v5920_v3, 4 }
 0x466   :  { %3845 = vmatprep.mubr.msk.f32.mxu1 %vm418_vm5, %v1386_v41  ;;  %3855 = vmatprep.subr.msk.mxu1 %vm425_vm13, %v4187_v44 }
 0x46f   :  { %v1383_v37 = vpop.permute.xlu1 %1382 }
 0x470   :  { %v1387_v24 = vsel %vm415_vm4, %v1375_v13, %v1383_v37 }
 0x471   :  { %3846 = vmatmul.mubr.msk.f32.vlgmr.msra.gmra.mxu1 %vm418_vm5, %v1387_v24 }
 0x472   :  { %3856 = vmatpush3.msk.msra.mxu1 %vm425_vm13, %v4187_v44  ;;  %vm2402_vm13 = vcmp.gt.s32.totalorder %v5912_v46, 1 }
 0x473   :  { %3857 = vmatprep.subr.mxu1 %v4188_v52  ;;  %v2404_v47 = vsel %vm2402_vm13, 1, %v4372_v1 }
 0x474   :  { %3858 = vmatpush3.msra.mxu1 %v4188_v52 }
 0x475   :  { %3869 = vmatprep.subr.mxu1 %v5873_v51 }
 0x489   :  { %v2023_v55 = vpop.permute.xlu1 %2022 }
 0x48a   :  { %v2028_v12 = vsel %vm415_vm4, %v2015_v53, %v2023_v55 }
 0x48b   :  { %3859 = vmatprep.mubr.msk.f32.mxu1 %vm418_vm5, %v2028_v12 }
 0x49d   :  { %v2025_v59 = vpop.permute.xlu1 %2024 }
 0x49e   :  { %v2029_v57 = vsel %vm415_vm4, %v2017_v9, %v2025_v59  ;;  %vm2401_vm4 = vcmp.gt.s32.totalorder %v5920_v3, 1 }
 0x49f   :  { %3860 = vmatmul.mubr.msk.f32.vlgmr.msra.gmra.mxu1 %vm418_vm5, %v2029_v57  ;;  %v2403_v45 = vsel %vm2401_vm4, 1, %v4372_v1  ;;  %v1140_v57 = vadd.f32 %v5903_v20, %v5185_v34  ;;  %vm3014_vm4 = vcmp.gt.s32.totalorder %v5912_v46, 5 }
 0x4a0   :  { %3870 = vmatpush3.msra.mxu1 %v5873_v51 }
 0x4a1   :  { %3871 = vmatprep.subr.mxu1 %v5884_v16 }
 0x4a2   :  { %3872 = vmatpush3.msra.mxu1 %v5884_v16 }
 0x4a3   :  { %3883 = vmatprep.subr.mxu1 %v5873_v51 }
 0x4ca   :  { %v2269_v60 = vpop.permute.xlu0 %2268 }
 0x4cb   :  { %3873 = vmatprep.mubr.msk.f32.mxu1 %vm151_vm2, %v2269_v60 }
 0x4ce   :  { %v2271_v63 = vpop.permute.xlu1 %2270 }
 0x4cf   :  { %3874 = vmatmul.mubr.msk.f32.vlgmr.msra.gmra.mxu1 %vm151_vm2, %v2271_v63 }
 0x4d0   :  { %3884 = vmatpush3.msra.mxu1 %v5873_v51 }
 0x4d1   :  { %3885 = vmatprep.subr.mxu1 %v5884_v16 }
 0x4d2   :  { %3886 = vmatpush3.msra.mxu1 %v5884_v16 }
 0x4d3   :  { %3897 = vmatprep.subr.mxu1 %v5873_v51 }
 0x522   :  { %v3833_v48 = vpop.f32.mrf.mxu1 }
 0x523   :  { %v824_v6 = vadd.f32 %v5903_v20, %v3833_v48 }
 0x524   :  { %v818_v11 = vpop.f32.mrf.mxu1 }
 0x525   :  { %v819_v19 = vadd.f32 %v5903_v20, %v818_v11 }
 0x531   :  { %v5895_v35 = vpop.f32.mrf.mxu1 }
 0x533   :  { %v5897_v42 = vpop.f32.mrf.mxu1 }
 0x55f   :  { %v5899_v32 = vpop.f32.mrf.mxu1 }
 0x561   :  { %v5901_v22 = vpop.f32.mrf.mxu1 }
 0x58f   :  { %v3875_v50 = vpop.f32.mrf.mxu1 }
 0x590   :  { %v2352_v29 = vadd.f32 %v3875_v50, %v824_v6 }
 0x591   :  { %v2342_v17 = vpop.f32.mrf.mxu1 }
 0x592   :  { %4102 = vtanh.f32 %v2352_v29  ;;  %v2351_v56 = vadd.f32 %v2342_v17, %v819_v19  ;;  %v3720_v27 = vmul.f32 -1.442695, %v2352_v29 }
 0x594   :  { %4104 = vtanh.f32 %v2351_v56  ;;  %v3719_v33 = vmul.f32 -1.442695, %v2351_v56 }
 0x595   :  { %4106 = vpow2.f32 %v3720_v27 }
 0x596   :  { %4108 = vpow2.f32 %v3719_v33 }
 0x59f   :  { %v4103_v43 = vpop.eup %4102 }
 0x5a0   :  { %2373 = vrot.lane.b32.xlu1 %v4103_v43, %s4385_s15 }
 0x5a1   :  { %v4105_v62 = vpop.eup %4104 }
 0x5a2   :  { %2371 = vrot.lane.b32.xlu0 %v4105_v62, %s4385_s15  ;;  %v4107_v5 = vpop.eup %4106 }
 0x5a3   :  { %v4109_v58 = vpop.eup %4108  ;;  %v2360_v2 = vadd.f32 1.0, %v4107_v5 }
 0x5a4   :  { %v2359_v7 = vadd.f32 1.0, %v4109_v58  ;;  %v2557_v58 = vsel %vm2555_vm6, 1, %v4372_v1 }
 0x5a5   :  { %4110 = vrcp.f32 %v2360_v2  ;;  %v2556_v2 = vsel %vm2554_vm1, 1, %v4372_v1 }
 0x5a6   :  { %4112 = vrcp.f32 %v2359_v7 }
 0x5b2   :  { %v4111_v8 = vpop.eup %4110 }
 0x5b3   :  { %v4113_v30 = vpop.eup %4112  ;;  %v2368_v36 = vmul.f32 %v4111_v8, %v5928_v15 }
 0x5b4   :  { %v2367_v38 = vmul.f32 %v4113_v30, %v5934_v40 }
 0x612   :  { %v2374_v49 = vpop.permute.xlu1 %2373 }
 0x613   :  { %v2378_v28 = vmul.f32 %v4111_v8, %v2374_v49 }
 0x614   :  { %v2372_v10 = vpop.permute.xlu0 %2371 }
 0x615   :  { %2383 = vrot.lane.b32.xlu1 %v2378_v28, %s4388_s21  ;;  %v2377_v0 = vmul.f32 %v4113_v30, %v2372_v10 }
 0x617   :  { %2381 = vrot.lane.b32.xlu0 %v2377_v0, %s4388_s21 }
 0x619   :  { %2409 = vperm.xlu1 %4036, %v2404_v47  }
 0x61b   :  { %2406 = vperm.xlu0 %4037, %v2403_v45  }
 0x687   :  { %v2384_v54 = vpop.permute.xlu1 %2383 }
 0x688   :  { %v5936_v44 = vadd.f32 %v2384_v54, %v2368_v36 }
 0x689   :  { %v2382_v52 = vpop.permute.xlu0 %2381 }
 0x68a   :  { %4114 = vtanh.f32 %v5936_v44  ;;  %v5940_v41 = vadd.f32 %v2382_v52, %v2367_v38 }
 0x68c   :  { %4116 = vtanh.f32 %v5940_v41 }
 0x694   :  { %v2410_v25 = vpop.permute.xlu1 %2409 }
 0x695   :  { %vm2412_vm5 = vcmp.eq.s32.totalorder %v2410_v25, 1 }
 0x696   :  { %v2407_v18 = vpop.permute.xlu0 %2406  ;;  %v5977_v7 = vsel %vm2412_vm5, %v5936_v44, %v5928_v15 }
 0x697   :  { %v4115_v61 = vpop.eup %4114  ;;  %vm2411_vm10 = vcmp.eq.s32.totalorder %v2407_v18, 1  ;;  %v1466_v18 = vadd.f32 %v5903_v20, %v5895_v35 }
 0x698   :  { %2395 = vrot.lane.b32.xlu1 %v4115_v61, %s4392_s23  ;;  %v5983_v28 = vsel %vm2411_vm10, %v5940_v41, %v5934_v40 }
 0x699   :  { %v4117_v26 = vpop.eup %4116 }
 0x69a   :  { %2393 = vrot.lane.b32.xlu0 %v4117_v26, %s4392_s23 }
 0x70a   :  { %v2396_v13 = vpop.permute.xlu1 %2395 }
 0x70b   :  { %v2400_v37 = vmul.f32 %v4111_v8, %v2396_v13 }
 0x70c   :  { %v2394_v24 = vpop.permute.xlu0 %2393 }
 0x70d   :  { %v5947_v53 = vsel %vm2412_vm5, %v2400_v37, %v5849_v21  ;;  %v2399_v55 = vmul.f32 %v4113_v30, %v2394_v24  ;;  %v1145_v21 = vadd.f32 %v5903_v20, %v5183_v31  ;;  %v1461_v37 = vadd.f32 %v5903_v20, %v5897_v42 }
 0x70e   :  { %2423 = vrot.lane.b32.xlu1 %v5947_v53, %s4393_s8  ;;  %vm3013_vm5 = vcmp.gt.s32.totalorder %v5920_v3, 5 }
 0x70f   :  { %v5953_v12 = vsel %vm2411_vm10, %v2399_v55, %v5841_v14  ;;  %vm3117_vm10 = vcmask 64512  }
 0x710   :  { %2421 = vrot.lane.b32.xlu0 %v5953_v12, %s4393_s8 }
 0x780   :  { %v2424_v59 = vpop.permute.xlu1 %2423 }
 0x782   :  { %v2422_v9 = vpop.permute.xlu0 %2421 }
 0x783   :  { %3880 = vmatprep.mubr.msk.f32.mxu0 %vm151_vm2, %v2422_v9 }
 0x784   :  { %3881 = vmatmul.mubr.msk.f32.vlgmr.msra.gmra.mxu0 %vm151_vm2, %v2424_v59 }
 0x785   :  { %3891 = vmatpush3.msra.mxu0 %v5873_v51 }
 0x786   :  { %3892 = vmatprep.subr.mxu0 %v5884_v16 }
 0x787   :  { %3893 = vmatpush3.msra.mxu0 %v5884_v16 }
 0x844   :  { %v3882_v14 = vpop.f32.mrf.mxu0 }
 0x845   :  { %v2505_v60 = vadd.f32 %v3882_v14, %v1145_v21 }
 0x846   :  { %v2495_v63 = vpop.f32.mrf.mxu0 }
 0x847   :  { %4118 = vtanh.f32 %v2505_v60  ;;  %v2504_v48 = vadd.f32 %v2495_v63, %v1140_v57  ;;  %v3724_v50 = vmul.f32 -1.442695, %v2505_v60 }
 0x849   :  { %4120 = vtanh.f32 %v2504_v48  ;;  %v3723_v19 = vmul.f32 -1.442695, %v2504_v48 }
 0x84a   :  { %4122 = vpow2.f32 %v3724_v50  ;;  %v2709_v50 = vsel %vm2707_vm11, 1, %v4372_v1 }
 0x84b   :  { %4124 = vpow2.f32 %v3723_v19 }
 0x854   :  { %v4119_v11 = vpop.eup %4118 }
 0x855   :  { %2526 = vrot.lane.b32.xlu1 %v4119_v11, %s4385_s15 }
 0x856   :  { %v4121_v6 = vpop.eup %4120 }
 0x857   :  { %2524 = vrot.lane.b32.xlu0 %v4121_v6, %s4385_s15  ;;  %v4123_v31 = vpop.eup %4122  ;;  %v2710_v6 = vsel %vm2708_vm9, 1, %v4372_v1 }
 0x858   :  { %v4125_v29 = vpop.eup %4124  ;;  %v2513_v17 = vadd.f32 1.0, %v4123_v31 }
 0x859   :  { %v2512_v56 = vadd.f32 1.0, %v4125_v29 }
 0x85a   :  { %4126 = vrcp.f32 %v2513_v17 }
 0x85b   :  { %4128 = vrcp.f32 %v2512_v56 }
 0x867   :  { %v4127_v34 = vpop.eup %4126 }
 0x868   :  { %v4129_v27 = vpop.eup %4128  ;;  %v2521_v8 = vmul.f32 %v4127_v34, %v5977_v7 }
 0x869   :  { %v2520_v10 = vmul.f32 %v4129_v27, %v5983_v28 }
 0x8c7   :  { %v2527_v43 = vpop.permute.xlu1 %2526 }
 0x8c8   :  { %v2531_v62 = vmul.f32 %v4127_v34, %v2527_v43 }
 0x8c9   :  { %v2525_v33 = vpop.permute.xlu0 %2524 }
 0x8ca   :  { %2536 = vrot.lane.b32.xlu1 %v2531_v62, %s4388_s21  ;;  %v2530_v5 = vmul.f32 %v4129_v27, %v2525_v33 }
 0x8cc   :  { %2534 = vrot.lane.b32.xlu0 %v2530_v5, %s4388_s21 }
 0x8ce   :  { %2562 = vperm.xlu1 %4036, %v2557_v58  }
 0x8d0   :  { %2559 = vperm.xlu0 %4037, %v2556_v2  }
 0x93c   :  { %v2537_v49 = vpop.permute.xlu1 %2536 }
 0x93d   :  { %v5985_v30 = vadd.f32 %v2537_v49, %v2521_v8 }
 0x93e   :  { %v2535_v0 = vpop.permute.xlu0 %2534 }
 0x93f   :  { %4130 = vtanh.f32 %v5985_v30  ;;  %v5989_v47 = vadd.f32 %v2535_v0, %v2520_v10 }
 0x941   :  { %4132 = vtanh.f32 %v5989_v47 }
 0x949   :  { %v2563_v36 = vpop.permute.xlu1 %2562 }
 0x94a   :  { %vm2565_vm7 = vcmp.eq.s32.totalorder %v2563_v36, 1 }
 0x94b   :  { %v2560_v54 = vpop.permute.xlu0 %2559  ;;  %v6026_v19 = vsel %vm2565_vm7, %v5985_v30, %v5977_v7 }
 0x94c   :  { %v4131_v45 = vpop.eup %4130  ;;  %vm2564_vm8 = vcmp.eq.s32.totalorder %v2560_v54, 1 }
 0x94d   :  { %2548 = vrot.lane.b32.xlu1 %v4131_v45, %s4392_s23  ;;  %v6032_v17 = vsel %vm2564_vm8, %v5989_v47, %v5983_v28  ;;  %v1787_v47 = vadd.f32 %v5903_v20, %v5187_v4 }
 0x94e   :  { %v4133_v15 = vpop.eup %4132 }
 0x94f   :  { %2546 = vrot.lane.b32.xlu0 %v4133_v15, %s4392_s23  ;;  %v1782_v15 = vadd.f32 %v5903_v20, %v5189_v23 }
 0x9bf   :  { %v2549_v40 = vpop.permute.xlu1 %2548 }
 0x9c0   :  { %v2553_v44 = vmul.f32 %v4127_v34, %v2549_v40 }
 0x9c1   :  { %v2547_v38 = vpop.permute.xlu0 %2546 }
 0x9c2   :  { %v5996_v52 = vsel %vm2565_vm7, %v2553_v44, %v5947_v53  ;;  %v2552_v41 = vmul.f32 %v4129_v27, %v2547_v38  ;;  %vm4394_vm7 = vmmov 0  }
 0x9c3   :  { %2576 = vrot.lane.b32.xlu1 %v5996_v52, %s4393_s8 }
 0x9c4   :  { %v6002_v61 = vsel %vm2564_vm8, %v2552_v41, %v5953_v12 }
 0x9c5   :  { %2574 = vrot.lane.b32.xlu0 %v6002_v61, %s4393_s8 }
 0xa35   :  { %v2577_v25 = vpop.permute.xlu1 %2576 }
 0xa37   :  { %v2575_v26 = vpop.permute.xlu0 %2574 }
 0xa38   :  { %3887 = vmatprep.mubr.msk.f32.mxu1 %vm151_vm2, %v2575_v26 }
 0xa39   :  { %3888 = vmatmul.mubr.msk.f32.vlgmr.msra.gmra.mxu1 %vm151_vm2, %v2577_v25 }
 0xa3a   :  { %3898 = vmatpush3.msra.mxu1 %v5873_v51 }
 0xa3b   :  { %3899 = vmatprep.subr.mxu1 %v5884_v16 }
 0xa3c   :  { %3900 = vmatpush3.msra.mxu1 %v5884_v16 }
 0xaf9   :  { %v3889_v13 = vpop.f32.mrf.mxu1 }
 0xafa   :  { %v2658_v24 = vadd.f32 %v3889_v13, %v1466_v18 }
 0xafb   :  { %v2648_v53 = vpop.f32.mrf.mxu1 }
 0xafc   :  { %4134 = vtanh.f32 %v2658_v24  ;;  %v2657_v55 = vadd.f32 %v2648_v53, %v1461_v37  ;;  %v3728_v9 = vmul.f32 -1.442695, %v2658_v24 }
 0xafe   :  { %4136 = vtanh.f32 %v2657_v55  ;;  %v3727_v16 = vmul.f32 -1.442695, %v2657_v55  ;;  %v2863_v55 = vsel %vm2861_vm0, 1, %v4372_v1 }
 0xaff   :  { %4138 = vpow2.f32 %v3728_v9 }
 0xb00   :  { %4140 = vpow2.f32 %v3727_v16 }
 0xb09   :  { %v4135_v12 = vpop.eup %4134 }
 0xb0a   :  { %2679 = vrot.lane.b32.xlu1 %v4135_v12, %s4385_s15  ;;  %v2862_v12 = vsel %vm2860_vm3, 1, %v4372_v1 }
 0xb0b   :  { %v4137_v51 = vpop.eup %4136 }
 0xb0c   :  { %2677 = vrot.lane.b32.xlu0 %v4137_v51, %s4385_s15  ;;  %v4139_v35 = vpop.eup %4138 }
 0xb0d   :  { %v4141_v59 = vpop.eup %4140  ;;  %v2666_v21 = vadd.f32 1.0, %v4139_v35 }
 0xb0e   :  { %v2665_v14 = vadd.f32 1.0, %v4141_v59 }
 0xb0f   :  { %4142 = vrcp.f32 %v2666_v21 }
 0xb10   :  { %4144 = vrcp.f32 %v2665_v14 }
 0xb1c   :  { %v4143_v42 = vpop.eup %4142 }
 0xb1d   :  { %v4145_v63 = vpop.eup %4144  ;;  %v2674_v31 = vmul.f32 %v4143_v42, %v6026_v19 }
 0xb1e   :  { %v2673_v34 = vmul.f32 %v4145_v63, %v6032_v17 }
 0xb7c   :  { %v2680_v57 = vpop.permute.xlu1 %2679 }
 0xb7d   :  { %v2684_v60 = vmul.f32 %v4143_v42, %v2680_v57 }
 0xb7e   :  { %v2678_v48 = vpop.permute.xlu0 %2677 }
 0xb7f   :  { %2689 = vrot.lane.b32.xlu1 %v2684_v60, %s4388_s21  ;;  %v2683_v11 = vmul.f32 %v4145_v63, %v2678_v48 }
 0xb81   :  { %2687 = vrot.lane.b32.xlu0 %v2683_v11, %s4388_s21 }
 0xb83   :  { %2715 = vperm.xlu1 %4036, %v2710_v6  }
 0xb85   :  { %2712 = vperm.xlu0 %4037, %v2709_v50  }
 0xbf1   :  { %v2690_v29 = vpop.permute.xlu1 %2689 }
 0xbf2   :  { %v6034_v56 = vadd.f32 %v2690_v29, %v2674_v31 }
 0xbf3   :  { %v2688_v43 = vpop.permute.xlu0 %2687 }
 0xbf4   :  { %4146 = vtanh.f32 %v6034_v56  ;;  %v2693_v62 = vadd.f32 %v2688_v43, %v2673_v34  ;;  %v2108_v34 = vadd.f32 %v5903_v20, %v5899_v32 }
 0xbf6   :  { %4148 = vtanh.f32 %v2693_v62 }
 0xbfe   :  { %v2716_v5 = vpop.permute.xlu1 %2715 }
 0xbff   :  { %vm2718_vm12 = vcmp.eq.s32.totalorder %v2716_v5, 1 }
 0xc00   :  { %v2713_v58 = vpop.permute.xlu0 %2712  ;;  %v6069_v51 = vsel %vm2718_vm12, %v6034_v56, %v6026_v19 }
 0xc01   :  { %v4147_v27 = vpop.eup %4146  ;;  %vm2717_vm14 = vcmp.eq.s32.totalorder %v2713_v58, 1 }
 0xc02   :  { %2701 = vrot.lane.b32.xlu1 %v4147_v27, %s4392_s23  ;;  %v6074_v35 = vsel %vm2717_vm14, %v2693_v62, %v6032_v17  ;;  %v2103_v62 = vadd.f32 %v5903_v20, %v5901_v22 }
 0xc03   :  { %v4149_v33 = vpop.eup %4148 }
 0xc04   :  { %2699 = vrot.lane.b32.xlu0 %v4149_v33, %s4392_s23 }
 0xc74   :  { %v2702_v2 = vpop.permute.xlu1 %2701 }
 0xc75   :  { %v2706_v7 = vmul.f32 %v4143_v42, %v2702_v2 }
 0xc76   :  { %v2700_v8 = vpop.permute.xlu0 %2699 }
 0xc77   :  { %v6042_v49 = vsel %vm2718_vm12, %v2706_v7, %v5996_v52  ;;  %v2705_v28 = vmul.f32 %v4145_v63, %v2700_v8 }
 0xc78   :  { %2729 = vrot.lane.b32.xlu1 %v6042_v49, %s4393_s8 }
 0xc79   :  { %v6048_v30 = vsel %vm2717_vm14, %v2705_v28, %v6002_v61 }
 0xc7a   :  { %2727 = vrot.lane.b32.xlu0 %v6048_v30, %s4393_s8 }
 0xcea   :  { %v2730_v0 = vpop.permute.xlu1 %2729 }
 0xcec   :  { %v2728_v10 = vpop.permute.xlu0 %2727 }
 0xced   :  { %3894 = vmatprep.mubr.msk.f32.mxu0 %vm151_vm2, %v2728_v10 }
 0xcee   :  { %3895 = vmatmul.mubr.msk.f32.vlgmr.msra.gmra.mxu0 %vm151_vm2, %v2730_v0 }
 0xdae   :  { %v3896_v45 = vpop.f32.mrf.mxu0 }
 0xdaf   :  { %v2811_v36 = vadd.f32 %v3896_v45, %v1787_v47 }
 0xdb0   :  { %v2801_v54 = vpop.f32.mrf.mxu0 }
 0xdb1   :  { %4150 = vtanh.f32 %v2811_v36  ;;  %v2810_v40 = vadd.f32 %v2801_v54, %v1782_v15  ;;  %v3732_v52 = vmul.f32 -1.442695, %v2811_v36  ;;  %v3016_v15 = vsel %vm3014_vm4, 1, %v4372_v1 }
 0xdb2   :  { %v3015_v36 = vsel %vm3013_vm5, 1, %v4372_v1  ;;  %v3031_v1 = vld [vmem:[%s6201_s13 + $0x8] sm:$0xff] }
 0xdb3   :  { %4152 = vtanh.f32 %v2810_v40  ;;  %v3731_v41 = vmul.f32 -1.442695, %v2810_v40  ;;  %3904 = vmatprep.subr.mxu0 %v3031_v1 }
 0xdb4   :  { %4154 = vpow2.f32 %v3732_v52  ;;  %3905 = vmatpush3.msra.mxu0 %v3031_v1 }
 0xdb5   :  { %4156 = vpow2.f32 %v3731_v41 }
 0xdbe   :  { %v4151_v44 = vpop.eup %4150 }
 0xdbf   :  { %2832 = vrot.lane.b32.xlu1 %v4151_v44, %s4385_s15 }
 0xdc0   :  { %v4153_v38 = vpop.eup %4152 }
 0xdc1   :  { %2830 = vrot.lane.b32.xlu0 %v4153_v38, %s4385_s15  ;;  %v4155_v4 = vpop.eup %4154 }
 0xdc2   :  { %v4157_v61 = vpop.eup %4156  ;;  %v2819_v26 = vadd.f32 1.0, %v4155_v4  ;;  %v3029_v4 = vld [vmem:[#allocation13] sm:$0xff] }
 0xdc3   :  { %v2818_v25 = vadd.f32 1.0, %v4157_v61  ;;  %3911 = vmatprep.subr.mxu1 %v3029_v4 }
 0xdc4   :  { %4158 = vrcp.f32 %v2819_v26 }
 0xdc5   :  { %4160 = vrcp.f32 %v2818_v25  ;;  %v3027_v25 = vld [vmem:[%s6241_s0] sm:$0xff] }
 0xdd1   :  { %v4159_v23 = vpop.eup %4158 }
 0xdd2   :  { %v4161_v37 = vpop.eup %4160  ;;  %v2827_v9 = vmul.f32 %v4159_v23, %v6069_v51 }
 0xdd3   :  { %v2826_v21 = vmul.f32 %v4161_v37, %v6074_v35 }
 0xe31   :  { %v2833_v18 = vpop.permute.xlu1 %2832 }
 0xe32   :  { %v2837_v13 = vmul.f32 %v4159_v23, %v2833_v18  ;;  %v3028_v18 = vld [vmem:[%s6241_s0 + $0x8] sm:$0xff] }
 0xe33   :  { %v2831_v24 = vpop.permute.xlu0 %2830 }
 0xe34   :  { %2842 = vrot.lane.b32.xlu1 %v2837_v13, %s4388_s21  ;;  %v2836_v53 = vmul.f32 %v4161_v37, %v2831_v24 }
 0xe36   :  { %2840 = vrot.lane.b32.xlu0 %v2836_v53, %s4388_s21 }
 0xe38   :  { %2868 = vperm.xlu1 %4036, %v2863_v55  }
 0xe3a   :  { %2865 = vperm.xlu0 %4037, %v2862_v12  }
 0xea6   :  { %v2843_v16 = vpop.permute.xlu1 %2842 }
 0xea7   :  { %v6076_v59 = vadd.f32 %v2843_v16, %v2827_v9  ;;  %v3383_v16 = vld [vmem:[%s6194_s6] sm:$0xff] }
 0xea8   :  { %v2841_v14 = vpop.permute.xlu0 %2840 }
 0xea9   :  { %4162 = vtanh.f32 %v6076_v59  ;;  %v2846_v42 = vadd.f32 %v2841_v14, %v2826_v21  ;;  %v3299_v21 = vld [vmem:[#allocation7] sm:$0xff] }
 0xeab   :  { %4164 = vtanh.f32 %v2846_v42 }
 0xeb3   :  { %v2869_v63 = vpop.permute.xlu1 %2868 }
 0xeb4   :  { %vm2871_vm15 = vcmp.eq.s32.totalorder %v2869_v63, 1 }
 0xeb5   :  { %v2866_v48 = vpop.permute.xlu0 %2865  ;;  %v2875_v54 = vsel %vm2871_vm15, %v6076_v59, %v6069_v51 }
 0xeb6   :  { %v4163_v57 = vpop.eup %4162  ;;  %vm2870_vm13 = vcmp.eq.s32.totalorder %v2866_v48, 1 }
 0xeb7   :  { %2854 = vrot.lane.b32.xlu1 %v4163_v57, %s4392_s23  ;;  %v2874_v44 = vsel %vm2870_vm13, %v2846_v42, %v6074_v35  ;;  %v3741_v57 = vld [vmem:[%s6202_s14] ss:$0 sm:$0xff] }
 0xeb8   :  { %v4165_v60 = vpop.eup %4164 }
 0xeb9   :  { %2852 = vrot.lane.b32.xlu0 %v4165_v60, %s4392_s23  ;;  %v6242_v60 = vlaneseq }
 0xebb   :  { %v3211_v63 = vshrl.u32 %v6242_v60, 7 }
 0xf29   :  { %v2855_v11 = vpop.permute.xlu1 %2854 }
 0xf2a   :  { %v2859_v6 = vmul.f32 %v4159_v23, %v2855_v11  ;;  %v3030_v23 = vld [vmem:[%s6201_s13] sm:$0xff]  ;;  %v3742_v11 = vld [vmem:[#allocation4] ss:$0 sm:$0xff] }
 0xf2b   :  { %v2853_v50 = vpop.permute.xlu0 %2852  ;;  %3906 = vmatprep.subr.mxu0 %v3030_v23  ;;  %vm3217_vm8 = vcmp.eq.s32.totalorder %v3211_v63, %v3742_v11 }
 0xf2c   :  { %v6084_v19 = vsel %vm2871_vm15, %v2859_v6, %v6042_v49  ;;  %v2858_v31 = vmul.f32 %v4161_v37, %v2853_v50  ;;  %3907 = vmatpush3.msra.mxu0 %v3030_v23 }
 0xf2d   :  { %2882 = vrot.lane.b32.xlu1 %v6084_v19, %s4393_s8  ;;  %3916 = vmatprep.subr.mxu0 %v4383_v39 }
 0xf2e   :  { %v6090_v29 = vsel %vm2870_vm13, %v2858_v31, %v6048_v30 }
 0xf2f   :  { %2880 = vrot.lane.b32.xlu0 %v6090_v29, %s4393_s8 }
 0xf9f   :  { %v2883_v56 = vpop.permute.xlu1 %2882 }
 0xfa1   :  { %v2881_v17 = vpop.permute.xlu0 %2880 }
 0xfa2   :  { %3901 = vmatprep.mubr.msk.f32.mxu1 %vm151_vm2, %v2881_v17 }
 0xfa3   :  { %3902 = vmatmul.mubr.msk.f32.vlgmr.msra.gmra.mxu1 %vm151_vm2, %v2883_v56 }
 0xfa4   :  { %3912 = vmatpush3.msra.mxu1 %v3029_v4  ;;  %3913 = vmatprep.mubr.msk.f32.mxu1 %vm3117_vm10, %v3027_v25 }
 0xfa5   :  { %3923 = vmatprep.subr.mxu1 %v4383_v39 }
 0xfa7   :  { %3914 = vmatmul.mubr.msk.f32.vlgmr.msra.gmra.mxu1 %vm3117_vm10, %v3028_v18 }
 0xfa8   :  { %3924 = vmatpush3.msra.mxu1 %v3029_v4  ;;  %3925 = vmatprep.mubr.msk.f32.mxu1 %vm4394_vm7, %v4383_v39 }
 0xfa9   :  { %3935 = vmatprep.subr.mxu1 %v4383_v39 }
 0xfab   :  { %3926 = vmatmul.mubr.msk.f32.vlgmr.msra.gmra.mxu1 %vm3117_vm10, %v3299_v21 }
 0xfac   :  { %3937 = vmatprep.mubr.msk.f32.mxu1 %vm4394_vm7, %v4383_v39 }
0x1063   :  { %v3903_v43 = vpop.f32.mrf.mxu1 }
0x1064   :  { %v2964_v27 = vadd.f32 %v3903_v43, %v2108_v34  ;;  %v3743_v34 = vsel %vm3217_vm8, 1.0, %v4383_v39 }
0x1065   :  { %v2954_v33 = vpop.f32.mrf.mxu1 }
0x1066   :  { %4166 = vtanh.f32 %v2964_v27  ;;  %v2963_v5 = vadd.f32 %v2954_v33, %v2103_v62  ;;  %v3736_v7 = vmul.f32 -1.442695, %v2964_v27  ;;  %v3392_v27 = vld [vmem:[%s6204_s16 + $0x8] sm:$0xff]  ;;  %v3390_v33 = vld [vmem:[#allocation15] sm:$0xff] }
0x1067   :  { %v3915_v14 = vpop.f32.mrf.mxu1  ;;  %3936 = vmatpush3.msra.mxu1 %v3390_v33 }
0x1068   :  { %4168 = vtanh.f32 %v2963_v5  ;;  %v3735_v8 = vmul.f32 -1.442695, %v2963_v5  ;;  %v3391_v5 = vld [vmem:[%s6204_s16] sm:$0xff]  ;;  %3938 = vmatmul.mubr.msk.f32.vlgmr.msra.gmra.mxu1 %vm3117_vm10, %v3299_v21 }
0x1069   :  { %4170 = vpow2.f32 %v3736_v7  ;;  %v3190_v6 = vpop.f32.mrf.mxu1 }
0x106a   :  { %4172 = vpow2.f32 %v3735_v8 }
0x106b   :  { %v3377_v43 = vpop.f32.mrf.mxu1 }
0x106d   :  { %v3927_v62 = vpop.f32.mrf.mxu1 }
0x1073   :  { %v4167_v58 = vpop.eup %4166 }
0x1074   :  { %2985 = vrot.lane.b32.xlu1 %v4167_v58, %s4385_s15  ;;  %v3220_v58 = vld [vmem:[#allocation2] sm:$0xff] }
0x1075   :  { %v4169_v2 = vpop.eup %4168 }
0x1076   :  { %2983 = vrot.lane.b32.xlu0 %v4169_v2, %s4385_s15  ;;  %v4171_v32 = vpop.eup %4170 }
0x1077   :  { %v4173_v49 = vpop.eup %4172  ;;  %v2972_v28 = vadd.f32 1.0, %v4171_v32  ;;  %v3378_v32 = vadd.f32 %v3741_v57, %v3377_v43 }
0x1078   :  { %v2971_v30 = vadd.f32 1.0, %v4173_v49 }
0x1079   :  { %4174 = vrcp.f32 %v2972_v28 }
0x107a   :  { %4176 = vrcp.f32 %v2971_v30 }
0x1086   :  { %v4175_v22 = vpop.eup %4174 }
0x1087   :  { %v4177_v0 = vpop.eup %4176  ;;  %v2980_v46 = vmul.f32 %v4175_v22, %v2875_v54 }
0x1088   :  { %v2979_v52 = vmul.f32 %v4177_v0, %v2874_v44  ;;  %v3750_v44 = vld [vmem:[%s6207_s19] ss:$0 sm:$0xff] }
0x10e6   :  { %v2986_v20 = vpop.permute.xlu1 %2985 }
0x10e7   :  { %v2990_v10 = vmul.f32 %v4175_v22, %v2986_v20 }
0x10e8   :  { %v2984_v47 = vpop.permute.xlu0 %2983 }
0x10e9   :  { %2995 = vrot.lane.b32.xlu1 %v2990_v10, %s4388_s21  ;;  %v2989_v45 = vmul.f32 %v4177_v0, %v2984_v47  ;;  %v3545_v47 = vld [vmem:[%s6206_s18] sm:$0xff] }
0x10eb   :  { %2993 = vrot.lane.b32.xlu0 %v2989_v45, %s4388_s21 }
0x10ed   :  { %3021 = vperm.xlu1 %4036, %v3016_v15   ;;  %v3749_v15 = vld [vmem:[%s6205_s17] ss:$0 sm:$0xff] }
0x10ef   :  { %3018 = vperm.xlu0 %4037, %v3015_v36  }
0x1128   :  { %v3532_v20 = vpop.f32.mrf.mxu1 }
0x112a   :  { %v3939_v10 = vpop.f32.mrf.mxu1 }
0x115b   :  { %v2996_v40 = vpop.permute.xlu1 %2995 }
0x115c   :  { %v3000_v38 = vadd.f32 %v2996_v40, %v2980_v46 }
0x115d   :  { %v2994_v41 = vpop.permute.xlu0 %2993 }
0x115e   :  { %4178 = vtanh.f32 %v3000_v38  ;;  %v2999_v3 = vadd.f32 %v2994_v41, %v2979_v52 }
0x1160   :  { %4180 = vtanh.f32 %v2999_v3 }
0x1168   :  { %v3022_v13 = vpop.permute.xlu1 %3021 }
0x1169   :  { %vm3024_vm6 = vcmp.eq.s32.totalorder %v3022_v13, 1 }
0x116a   :  { %v3019_v37 = vpop.permute.xlu0 %3018 }
0x116b   :  { %v4179_v61 = vpop.eup %4178  ;;  %vm3023_vm1 = vcmp.eq.s32.totalorder %v3019_v37, 1 }
0x116c   :  { %3007 = vrot.lane.b32.xlu1 %v4179_v61, %s4392_s23 }
0x116d   :  { %v4181_v26 = vpop.eup %4180 }
0x116e   :  { %3005 = vrot.lane.b32.xlu0 %v4181_v26, %s4392_s23 }
0x11de   :  { %v3008_v24 = vpop.permute.xlu1 %3007 }
0x11df   :  { %v3012_v53 = vmul.f32 %v4175_v22, %v3008_v24 }
0x11e0   :  { %v3006_v55 = vpop.permute.xlu0 %3005 }
0x11e1   :  { %v3026_v12 = vsel %vm3024_vm6, %v3012_v53, %v6084_v19  ;;  %v3011_v51 = vmul.f32 %v4177_v0, %v3006_v55  ;;  %v3546_v0 = vld [vmem:[%s6206_s18 + $0x8] sm:$0xff]  ;;  %s4395_s18 = smov [#allocation16]  }
0x11e2   :  { %3036 = vrot.lane.b32.xlu1 %v3026_v12, %s4393_s8  ;;  %s3634_s28 = sshll.u32 %s4395_s18, 4  ;;  %s3635_s28 = int_to_ptr.vmem [resolvable:$true] %s3634_s28 }
0x11e3   :  { %v3025_v9 = vsel %vm3023_vm1, %v3011_v51, %v6090_v29  ;;  %s4334_s25 = scalar_lea.vmem %s3635_s28, 128  ;;  %p4339_p8 = scmp.lt.s32.totalorder %s3635_s28, %s3635_s28 }
0x11e4   :  { %3034 = vrot.lane.b32.xlu0 %v3025_v9, %s4393_s8  ;;  %p4335_p7 = scmp.ne.s32.totalorder %s3635_s28, %s4334_s25  ;;  %p4340_p9 = scmp.lt.s32.totalorder %s4334_s25, %s4334_s25 }
0x11e6   :  { %p4341_p10 = por %p4340_p9, %p4339_p8 }
0x11e8   :  { %3386 = vperm.xlu0 %4037, %v3383_v16   ;;  %p4342_p11 = pnand %p4341_p10, %p4335_p7 }
0x1254   :  { %v3037_v59 = vpop.permute.xlu1 %3036 }
0x1256   :  { %v3035_v35 = vpop.permute.xlu0 %3034 }
0x1257   :  { %3908 = vmatprep.mubr.msk.f32.mxu0 %vm151_vm2, %v3035_v35 }
0x1258   :  { %3909 = vmatmul.mubr.msk.f32.vlgmr.msra.gmra.mxu0 %vm151_vm2, %v3037_v59 }
0x1259   :  { %3920 = vmatprep.mubr.msk.f32.mxu0 %vm4394_vm7, %v4383_v39 }
0x1263   :  { %v3387_v30 = vpop.permute.xlu0 %3386 }
0x1318   :  { %v3910_v42 = vpop.f32.mrf.mxu0 }
0x1319   :  { %v3196_v48 = vadd.f32 %v3915_v14, %v3910_v42 }
0x131a   :  { %v3108_v50 = vpop.f32.mrf.mxu0 }
0x131b   :  { %v3207_v19 = vadd.f32 %v3741_v57, %v3196_v48  ;;  %v3191_v31 = vadd.f32 %v3190_v6, %v3108_v50 }
0x131d   :  { %v3209_v29 = vmax.f32 %v3207_v19, 0.0  ;;  %v3206_v17 = vadd.f32 %v3741_v57, %v3191_v31 }
0x131f   :  { %v3208_v56 = vmax.f32 %v3206_v17, 0.0  ;;  %3917 = vmatpush3.msra.mxu0 %v3209_v29 }
0x1320   :  { %3918 = vmatprep.subr.mxu0 %v4383_v39 }
0x1321   :  { %3919 = vmatpush3.msra.mxu0 %v3208_v56 }
0x1322   :  { %3921 = vmatmul.mubr.msk.f32.vlgmr.msra.gmra.mxu0 %vm151_vm2, %v3743_v34  ;;  %3928 = vmatprep.subr.mxu0 %v4383_v39 }
0x1323   :  { %3932 = vmatprep.mubr.msk.f32.mxu0 %vm4394_vm7, %v4383_v39  ;;  %3929 = vmatpush3.msra.mxu0 %v3392_v27 }
0x1324   :  { %3930 = vmatprep.subr.mxu0 %v4383_v39 }
0x1325   :  { %3931 = vmatpush3.msra.mxu0 %v3391_v5 }
0x1326   :  { %3940 = vmatprep.subr.mxu0 %v4383_v39 }
0x13e2   :  { %v3290_v2 = vpop.f32.mrf.mxu0 }
0x13e3   :  { %v3294_v7 = vadd.f32 %v3290_v2, %v3220_v58 }
0x13e4   :  { %v3922_v8 = vpop.f32.mrf.mxu0 }
0x13e5   :  { %3295 = vst.msk [vmem:[#allocation2] sm:$0xff] %vm151_vm2, %v3294_v7 }
0x13ec   :  { %v3381_v49 = vld [vmem:[#allocation2] sm:$0xff] }
0x13ed   :  { %v3382_v28 = vsub.f32 %v3381_v49, %v3378_v32 }
0x13ef   :  { %v3389_v22 = vmul.f32 %v3387_v30, %v3382_v28 }
0x13f1   :  { %3933 = vmatmul.mubr.msk.f32.vlgmr.msra.gmra.mxu0 %vm151_vm2, %v3389_v22 }
0x13f2   :  { %3944 = vmatprep.mubr.msk.f32.mxu0 %vm4394_vm7, %v4383_v39  ;;  %3941 = vmatpush3.msra.mxu0 %v3546_v0 }
0x13f3   :  { %3942 = vmatprep.subr.mxu0 %v4383_v39 }
0x13f4   :  { %3943 = vmatpush3.msra.mxu0 %v3545_v47 }
0x14b1   :  { %v3462_v45 = vpop.f32.mrf.mxu0 }
0x14b2   :  { %v3533_v36 = vadd.f32 %v3532_v20, %v3462_v45 }
0x14b3   :  { %v3934_v54 = vpop.f32.mrf.mxu0 }
0x14b4   :  { %v3543_v46 = vadd.f32 %v3749_v15, %v3533_v36 }
0x14b6   :  { %v3544_v40 = vmax.f32 %v3543_v46, 0.0 }
0x14b8   :  { %3945 = vmatmul.mubr.msk.f32.vlgmr.msra.gmra.mxu0 %vm151_vm2, %v3544_v40 }
0x1578   :  { %v3623_v38 = vpop.f32.mrf.mxu0 }
0x1579   :  { %v3624_v39 = vadd.f32 %v3750_v44, %v3623_v38 }
0x157a   :  { %v3946_v52 = vpop.f32.mrf.mxu0 }
0x157b   :  { %3627 = vst [vmem:[#allocation16] sm:$0xff] %v3624_v39 }
0x157c   :  { %4345 = shalt.err (!%p4342_p11)
}
0x157d   :  { %3637 = dma.vmem_to_hbm [thread:$0]  %s3635_s28, 128, %s6208_s20, [#allocation6]  }
0x157e   :  { %4362 = dma.done.wait [#allocation6], 128  }
0x157f   :  { %4363 = vsyncadd [#allocation6], 4294967168 }
0x1580   :  { %3641 = vsyncpa [#allocation5], 1 }
0x1581   :  { %3642 = vsyncpa [#allocation8], 1 }
0x1582   :  { %3643 = vsyncpa [#allocation11], 1 }
0x1583   :  { %3644 = vsyncpa [#allocation14], 1 }
0x1584   :  { %3645 = vsyncpa [#allocation6], 1 }

</bundles_post_ra>
